<compile_context>
chip_gen: v7x
topology: tpu7x:2x2x1
jax: 0.10.0
libtpu: 0.0.40
codegen_flags: <defaults>
</compile_context>

<pallas_src>
import functools

import jax
import jax.numpy as jnp
from jax import lax
from jax.experimental import pallas as pl
from jax.experimental.pallas import tpu as pltpu


def _mlp_kernel(x_ref,
                w1_ref, b1_ref,
                w2_ref, b2_ref,
                w3_ref, b3_ref,
                w4t_ref, b4_ref,
                o_ref):
    """Fused 4-layer MLP: (Linear+ReLU) x3 -> Linear; lane-dense [1, TB] out."""
    # x arrives f32; cast to the matmul compute dtype (bf16 by default)
    # in-kernel — a cheap VPU op hidden under the MXU — instead of a separate
    # XLA cast pass that would re-read/re-write the whole batch in HBM.
    x = x_ref[...].astype(w1_ref.dtype)

    # layer1: [TB, F] @ [F, 128] + [1, 128], ReLU (f32 accumulate + bias).
    # dropout(p=0.4) -> identity in eval/inference mode (no RNG, no scaling).
    h = jnp.dot(x, w1_ref[...], preferred_element_type=jnp.float32) + b1_ref[...]
    h = jnp.maximum(h, 0.0)

    # layer2: [TB, 128] @ [128, 64] + [1, 64], ReLU.
    h = jnp.dot(h.astype(w2_ref.dtype), w2_ref[...],
                preferred_element_type=jnp.float32) + b2_ref[...]
    h = jnp.maximum(h, 0.0)

    # layer3: [TB, 64] @ [64, 32] + [1, 32], ReLU.
    h = jnp.dot(h.astype(w3_ref.dtype), w3_ref[...],
                preferred_element_type=jnp.float32) + b3_ref[...]
    h = jnp.maximum(h, 0.0)

    # output layer: contract the 32 hidden features against the w4 row so the
    # result lands directly as a lane-dense [1, TB] row (batch on the lane
    # axis) instead of a [TB, 1] column of masked 4-byte partial stores. Any
    # relayout of h this implies goes through the XLU, whose issue slot is
    # free under the MXU work of layers 1-3.
    row = lax.dot_general(w4t_ref[...], h,
                          (((1,), (1,)), ((), ())),
                          preferred_element_type=jnp.float32) + b4_ref[...]
    o_ref[...] = row.astype(o_ref.dtype)


def _round_up(x, m):
    return (x + m - 1) // m * m


def _num_tensorcores():
    """2 on v7x-class chips (two TensorCores per chip), else 1."""
    try:
        kind = (jax.devices()[0].device_kind or "").lower()
    except Exception:
        return 1
    return 2 if ("v7" in kind or "7x" in kind) else 1


@functools.partial(jax.jit, static_argnames=("tile_b", "use_bf16"))
def ann_model_forward(x, params, tile_b=2048, use_bf16=True):
    """x: [B, input_size] float32; params: dict of weights/biases -> [B, 1]."""
    B, F = x.shape
    w1, b1 = params["w1"], params["b1"]
    w2, b2 = params["w2"], params["b2"]
    w3, b3 = params["w3"], params["b3"]
    w4, b4 = params["w4"], params["b4"]
    w4t = w4.T  # [1, 32] row for the lane-dense final contraction.

    # Small batches: fixed pallas_call + custom-call + reshape overhead dwarfs
    # the <1 MFLOP of work; let XLA fuse the four small matmuls instead.
    if B < 512:
        h = jnp.maximum(x @ w1 + b1, 0.0)
        h = jnp.maximum(h @ w2 + b2, 0.0)
        h = jnp.maximum(h @ w3 + b3, 0.0)
        return h @ w4 + b4

    # Batch tile: as large as possible (amortizes the ~0.35 us/step overhead
    # and fills the MXU M-dimension), multiple of 128 (lane-dense output rows,
    # unmasked stores). Force >= 2 grid steps only on multi-TC chips (v7x) so
    # dimension_semantics=("parallel",) can actually shard across cores; on
    # v5e/v6e a split would just double step overhead for zero benefit.
    splits = 2 if _num_tensorcores() >= 2 else 1
    tile = max(128, min(int(tile_b), _round_up(pl.cdiv(B, splits), 128)))
    num_tiles = pl.cdiv(B, tile)

    # bf16 matmul operands (MXU-native on v5e/v6e/v7x) with f32 accumulation;
    # biases, w4t, b4 stay f32 so bias-add / ReLU / final row are f32.
    compute_dtype = jnp.bfloat16 if use_bf16 else x.dtype
    w1c, w2c, w3c = (w.astype(compute_dtype) for w in (w1, w2, w3))
    # x is passed as-is (f32) and cast inside the kernel.

    def full_spec(arr):
        # Constant index_map: the operand is fetched once and never revolves.
        return pl.BlockSpec(arr.shape, lambda i: (0, 0))

    flops = 2 * B * (F * 128 + 128 * 64 + 64 * 32 + 32 * 1)
    bytes_accessed = (
        x.size * x.dtype.itemsize                       # streamed x
        + num_tiles * tile * 4                          # output rows
        + sum(a.size * a.dtype.itemsize
              for a in (w1c, b1, w2c, b2, w3c, b3, w4t, b4)))

    out_padded = pl.pallas_call(
        _mlp_kernel,
        out_shape=jax.ShapeDtypeStruct((num_tiles, tile), jnp.float32),
        grid_spec=pltpu.PrefetchScalarGridSpec(
            num_scalar_prefetch=0,
            grid=(num_tiles,),
            in_specs=[
                pl.BlockSpec((tile, F), lambda i: (i, 0)),  # x tile over batch
                full_spec(w1c), full_spec(b1),
                full_spec(w2c), full_spec(b2),
                full_spec(w3c), full_spec(b3),
                full_spec(w4t), full_spec(b4),
            ],
            # Lane-dense output: one [1, tile] row per grid step.
            out_specs=pl.BlockSpec((1, tile), lambda i: (i, 0)),
        ),
        compiler_params=pltpu.CompilerParams(
            dimension_semantics=("parallel",),
            vmem_limit_bytes=32 * 1024 * 1024),
        cost_estimate=pl.CostEstimate(
            flops=flops, transcendentals=0, bytes_accessed=bytes_accessed),
    )(x, w1c, b1, w2c, b2, w3c, b3, w4t, b4)

    # [num_tiles, tile] row-major == padded batch order; trim any tail padding
    # (rows past B come from OOB block padding and are garbage -> dropped) and
    # restore the [B, 1] module output shape.
    return out_padded.reshape(-1)[:B].reshape(B, 1)


def init_params(key, input_size):
    """Deterministic init mimicking PyTorch nn.Linear (uniform +-1/sqrt(fan_in))."""
    dims = [(input_size, 128), (128, 64), (64, 32), (32, 1)]
    params = {}
    keys = jax.random.split(key, 2 * len(dims))
    for idx, (fan_in, fan_out) in enumerate(dims):
        bound = 1.0 / jnp.sqrt(float(fan_in))
        w = jax.random.uniform(keys[2 * idx], (fan_in, fan_out),
                               minval=-bound, maxval=bound, dtype=jnp.float32)
        b = jax.random.uniform(keys[2 * idx + 1], (1, fan_out),
                               minval=-bound, maxval=bound, dtype=jnp.float32)
        params[f"w{idx + 1}"] = w
        params[f"b{idx + 1}"] = b
    return params


def reference_forward(x, params):
    """Pure-JAX f32 reference for correctness checking."""
    h = jnp.maximum(x @ params["w1"] + params["b1"], 0.0)
    h = jnp.maximum(h @ params["w2"] + params["b2"], 0.0)
    h = jnp.maximum(h @ params["w3"] + params["b3"], 0.0)
    return h @ params["w4"] + params["b4"]


if __name__ == "__main__":
    key = jax.random.PRNGKey(0)
    k_params, k_x = jax.random.split(key)

    input_size = 32   # "number of tabular features" in the original module
    batch = 1024      # >= bypass threshold so the Pallas path is exercised

    params = init_params(k_params, input_size)
    x = jax.random.normal(k_x, (batch, input_size), dtype=jnp.float32)

    ref = reference_forward(x, params)

    # Default (bf16 matmul operands, f32 accumulation) Pallas path.
    out = jax.block_until_ready(ann_model_forward(x, params))
    assert out.shape == (batch, 1), out.shape
    assert jnp.allclose(out, ref, atol=3e-2, rtol=3e-2), "bf16 path mismatch"

    # Full-f32 Pallas path: must match the reference tightly.
    out_f32 = jax.block_until_ready(ann_model_forward(x, params, use_bf16=False))
    assert jnp.allclose(out_f32, ref, atol=1e-4, rtol=1e-4), "f32 path mismatch"

    print("KERNEL_OK")
</pallas_src>

<mosaic_0001>
module attributes {stable_mosaic.version = 11 : i64} {
  func.func @_mlp_kernel(%arg0: i32, %arg1: memref<1024x32xf32, #tpu.memory_space<vmem>>, %arg2: memref<32x128xbf16, #tpu.memory_space<vmem>>, %arg3: memref<1x128xf32, #tpu.memory_space<vmem>>, %arg4: memref<128x64xbf16, #tpu.memory_space<vmem>>, %arg5: memref<1x64xf32, #tpu.memory_space<vmem>>, %arg6: memref<64x32xbf16, #tpu.memory_space<vmem>>, %arg7: memref<1x32xf32, #tpu.memory_space<vmem>>, %arg8: memref<1x32xf32, #tpu.memory_space<vmem>>, %arg9: memref<1x1xf32, #tpu.memory_space<vmem>>, %arg10: memref<1x1024xf32, #tpu.memory_space<vmem>>) attributes {dimension_semantics = [#tpu.dimension_semantics<parallel>], iteration_bounds = array<i64: 1>, scalar_prefetch = 0 : i64, scratch_operands = 0 : i64, tpu.core_type = #tpu.core_type<tc>, window_params = [{transform_indices = @transform_0, window_bounds = array<i64: 1024, 32>}, {pipeline_mode = #tpu.pipeline_mode<synchronous>, transform_indices = @transform_1, window_bounds = array<i64: 32, 128>}, {pipeline_mode = #tpu.pipeline_mode<synchronous>, transform_indices = @transform_2, window_bounds = array<i64: 1, 128>}, {pipeline_mode = #tpu.pipeline_mode<synchronous>, transform_indices = @transform_3, window_bounds = array<i64: 128, 64>}, {pipeline_mode = #tpu.pipeline_mode<synchronous>, transform_indices = @transform_4, window_bounds = array<i64: 1, 64>}, {pipeline_mode = #tpu.pipeline_mode<synchronous>, transform_indices = @transform_5, window_bounds = array<i64: 64, 32>}, {pipeline_mode = #tpu.pipeline_mode<synchronous>, transform_indices = @transform_6, window_bounds = array<i64: 1, 32>}, {pipeline_mode = #tpu.pipeline_mode<synchronous>, transform_indices = @transform_7, window_bounds = array<i64: 1, 32>}, {pipeline_mode = #tpu.pipeline_mode<synchronous>, transform_indices = @transform_8, window_bounds = array<i64: 1, 1>}, {transform_indices = @transform_9, window_bounds = array<i64: 1, 1024>}]} {
    %c0 = arith.constant 0 : index
    %c0_0 = arith.constant 0 : index
    %0 = vector.load %arg1[%c0, %c0_0] : memref<1024x32xf32, #tpu.memory_space<vmem>>, vector<1024x32xf32>
    %1 = arith.truncf %0 : vector<1024x32xf32> to vector<1024x32xbf16>
    %c0_1 = arith.constant 0 : index
    %c0_2 = arith.constant 0 : index
    %2 = vector.load %arg2[%c0_1, %c0_2] : memref<32x128xbf16, #tpu.memory_space<vmem>>, vector<32x128xbf16>
    %cst = arith.constant dense<0.000000e+00> : vector<1024x128xf32>
    %3 = tpu.matmul %1, %2, %cst {dimension_numbers = #tpu.dot_dimension_numbers<[1], [0], [0], [1], [0, 0, 1, 1], [], []>} : vector<1024x32xbf16>, vector<32x128xbf16>, vector<1024x128xf32> -> vector<1024x128xf32>
    %c0_3 = arith.constant 0 : index
    %c0_4 = arith.constant 0 : index
    %4 = vector.load %arg3[%c0_3, %c0_4] : memref<1x128xf32, #tpu.memory_space<vmem>>, vector<1x128xf32>
    %5 = vector.broadcast %4 : vector<1x128xf32> to vector<1024x128xf32>
    %6 = arith.addf %3, %5 : vector<1024x128xf32>
    %cst_5 = arith.constant 0.000000e+00 : f32
    %7 = vector.broadcast %cst_5 : f32 to vector<1024x128xf32>
    %8 = arith.maximumf %6, %7 : vector<1024x128xf32>
    %9 = arith.truncf %8 : vector<1024x128xf32> to vector<1024x128xbf16>
    %c0_6 = arith.constant 0 : index
    %c0_7 = arith.constant 0 : index
    %10 = vector.load %arg4[%c0_6, %c0_7] : memref<128x64xbf16, #tpu.memory_space<vmem>>, vector<128x64xbf16>
    %cst_8 = arith.constant dense<0.000000e+00> : vector<1024x64xf32>
    %11 = tpu.matmul %9, %10, %cst_8 {dimension_numbers = #tpu.dot_dimension_numbers<[1], [0], [0], [1], [0, 0, 1, 1], [], []>} : vector<1024x128xbf16>, vector<128x64xbf16>, vector<1024x64xf32> -> vector<1024x64xf32>
    %c0_9 = arith.constant 0 : index
    %c0_10 = arith.constant 0 : index
    %12 = vector.load %arg5[%c0_9, %c0_10] : memref<1x64xf32, #tpu.memory_space<vmem>>, vector<1x64xf32>
    %13 = vector.broadcast %12 : vector<1x64xf32> to vector<1024x64xf32>
    %14 = arith.addf %11, %13 : vector<1024x64xf32>
    %cst_11 = arith.constant 0.000000e+00 : f32
    %15 = vector.broadcast %cst_11 : f32 to vector<1024x64xf32>
    %16 = arith.maximumf %14, %15 : vector<1024x64xf32>
    %17 = arith.truncf %16 : vector<1024x64xf32> to vector<1024x64xbf16>
    %c0_12 = arith.constant 0 : index
    %c0_13 = arith.constant 0 : index
    %18 = vector.load %arg6[%c0_12, %c0_13] : memref<64x32xbf16, #tpu.memory_space<vmem>>, vector<64x32xbf16>
    %cst_14 = arith.constant dense<0.000000e+00> : vector<1024x32xf32>
    %19 = tpu.matmul %17, %18, %cst_14 {dimension_numbers = #tpu.dot_dimension_numbers<[1], [0], [0], [1], [0, 0, 1, 1], [], []>} : vector<1024x64xbf16>, vector<64x32xbf16>, vector<1024x32xf32> -> vector<1024x32xf32>
    %c0_15 = arith.constant 0 : index
    %c0_16 = arith.constant 0 : index
    %20 = vector.load %arg7[%c0_15, %c0_16] : memref<1x32xf32, #tpu.memory_space<vmem>>, vector<1x32xf32>
    %21 = vector.broadcast %20 : vector<1x32xf32> to vector<1024x32xf32>
    %22 = arith.addf %19, %21 : vector<1024x32xf32>
    %cst_17 = arith.constant 0.000000e+00 : f32
    %23 = vector.broadcast %cst_17 : f32 to vector<1024x32xf32>
    %24 = arith.maximumf %22, %23 : vector<1024x32xf32>
    %c0_18 = arith.constant 0 : index
    %c0_19 = arith.constant 0 : index
    %25 = vector.load %arg8[%c0_18, %c0_19] : memref<1x32xf32, #tpu.memory_space<vmem>>, vector<1x32xf32>
    %cst_20 = arith.constant dense<0.000000e+00> : vector<1x1024xf32>
    %26 = tpu.matmul %25, %24, %cst_20 {dimension_numbers = #tpu.dot_dimension_numbers<[1], [1], [0], [0], [0, 0, 1, 0], [], []>} : vector<1x32xf32>, vector<1024x32xf32>, vector<1x1024xf32> -> vector<1x1024xf32>
    %c0_21 = arith.constant 0 : index
    %c0_22 = arith.constant 0 : index
    %27 = vector.load %arg9[%c0_21, %c0_22] : memref<1x1xf32, #tpu.memory_space<vmem>>, vector<1x1xf32>
    %28 = vector.broadcast %27 : vector<1x1xf32> to vector<1x1024xf32>
    %29 = arith.addf %26, %28 : vector<1x1024xf32>
    %c0_23 = arith.constant 0 : index
    %c0_24 = arith.constant 0 : index
    %30 = vector.load %arg10[%c0_23, %c0_24] : memref<1x1024xf32, #tpu.memory_space<vmem>>, vector<1x1024xf32>
    tpu.vector_store %arg10[%c0_23, %c0_24], %29 {strides = array<i32>} : memref<1x1024xf32, #tpu.memory_space<vmem>>, vector<1x1024xf32>,
    return
  }
  func.func @transform_0(%arg0: i32) -> (i32, i32) {
    %c0_i32 = arith.constant 0 : i32
    %c0_i32_0 = arith.constant 0 : i32
    return %arg0, %c0_i32 : i32, i32
  }
  func.func @transform_1(%arg0: i32) -> (i32, i32) {
    %c0_i32 = arith.constant 0 : i32
    %c0_i32_0 = arith.constant 0 : i32
    %c0_i32_1 = arith.constant 0 : i32
    return %c0_i32, %c0_i32_0 : i32, i32
  }
  func.func @transform_2(%arg0: i32) -> (i32, i32) {
    %c0_i32 = arith.constant 0 : i32
    %c0_i32_0 = arith.constant 0 : i32
    %c0_i32_1 = arith.constant 0 : i32
    return %c0_i32, %c0_i32_0 : i32, i32
  }
  func.func @transform_3(%arg0: i32) -> (i32, i32) {
    %c0_i32 = arith.constant 0 : i32
    %c0_i32_0 = arith.constant 0 : i32
    %c0_i32_1 = arith.constant 0 : i32
    return %c0_i32, %c0_i32_0 : i32, i32
  }
  func.func @transform_4(%arg0: i32) -> (i32, i32) {
    %c0_i32 = arith.constant 0 : i32
    %c0_i32_0 = arith.constant 0 : i32
    %c0_i32_1 = arith.constant 0 : i32
    return %c0_i32, %c0_i32_0 : i32, i32
  }
  func.func @transform_5(%arg0: i32) -> (i32, i32) {
    %c0_i32 = arith.constant 0 : i32
    %c0_i32_0 = arith.constant 0 : i32
    %c0_i32_1 = arith.constant 0 : i32
    return %c0_i32, %c0_i32_0 : i32, i32
  }
  func.func @transform_6(%arg0: i32) -> (i32, i32) {
    %c0_i32 = arith.constant 0 : i32
    %c0_i32_0 = arith.constant 0 : i32
    %c0_i32_1 = arith.constant 0 : i32
    return %c0_i32, %c0_i32_0 : i32, i32
  }
  func.func @transform_7(%arg0: i32) -> (i32, i32) {
    %c0_i32 = arith.constant 0 : i32
    %c0_i32_0 = arith.constant 0 : i32
    %c0_i32_1 = arith.constant 0 : i32
    return %c0_i32, %c0_i32_0 : i32, i32
  }
  func.func @transform_8(%arg0: i32) -> (i32, i32) {
    %c0_i32 = arith.constant 0 : i32
    %c0_i32_0 = arith.constant 0 : i32
    %c0_i32_1 = arith.constant 0 : i32
    return %c0_i32, %c0_i32_0 : i32, i32
  }
  func.func @transform_9(%arg0: i32) -> (i32, i32) {
    %c0_i32 = arith.constant 0 : i32
    %c0_i32_0 = arith.constant 0 : i32
    return %arg0, %c0_i32 : i32, i32
  }
}

</mosaic_0001>

<bundles_post_ra>
// kernel: ann_model_forward.1
= control target key start
LH: loop header
LB: loop body
LE: loop exit
PB: predicated region body
PF: predicated region fallthrough
CT: control target
= control target key end

     0   :  { %s6205_s0 = inlined_call_operand.vmem [shape: f32[1024,32], index: 0, kind: input, shape index: {}]   ;;  %s6206_s1 = inlined_call_operand.vmem [shape: bf16[32,128], index: 1, kind: input, shape index: {}]   ;;  %s6207_s2 = inlined_call_operand.vmem [shape: f32[1,128], index: 2, kind: input, shape index: {}]   ;;  %s6208_s3 = inlined_call_operand.vmem [shape: bf16[128,64], index: 3, kind: input, shape index: {}]   ;;  %s6209_s4 = inlined_call_operand.vmem [shape: f32[1,64], index: 4, kind: input, shape index: {}]   ;;  %s6210_s5 = inlined_call_operand.vmem [shape: bf16[64,32], index: 5, kind: input, shape index: {}]   ;;  %s6211_s6 = inlined_call_operand.vmem [shape: f32[1,32], index: 6, kind: input, shape index: {}]   ;;  %s6212_s7 = inlined_call_operand.vmem [shape: f32[1,32], index: 7, kind: input, shape index: {}]   ;;  %s6213_s8 = inlined_call_operand.<no memory space> [shape: f32[1,1], index: 8, kind: input, shape index: {}]   ;;  %s6214_s9 = inlined_call_operand.hbm [shape: f32[1,1024], index: 9, kind: output, shape index: {}]  }
   0x1   :  { %v14_v0 = vstv %s6213_s8 }
   0x2   :  { %15 = vst [vmem:[#allocation2] sm:$0x1] %v14_v0 }
   0x3   :  { %v4876_v1 = vld [vmem:[%s6206_s1] sm:$0xff]   ;;  %v4877_v2 = vld [vmem:[%s6206_s1 + $0x8] sm:$0xff]   ;;  %vm251_vm0 = vcmask 261120   ;;  %v38_v6 = vld [vmem:[%s6205_s0 + $0x10] sm:$0xff] }
   0x4   :  { %4268 = vmatprep.subr.bf16.mxu0 %v4876_v1  ;;  %v36_v3 = vld [vmem:[%s6205_s0] sm:$0xff]  ;;  %v37_v4 = vld [vmem:[%s6205_s0 + $0x8] sm:$0xff]  ;;  %v39_v7 = vld [vmem:[%s6205_s0 + $0x18] sm:$0xff] }
   0x5   :  { %4269 = vmatpush3.bf16.msra.mxu0 %v4876_v1  ;;  %v164_v5 = vpack.c.bf16 %v37_v4, %v36_v3  ;;  %v40_v8 = vld [vmem:[%s6205_s0 + $0x20] sm:$0xff]  ;;  %v41_v9 = vld [vmem:[%s6205_s0 + $0x28] sm:$0xff]  ;;  %v165_v10 = vpack.c.bf16 %v39_v7, %v38_v6  ;;  %v42_v12 = vld [vmem:[%s6205_s0 + $0x30] sm:$0xff] }
   0x6   :  { %4270 = vmatprep.subr.bf16.mxu0 %v4877_v2  ;;  %v166_v11 = vpack.c.bf16 %v41_v9, %v40_v8  ;;  %v43_v13 = vld [vmem:[%s6205_s0 + $0x38] sm:$0xff]  ;;  %v44_v14 = vld [vmem:[%s6205_s0 + $0x40] sm:$0xff]  ;;  %v45_v15 = vld [vmem:[%s6205_s0 + $0x48] sm:$0xff] }
   0x7   :  { %4272 = vmatprep.mubr.msk.bf16.mxu0 %vm251_vm0, %v164_v5  ;;  %v167_v16 = vpack.c.bf16 %v43_v13, %v42_v12  ;;  %v168_v17 = vpack.c.bf16 %v45_v15, %v44_v14  ;;  %v46_v18 = vld [vmem:[%s6205_s0 + $0x50] sm:$0xff]  ;;  %v47_v19 = vld [vmem:[%s6205_s0 + $0x58] sm:$0xff]  ;;  %v48_v20 = vld [vmem:[%s6205_s0 + $0x60] sm:$0xff] }
   0x8   :  { %v49_v21 = vld [vmem:[%s6205_s0 + $0x68] sm:$0xff]  ;;  %v169_v22 = vpack.c.bf16 %v47_v19, %v46_v18  ;;  %v50_v24 = vld [vmem:[%s6205_s0 + $0x70] sm:$0xff]  ;;  %v51_v25 = vld [vmem:[%s6205_s0 + $0x78] sm:$0xff] }
   0x9   :  { %4271 = vmatpush3.bf16.msra.mxu0 %v4877_v2  ;;  %v170_v23 = vpack.c.bf16 %v49_v21, %v48_v20  ;;  %v52_v26 = vld [vmem:[%s6205_s0 + $0x80] sm:$0xff]  ;;  %v53_v27 = vld [vmem:[%s6205_s0 + $0x88] sm:$0xff]  ;;  %v171_v28 = vpack.c.bf16 %v51_v25, %v50_v24  ;;  %v54_v30 = vld [vmem:[%s6205_s0 + $0x90] sm:$0xff] }
   0xa   :  { %v172_v29 = vpack.c.bf16 %v53_v27, %v52_v26  ;;  %v55_v31 = vld [vmem:[%s6205_s0 + $0x98] sm:$0xff]  ;;  %v56_v32 = vld [vmem:[%s6205_s0 + $0xa0] sm:$0xff]  ;;  %v57_v33 = vld [vmem:[%s6205_s0 + $0xa8] sm:$0xff] }
   0xb   :  { %v173_v34 = vpack.c.bf16 %v55_v31, %v54_v30 }
   0xc   :  { %4273 = vmatmul.mubr.msk.bf16.vlgmr.msra.gmra.mrb[0].mxu0 %vm251_vm0, %v165_v10 }
   0xd   :  { %4276 = vmatprep.mubr.msk.bf16.mxu0 %vm251_vm0, %v166_v11 }
  0x14   :  { %4277 = vmatmul.mubr.msk.bf16.gmra.mrb[4].mxu0 %vm251_vm0, %v167_v16 }
  0x15   :  { %4280 = vmatprep.mubr.msk.bf16.mxu0 %vm251_vm0, %v168_v17 }
  0x1c   :  { %4281 = vmatmul.mubr.msk.bf16.gmra.mrb[8].mxu0 %vm251_vm0, %v169_v22 }
  0x1d   :  { %4284 = vmatprep.mubr.msk.bf16.mxu0 %vm251_vm0, %v170_v23 }
  0x24   :  { %4285 = vmatmul.mubr.msk.bf16.gmra.mrb[12].mxu0 %vm251_vm0, %v171_v28 }
  0x25   :  { %4288 = vmatprep.mubr.msk.bf16.mxu0 %vm251_vm0, %v172_v29 }
  0x26   :  { %16 = vsyncpa [#allocation4], 0  ;;  %v174_v35 = vpack.c.bf16 %v57_v33, %v56_v32  ;;  %v58_v36 = vld [vmem:[%s6205_s0 + $0xb0] sm:$0xff]  ;;  %v59_v37 = vld [vmem:[%s6205_s0 + $0xb8] sm:$0xff]  ;;  %vm2028_vm1 = vcmask 523264  }
  0x27   :  { %v60_v38 = vld [vmem:[%s6205_s0 + $0xc0] sm:$0xff]  ;;  %v61_v39 = vld [vmem:[%s6205_s0 + $0xc8] sm:$0xff]  ;;  %v175_v40 = vpack.c.bf16 %v59_v37, %v58_v36  ;;  %v62_v42 = vld [vmem:[%s6205_s0 + $0xd0] sm:$0xff] }
  0x28   :  { %v176_v41 = vpack.c.bf16 %v61_v39, %v60_v38  ;;  %v63_v43 = vld [vmem:[%s6205_s0 + $0xd8] sm:$0xff]  ;;  %v64_v44 = vld [vmem:[%s6205_s0 + $0xe0] sm:$0xff]  ;;  %v65_v45 = vld [vmem:[%s6205_s0 + $0xe8] sm:$0xff] }
  0x29   :  { %v177_v46 = vpack.c.bf16 %v63_v43, %v62_v42  ;;  %v178_v47 = vpack.c.bf16 %v65_v45, %v64_v44  ;;  %v66_v48 = vld [vmem:[%s6205_s0 + $0xf0] sm:$0xff]  ;;  %v67_v49 = vld [vmem:[%s6205_s0 + $0xf8] sm:$0xff]  ;;  %v68_v50 = vld [vmem:[%s6205_s0 + $0x100] sm:$0xff] }
  0x2a   :  { %v69_v51 = vld [vmem:[%s6205_s0 + $0x108] sm:$0xff]  ;;  %v179_v52 = vpack.c.bf16 %v67_v49, %v66_v48  ;;  %v4878_v54 = vld [vmem:[%s6208_s3] sm:$0xff]   ;;  %v70_v55 = vld [vmem:[%s6205_s0 + $0x110] sm:$0xff] }
  0x2b   :  { %v180_v53 = vpack.c.bf16 %v69_v51, %v68_v50  ;;  %v71_v56 = vld [vmem:[%s6205_s0 + $0x118] sm:$0xff]  ;;  %v72_v57 = vld [vmem:[%s6205_s0 + $0x120] sm:$0xff]  ;;  %v73_v58 = vld [vmem:[%s6205_s0 + $0x128] sm:$0xff]  ;;  %4400 = vmatprep.subr.bf16.mxu1 %v4878_v54 }
  0x2c   :  { %4289 = vmatmul.mubr.msk.bf16.gmra.mrb[16].mxu0 %vm251_vm0, %v173_v34  ;;  %4401 = vmatpush3.bf16.msra.mxu1 %v4878_v54  ;;  %v181_v59 = vpack.c.bf16 %v71_v56, %v70_v55  ;;  %v182_v60 = vpack.c.bf16 %v73_v58, %v72_v57  ;;  %v4879_v61 = vld [vmem:[%s6208_s3 + $0x8] sm:$0xff]   ;;  %v4880_v62 = vld [vmem:[%s6208_s3 + $0x10] sm:$0xff]   ;;  %v75_v0 = vld [vmem:[%s6205_s0 + $0x138] sm:$0xff] }
  0x2d   :  { %4292 = vmatprep.mubr.msk.bf16.mxu0 %vm251_vm0, %v174_v35  ;;  %v74_v63 = vld [vmem:[%s6205_s0 + $0x130] sm:$0xff]  ;;  %v76_v1 = vld [vmem:[%s6205_s0 + $0x140] sm:$0xff]  ;;  %v77_v2 = vld [vmem:[%s6205_s0 + $0x148] sm:$0xff]  ;;  %4402 = vmatprep.subr.bf16.mxu1 %v4879_v61 }
  0x2e   :  { %v183_v3 = vpack.c.bf16 %v75_v0, %v74_v63  ;;  %v184_v4 = vpack.c.bf16 %v77_v2, %v76_v1  ;;  %v4881_v5 = vld [vmem:[%s6208_s3 + $0x18] sm:$0xff]   ;;  %v4882_v6 = vld [vmem:[%s6208_s3 + $0x20] sm:$0xff]   ;;  %v78_v7 = vld [vmem:[%s6205_s0 + $0x150] sm:$0xff] }
  0x2f   :  { %v79_v8 = vld [vmem:[%s6205_s0 + $0x158] sm:$0xff]  ;;  %v80_v9 = vld [vmem:[%s6205_s0 + $0x160] sm:$0xff]  ;;  %v81_v10 = vld [vmem:[%s6205_s0 + $0x168] sm:$0xff] }
  0x30   :  { %4403 = vmatpush3.bf16.msra.mxu1 %v4879_v61  ;;  %v185_v11 = vpack.c.bf16 %v79_v8, %v78_v7  ;;  %v186_v12 = vpack.c.bf16 %v81_v10, %v80_v9  ;;  %v4883_v13 = vld [vmem:[%s6208_s3 + $0x28] sm:$0xff]   ;;  %v82_v14 = vld [vmem:[%s6205_s0 + $0x170] sm:$0xff]  ;;  %v83_v15 = vld [vmem:[%s6205_s0 + $0x178] sm:$0xff] }
  0x31   :  { %4404 = vmatprep.subr.bf16.mxu1 %v4880_v62  ;;  %v84_v16 = vld [vmem:[%s6205_s0 + $0x180] sm:$0xff]  ;;  %v85_v17 = vld [vmem:[%s6205_s0 + $0x188] sm:$0xff]  ;;  %v187_v18 = vpack.c.bf16 %v83_v15, %v82_v14  ;;  %v4884_v19 = vld [vmem:[%s6208_s3 + $0x30] sm:$0xff]  }
  0x32   :  { %v188_v20 = vpack.c.bf16 %v85_v17, %v84_v16  ;;  %v4885_v21 = vld [vmem:[%s6208_s3 + $0x38] sm:$0xff]   ;;  %v86_v22 = vld [vmem:[%s6205_s0 + $0x190] sm:$0xff]  ;;  %v88_v24 = vld [vmem:[%s6205_s0 + $0x1a0] sm:$0xff] }
  0x33   :  { %v87_v23 = vld [vmem:[%s6205_s0 + $0x198] sm:$0xff]  ;;  %v89_v25 = vld [vmem:[%s6205_s0 + $0x1a8] sm:$0xff]  ;;  %v90_v28 = vld [vmem:[%s6205_s0 + $0x1b0] sm:$0xff] }
  0x34   :  { %4293 = vmatmul.mubr.msk.bf16.gmra.mrb[20].mxu0 %vm251_vm0, %v175_v40  ;;  %4405 = vmatpush3.bf16.msra.mxu1 %v4880_v62  ;;  %v189_v26 = vpack.c.bf16 %v87_v23, %v86_v22  ;;  %v190_v27 = vpack.c.bf16 %v89_v25, %v88_v24  ;;  %v91_v29 = vld [vmem:[%s6205_s0 + $0x1b8] sm:$0xff]  ;;  %v92_v30 = vld [vmem:[%s6205_s0 + $0x1c0] sm:$0xff]  ;;  %v93_v31 = vld [vmem:[%s6205_s0 + $0x1c8] sm:$0xff] }
  0x35   :  { %4296 = vmatprep.mubr.msk.bf16.mxu0 %vm251_vm0, %v176_v41  ;;  %4406 = vmatprep.subr.bf16.mxu1 %v4881_v5  ;;  %v191_v32 = vpack.c.bf16 %v91_v29, %v90_v28  ;;  %v192_v33 = vpack.c.bf16 %v93_v31, %v92_v30  ;;  %v94_v34 = vld [vmem:[%s6205_s0 + $0x1d0] sm:$0xff]  ;;  %v95_v35 = vld [vmem:[%s6205_s0 + $0x1d8] sm:$0xff]  ;;  %v96_v36 = vld [vmem:[%s6205_s0 + $0x1e0] sm:$0xff] }
  0x36   :  { %v97_v37 = vld [vmem:[%s6205_s0 + $0x1e8] sm:$0xff]  ;;  %v193_v38 = vpack.c.bf16 %v95_v35, %v94_v34  ;;  %v98_v40 = vld [vmem:[%s6205_s0 + $0x1f0] sm:$0xff]  ;;  %v99_v41 = vld [vmem:[%s6205_s0 + $0x1f8] sm:$0xff] }
  0x37   :  { %v194_v39 = vpack.c.bf16 %v97_v37, %v96_v36  ;;  %v100_v42 = vld [vmem:[%s6205_s0 + $0x200] sm:$0xff]  ;;  %v101_v43 = vld [vmem:[%s6205_s0 + $0x208] sm:$0xff]  ;;  %v195_v44 = vpack.c.bf16 %v99_v41, %v98_v40  ;;  %v110_v58 = vld [vmem:[%s6205_s0 + $0x250] sm:$0xff] }
  0x38   :  { %4407 = vmatpush3.bf16.msra.mxu1 %v4881_v5  ;;  %v196_v45 = vpack.c.bf16 %v101_v43, %v100_v42  ;;  %v104_v48 = vld [vmem:[%s6205_s0 + $0x220] sm:$0xff]  ;;  %v105_v49 = vld [vmem:[%s6205_s0 + $0x228] sm:$0xff]  ;;  %v114_v0 = vld [vmem:[%s6205_s0 + $0x270] sm:$0xff] }
  0x39   :  { %4408 = vmatprep.subr.bf16.mxu1 %v4882_v6  ;;  %v198_v51 = vpack.c.bf16 %v105_v49, %v104_v48  ;;  %v108_v54 = vld [vmem:[%s6205_s0 + $0x240] sm:$0xff]  ;;  %v109_v55 = vld [vmem:[%s6205_s0 + $0x248] sm:$0xff]  ;;  %v115_v1 = vld [vmem:[%s6205_s0 + $0x278] sm:$0xff] }
  0x3a   :  { %v200_v57 = vpack.c.bf16 %v109_v55, %v108_v54  ;;  %v113_v61 = vld [vmem:[%s6205_s0 + $0x268] sm:$0xff]  ;;  %v116_v2 = vld [vmem:[%s6205_s0 + $0x280] sm:$0xff]  ;;  %v119_v7 = vld [vmem:[%s6205_s0 + $0x298] sm:$0xff] }
  0x3b   :  { %v120_v8 = vld [vmem:[%s6205_s0 + $0x2a0] sm:$0xff]  ;;  %v121_v9 = vld [vmem:[%s6205_s0 + $0x2a8] sm:$0xff]  ;;  %v130_v24 = vld [vmem:[%s6205_s0 + $0x2f0] sm:$0xff] }
  0x3c   :  { %4297 = vmatmul.mubr.msk.bf16.gmra.mrb[24].mxu0 %vm251_vm0, %v177_v46  ;;  %4409 = vmatpush3.bf16.msra.mxu1 %v4882_v6  ;;  %v102_v46 = vld [vmem:[%s6205_s0 + $0x210] sm:$0xff]  ;;  %v124_v14 = vld [vmem:[%s6205_s0 + $0x2c0] sm:$0xff]  ;;  %v125_v15 = vld [vmem:[%s6205_s0 + $0x2c8] sm:$0xff] }
  0x3d   :  { %4300 = vmatprep.mubr.msk.bf16.mxu0 %vm251_vm0, %v178_v47  ;;  %4410 = vmatprep.subr.bf16.mxu1 %v4883_v13  ;;  %v103_v47 = vld [vmem:[%s6205_s0 + $0x218] sm:$0xff]  ;;  %v118_v6 = vld [vmem:[%s6205_s0 + $0x290] sm:$0xff]  ;;  %v208_v17 = vpack.c.bf16 %v125_v15, %v124_v14  ;;  %v5391_v48 = vld [vmem:[%s6207_s2] ss:$0 sm:$0xff] }
  0x3e   :  { %v197_v50 = vpack.c.bf16 %v103_v47, %v102_v46  ;;  %v205_v10 = vpack.c.bf16 %v119_v7, %v118_v6  ;;  %v131_v25 = vld [vmem:[%s6205_s0 + $0x2f8] sm:$0xff]  ;;  %v134_v30 = vld [vmem:[%s6205_s0 + $0x310] sm:$0xff]  ;;  %v152_v6 = vld [vmem:[%s6205_s0 + $0x3a0] sm:$0xff] }
  0x3f   :  { %v211_v28 = vpack.c.bf16 %v131_v25, %v130_v24  ;;  %v135_v31 = vld [vmem:[%s6205_s0 + $0x318] sm:$0xff]  ;;  %v138_v36 = vld [vmem:[%s6205_s0 + $0x330] sm:$0xff]  ;;  %v153_v7 = vld [vmem:[%s6205_s0 + $0x3a8] sm:$0xff] }
  0x40   :  { %4411 = vmatpush3.bf16.msra.mxu1 %v4883_v13  ;;  %v123_v13 = vld [vmem:[%s6205_s0 + $0x2b8] sm:$0xff]  ;;  %v213_v34 = vpack.c.bf16 %v135_v31, %v134_v30  ;;  %v142_v42 = vld [vmem:[%s6205_s0 + $0x350] sm:$0xff]  ;;  %v222_v15 = vpack.c.bf16 %v153_v7, %v152_v6  ;;  %vm5854_vm2 = vmpackc.low %vm251_vm0, %vm251_vm0 }
  0x41   :  { %4412 = vmatprep.subr.bf16.mxu1 %v4884_v19  ;;  %v139_v37 = vld [vmem:[%s6205_s0 + $0x338] sm:$0xff]  ;;  %v146_v49 = vld [vmem:[%s6205_s0 + $0x370] sm:$0xff] }
  0x42   :  { %v215_v40 = vpack.c.bf16 %v139_v37, %v138_v36  ;;  %v143_v43 = vld [vmem:[%s6205_s0 + $0x358] sm:$0xff] }
  0x43   :  { %v217_v46 = vpack.c.bf16 %v143_v43, %v142_v42  ;;  %v155_v24 = vld [vmem:[%s6205_s0 + $0x3b8] sm:$0xff]  ;;  %v158_v43 = vld [vmem:[%s6205_s0 + $0x3d0] sm:$0xff] }
  0x44   :  { %4301 = vmatmul.mubr.msk.bf16.gmra.mrb[28].mxu0 %vm251_vm0, %v179_v52  ;;  %4413 = vmatpush3.bf16.msra.mxu1 %v4884_v19  ;;  %v106_v52 = vld [vmem:[%s6205_s0 + $0x230] sm:$0xff]  ;;  %v127_v19 = vld [vmem:[%s6205_s0 + $0x2d8] sm:$0xff] }
  0x45   :  { %4304 = vmatprep.mubr.msk.bf16.mxu0 %vm251_vm0, %v180_v53  ;;  %4414 = vmatprep.subr.bf16.mxu1 %v4885_v21  ;;  %v107_v53 = vld [vmem:[%s6205_s0 + $0x238] sm:$0xff] }
  0x46   :  { %v199_v56 = vpack.c.bf16 %v107_v53, %v106_v52  ;;  %v149_v52 = vld [vmem:[%s6205_s0 + $0x388] sm:$0xff] }
  0x48   :  { %4415 = vmatpush3.bf16.msra.mxu1 %v4885_v21  ;;  %v129_v21 = vld [vmem:[%s6205_s0 + $0x2e8] sm:$0xff] }
  0x4c   :  { %4305 = vmatmul.mubr.msk.bf16.gmra.mrb[32].mxu0 %vm251_vm0, %v181_v59  ;;  %v111_v59 = vld [vmem:[%s6205_s0 + $0x258] sm:$0xff] }
  0x4d   :  { %4308 = vmatprep.mubr.msk.bf16.mxu0 %vm251_vm0, %v182_v60  ;;  %v112_v60 = vld [vmem:[%s6205_s0 + $0x260] sm:$0xff]  ;;  %v201_v62 = vpack.c.bf16 %v111_v59, %v110_v58 }
  0x4e   :  { %v202_v63 = vpack.c.bf16 %v113_v61, %v112_v60 }
  0x54   :  { %4309 = vmatmul.mubr.msk.bf16.gmra.mrb[36].mxu0 %vm251_vm0, %v183_v3  ;;  %v117_v3 = vld [vmem:[%s6205_s0 + $0x288] sm:$0xff] }
  0x55   :  { %4312 = vmatprep.mubr.msk.bf16.mxu0 %vm251_vm0, %v184_v4  ;;  %v203_v4 = vpack.c.bf16 %v115_v1, %v114_v0  ;;  %v204_v5 = vpack.c.bf16 %v117_v3, %v116_v2  ;;  %v150_v3 = vld [vmem:[%s6205_s0 + $0x390] sm:$0xff] }
  0x5c   :  { %4313 = vmatmul.mubr.msk.bf16.gmra.mrb[40].mxu0 %vm251_vm0, %v185_v11  ;;  %v206_v11 = vpack.c.bf16 %v121_v9, %v120_v8 }
  0x5d   :  { %4316 = vmatprep.mubr.msk.bf16.mxu0 %vm251_vm0, %v186_v12  ;;  %v122_v12 = vld [vmem:[%s6205_s0 + $0x2b0] sm:$0xff] }
  0x5e   :  { %v207_v16 = vpack.c.bf16 %v123_v13, %v122_v12 }
  0x64   :  { %4317 = vmatmul.mubr.msk.bf16.gmra.mrb[44].mxu0 %vm251_vm0, %v187_v18  ;;  %v126_v18 = vld [vmem:[%s6205_s0 + $0x2d0] sm:$0xff] }
  0x65   :  { %4320 = vmatprep.mubr.msk.bf16.mxu0 %vm251_vm0, %v188_v20  ;;  %v128_v20 = vld [vmem:[%s6205_s0 + $0x2e0] sm:$0xff]  ;;  %v209_v22 = vpack.c.bf16 %v127_v19, %v126_v18 }
  0x66   :  { %v210_v23 = vpack.c.bf16 %v129_v21, %v128_v20 }
  0x6c   :  { %4321 = vmatmul.mubr.msk.bf16.gmra.mrb[48].mxu0 %vm251_vm0, %v189_v26  ;;  %v132_v26 = vld [vmem:[%s6205_s0 + $0x300] sm:$0xff] }
  0x6d   :  { %4324 = vmatprep.mubr.msk.bf16.mxu0 %vm251_vm0, %v190_v27  ;;  %v133_v27 = vld [vmem:[%s6205_s0 + $0x308] sm:$0xff] }
  0x6e   :  { %v212_v29 = vpack.c.bf16 %v133_v27, %v132_v26  ;;  %v156_v26 = vld [vmem:[%s6205_s0 + $0x3c0] sm:$0xff]  ;;  %v157_v27 = vld [vmem:[%s6205_s0 + $0x3c8] sm:$0xff] }
  0x74   :  { %4325 = vmatmul.mubr.msk.bf16.gmra.mrb[52].mxu0 %vm251_vm0, %v191_v32  ;;  %v136_v32 = vld [vmem:[%s6205_s0 + $0x320] sm:$0xff] }
  0x75   :  { %4328 = vmatprep.mubr.msk.bf16.mxu0 %vm251_vm0, %v192_v33  ;;  %v137_v33 = vld [vmem:[%s6205_s0 + $0x328] sm:$0xff] }
  0x76   :  { %v214_v35 = vpack.c.bf16 %v137_v33, %v136_v32 }
  0x7c   :  { %4329 = vmatmul.mubr.msk.bf16.gmra.mrb[56].mxu0 %vm251_vm0, %v193_v38  ;;  %v140_v38 = vld [vmem:[%s6205_s0 + $0x340] sm:$0xff] }
  0x7d   :  { %4332 = vmatprep.mubr.msk.bf16.mxu0 %vm251_vm0, %v194_v39  ;;  %v141_v39 = vld [vmem:[%s6205_s0 + $0x348] sm:$0xff] }
  0x7e   :  { %v216_v41 = vpack.c.bf16 %v141_v39, %v140_v38 }
  0x84   :  { %4333 = vmatmul.mubr.msk.bf16.gmra.mrb[60].mxu0 %vm251_vm0, %v195_v44  ;;  %v144_v44 = vld [vmem:[%s6205_s0 + $0x360] sm:$0xff] }
  0x85   :  { %4336 = vmatprep.mubr.msk.bf16.mxu0 %vm251_vm0, %v196_v45  ;;  %v145_v45 = vld [vmem:[%s6205_s0 + $0x368] sm:$0xff] }
  0x86   :  { %v218_v47 = vpack.c.bf16 %v145_v45, %v144_v44  ;;  %v159_v44 = vld [vmem:[%s6205_s0 + $0x3d8] sm:$0xff] }
  0x8c   :  { %4337 = vmatmul.mubr.msk.bf16.gmra.mrb[64].mxu0 %vm251_vm0, %v197_v50  ;;  %v147_v50 = vld [vmem:[%s6205_s0 + $0x378] sm:$0xff] }
  0x8d   :  { %4340 = vmatprep.mubr.msk.bf16.mxu0 %vm251_vm0, %v198_v51  ;;  %v148_v51 = vld [vmem:[%s6205_s0 + $0x380] sm:$0xff] }
  0x8e   :  { %v220_v59 = vpack.c.bf16 %v149_v52, %v148_v51 }
  0x94   :  { %4341 = vmatmul.mubr.msk.bf16.gmra.mrb[68].mxu0 %vm251_vm0, %v199_v56  ;;  %v219_v56 = vpack.c.bf16 %v147_v50, %v146_v49 }
  0x95   :  { %4344 = vmatprep.mubr.msk.bf16.mxu0 %vm251_vm0, %v200_v57 }
  0x9c   :  { %4345 = vmatmul.mubr.msk.bf16.gmra.mrb[72].mxu0 %vm251_vm0, %v201_v62 }
  0x9d   :  { %4348 = vmatprep.mubr.msk.bf16.mxu0 %vm251_vm0, %v202_v63 }
  0xa4   :  { %4349 = vmatmul.mubr.msk.bf16.gmra.mrb[76].mxu0 %vm251_vm0, %v203_v4  ;;  %v151_v4 = vld [vmem:[%s6205_s0 + $0x398] sm:$0xff] }
  0xa5   :  { %4352 = vmatprep.mubr.msk.bf16.mxu0 %vm251_vm0, %v204_v5  ;;  %v221_v12 = vpack.c.bf16 %v151_v4, %v150_v3 }
  0xac   :  { %4353 = vmatmul.mubr.msk.bf16.gmra.mrb[80].mxu0 %vm251_vm0, %v205_v10 }
  0xad   :  { %4356 = vmatprep.mubr.msk.bf16.mxu0 %vm251_vm0, %v206_v11 }
  0xb4   :  { %4357 = vmatmul.mubr.msk.bf16.gmra.mrb[84].mxu0 %vm251_vm0, %v207_v16 }
  0xb5   :  { %4360 = vmatprep.mubr.msk.bf16.mxu0 %vm251_vm0, %v208_v17 }
  0xbc   :  { %4361 = vmatmul.mubr.msk.bf16.gmra.mrb[88].mxu0 %vm251_vm0, %v209_v22 }
  0xbd   :  { %4364 = vmatprep.mubr.msk.bf16.mxu0 %vm251_vm0, %v210_v23  ;;  %v154_v23 = vld [vmem:[%s6205_s0 + $0x3b0] sm:$0xff] }
  0xbe   :  { %v223_v32 = vpack.c.bf16 %v155_v24, %v154_v23 }
  0xc4   :  { %4365 = vmatmul.mubr.msk.bf16.gmra.mrb[92].mxu0 %vm251_vm0, %v211_v28 }
  0xc5   :  { %4368 = vmatprep.mubr.msk.bf16.mxu0 %vm251_vm0, %v212_v29 }
  0xcc   :  { %4369 = vmatmul.mubr.msk.bf16.gmra.mrb[96].mxu0 %vm251_vm0, %v213_v34 }
  0xcd   :  { %4372 = vmatprep.mubr.msk.bf16.mxu0 %vm251_vm0, %v214_v35  ;;  %v224_v35 = vpack.c.bf16 %v157_v27, %v156_v26  ;;  %v4886_v26 = vld [vmem:[%s6210_s5] sm:$0xff]  }
  0xce   :  { %4544 = vmatprep.subr.bf16.mxu0 %v4886_v26 }
  0xcf   :  { %4545 = vmatpush3.bf16.msra.mxu0 %v4886_v26 }
  0xd4   :  { %4373 = vmatmul.mubr.msk.bf16.gmra.mrb[100].mxu0 %vm251_vm0, %v215_v40 }
  0xd5   :  { %4376 = vmatprep.mubr.msk.bf16.mxu0 %vm251_vm0, %v216_v41 }
  0xdc   :  { %4377 = vmatmul.mubr.msk.bf16.gmra.mrb[104].mxu0 %vm251_vm0, %v217_v46  ;;  %v160_v46 = vld [vmem:[%s6205_s0 + $0x3e0] sm:$0xff] }
  0xdd   :  { %4380 = vmatprep.mubr.msk.bf16.mxu0 %vm251_vm0, %v218_v47  ;;  %v161_v47 = vld [vmem:[%s6205_s0 + $0x3e8] sm:$0xff] }
  0xdf   :  { %v4274_v53 = vpop.f32.mrb[0].mxu0 }
  0xe0   :  { %v487_v54 = vadd.f32 %v4274_v53, %v5391_v48  ;;  %v478_v55 = vpop.f32.mrb[1].mxu0  ;;  %v225_v53 = vpack.c.bf16 %v159_v44, %v158_v43 }
  0xe1   :  { %v479_v57 = vadd.f32 %v5391_v48, %v478_v55  ;;  %v4275_v58 = vpop.f32.mrb[2].mxu0 }
  0xe2   :  { %v490_v60 = vadd.f32 %v4275_v58, %v5391_v48  ;;  %v481_v61 = vpop.f32.mrb[3].mxu0  ;;  %v991_v63 = vmax.f32 %v487_v54, 0.0 }
  0xe3   :  { %v482_v62 = vadd.f32 %v5391_v48, %v481_v61  ;;  %v989_v1 = vmax.f32 %v479_v57, 0.0 }
  0xe4   :  { %v992_v0 = vmax.f32 %v490_v60, 0.0  ;;  %4381 = vmatmul.mubr.msk.bf16.gmra.mrb[108].mxu0 %vm251_vm0, %v219_v56  ;;  %v226_v56 = vpack.c.bf16 %v161_v47, %v160_v46 }
  0xe5   :  { %v990_v2 = vmax.f32 %v482_v62, 0.0  ;;  %4384 = vmatprep.mubr.msk.bf16.mxu0 %vm251_vm0, %v220_v59 }
  0xe6   :  { %v1118_v5 = vpack.c.bf16 %v992_v0, %v991_v63  ;;  %v162_v0 = vld [vmem:[%s6205_s0 + $0x3f0] sm:$0xff] }
  0xe7   :  { %v4278_v8 = vpop.f32.mrb[4].mxu0  ;;  %v1117_v9 = vpack.c.bf16 %v990_v2, %v989_v1  ;;  %v163_v1 = vld [vmem:[%s6205_s0 + $0x3f8] sm:$0xff] }
  0xe8   :  { %v503_v10 = vadd.f32 %v4278_v8, %v5391_v48  ;;  %v494_v11 = vpop.f32.mrb[5].mxu0  ;;  %v227_v7 = vpack.c.bf16 %v163_v1, %v162_v0 }
  0xe9   :  { %v495_v13 = vadd.f32 %v5391_v48, %v494_v11  ;;  %v4279_v14 = vpop.f32.mrb[6].mxu0  ;;  %4416 = vmatprep.mubr.bf16.mxu1 %v1117_v9 }
  0xea   :  { %v506_v16 = vadd.f32 %v4279_v14, %v5391_v48  ;;  %v497_v17 = vpop.f32.mrb[7].mxu0  ;;  %4417 = vmatmul.mubr.bf16.vlgmr.msra.gmra.mrb[0].mxu1 %v1118_v5  ;;  %v995_v19 = vmax.f32 %v503_v10, 0.0 }
  0xeb   :  { %v498_v18 = vadd.f32 %v5391_v48, %v497_v17  ;;  %v993_v21 = vmax.f32 %v495_v13, 0.0 }
  0xec   :  { %v996_v20 = vmax.f32 %v506_v16, 0.0  ;;  %4385 = vmatmul.mubr.msk.bf16.gmra.mrb[112].mxu0 %vm251_vm0, %v221_v12 }
  0xed   :  { %v994_v22 = vmax.f32 %v498_v18, 0.0  ;;  %4388 = vmatprep.mubr.msk.bf16.mxu0 %vm251_vm0, %v222_v15 }
  0xee   :  { %v1120_v25 = vpack.c.bf16 %v996_v20, %v995_v19 }
  0xef   :  { %v1119_v28 = vpack.c.bf16 %v994_v22, %v993_v21  ;;  %v4282_v29 = vpop.f32.mrb[8].mxu0 }
  0xf0   :  { %v519_v30 = vadd.f32 %v4282_v29, %v5391_v48  ;;  %v510_v31 = vpop.f32.mrb[9].mxu0 }
  0xf1   :  { %v511_v33 = vadd.f32 %v5391_v48, %v510_v31  ;;  %v4283_v34 = vpop.f32.mrb[10].mxu0  ;;  %4420 = vmatprep.mubr.bf16.mxu1 %v1119_v28 }
  0xf2   :  { %v522_v36 = vadd.f32 %v4283_v34, %v5391_v48  ;;  %v513_v37 = vpop.f32.mrb[11].mxu0  ;;  %4421 = vmatmul.mubr.bf16.gmra.mrb[4].mxu1 %v1120_v25  ;;  %v999_v39 = vmax.f32 %v519_v30, 0.0 }
  0xf3   :  { %v514_v38 = vadd.f32 %v5391_v48, %v513_v37  ;;  %v997_v41 = vmax.f32 %v511_v33, 0.0 }
  0xf4   :  { %v1000_v40 = vmax.f32 %v522_v36, 0.0  ;;  %4389 = vmatmul.mubr.msk.bf16.gmra.mrb[116].mxu0 %vm251_vm0, %v223_v32 }
  0xf5   :  { %v998_v42 = vmax.f32 %v514_v38, 0.0  ;;  %4392 = vmatprep.mubr.msk.bf16.mxu0 %vm251_vm0, %v224_v35 }
  0xf6   :  { %v1122_v45 = vpack.c.bf16 %v1000_v40, %v999_v39 }
  0xf7   :  { %v1121_v49 = vpack.c.bf16 %v998_v42, %v997_v41  ;;  %v4286_v50 = vpop.f32.mrb[12].mxu0 }
  0xf8   :  { %v535_v51 = vadd.f32 %v4286_v50, %v5391_v48  ;;  %v526_v52 = vpop.f32.mrb[13].mxu0 }
  0xf9   :  { %v527_v54 = vadd.f32 %v5391_v48, %v526_v52  ;;  %v4287_v55 = vpop.f32.mrb[14].mxu0  ;;  %4424 = vmatprep.mubr.bf16.mxu1 %v1121_v49 }
  0xfa   :  { %v538_v57 = vadd.f32 %v4287_v55, %v5391_v48  ;;  %v529_v58 = vpop.f32.mrb[15].mxu0  ;;  %4425 = vmatmul.mubr.bf16.gmra.mrb[8].mxu1 %v1122_v45  ;;  %v1003_v60 = vmax.f32 %v535_v51, 0.0 }
  0xfb   :  { %v530_v59 = vadd.f32 %v5391_v48, %v529_v58  ;;  %v1001_v62 = vmax.f32 %v527_v54, 0.0 }
  0xfc   :  { %v1004_v61 = vmax.f32 %v538_v57, 0.0  ;;  %4393 = vmatmul.mubr.msk.bf16.gmra.mrb[120].mxu0 %vm251_vm0, %v225_v53 }
  0xfd   :  { %v1002_v63 = vmax.f32 %v530_v59, 0.0  ;;  %4396 = vmatprep.mubr.msk.bf16.mxu0 %vm251_vm0, %v226_v56 }
  0xfe   :  { %v1124_v2 = vpack.c.bf16 %v1004_v61, %v1003_v60 }
  0xff   :  { %v1123_v3 = vpack.c.bf16 %v1002_v63, %v1001_v62  ;;  %v4290_v4 = vpop.f32.mrb[16].mxu0 }
 0x100   :  { %v551_v5 = vadd.f32 %v4290_v4, %v5391_v48  ;;  %v542_v6 = vpop.f32.mrb[17].mxu0 }
 0x101   :  { %v543_v8 = vadd.f32 %v5391_v48, %v542_v6  ;;  %v4291_v9 = vpop.f32.mrb[18].mxu0  ;;  %4428 = vmatprep.mubr.bf16.mxu1 %v1123_v3 }
 0x102   :  { %v554_v10 = vadd.f32 %v4291_v9, %v5391_v48  ;;  %v545_v11 = vpop.f32.mrb[19].mxu0  ;;  %4429 = vmatmul.mubr.bf16.gmra.mrb[12].mxu1 %v1124_v2  ;;  %v1007_v13 = vmax.f32 %v551_v5, 0.0 }
 0x103   :  { %v546_v12 = vadd.f32 %v5391_v48, %v545_v11  ;;  %v1005_v15 = vmax.f32 %v543_v8, 0.0 }
 0x104   :  { %v1008_v14 = vmax.f32 %v554_v10, 0.0  ;;  %4397 = vmatmul.mubr.msk.bf16.gmra.mrb[124].mxu0 %vm251_vm0, %v227_v7 }
 0x105   :  { %v1006_v16 = vmax.f32 %v546_v12, 0.0 }
 0x106   :  { %v1126_v17 = vpack.c.bf16 %v1008_v14, %v1007_v13 }
 0x107   :  { %v1125_v18 = vpack.c.bf16 %v1006_v16, %v1005_v15  ;;  %v4294_v19 = vpop.f32.mrb[20].mxu0 }
 0x108   :  { %v567_v20 = vadd.f32 %v4294_v19, %v5391_v48  ;;  %v558_v21 = vpop.f32.mrb[21].mxu0 }
 0x109   :  { %v559_v22 = vadd.f32 %v5391_v48, %v558_v21  ;;  %v4295_v23 = vpop.f32.mrb[22].mxu0  ;;  %4432 = vmatprep.mubr.bf16.mxu1 %v1125_v18 }
 0x10a   :  { %v570_v24 = vadd.f32 %v4295_v23, %v5391_v48  ;;  %v561_v25 = vpop.f32.mrb[23].mxu0  ;;  %4433 = vmatmul.mubr.bf16.gmra.mrb[16].mxu1 %v1126_v17  ;;  %v1011_v28 = vmax.f32 %v567_v20, 0.0 }
 0x10b   :  { %v562_v27 = vadd.f32 %v5391_v48, %v561_v25  ;;  %v1009_v30 = vmax.f32 %v559_v22, 0.0 }
 0x10c   :  { %v1012_v29 = vmax.f32 %v570_v24, 0.0 }
 0x10d   :  { %v1010_v31 = vmax.f32 %v562_v27, 0.0 }
 0x10e   :  { %v1128_v32 = vpack.c.bf16 %v1012_v29, %v1011_v28 }
 0x10f   :  { %v1127_v33 = vpack.c.bf16 %v1010_v31, %v1009_v30  ;;  %v4298_v34 = vpop.f32.mrb[24].mxu0 }
 0x110   :  { %v583_v35 = vadd.f32 %v4298_v34, %v5391_v48  ;;  %v574_v36 = vpop.f32.mrb[25].mxu0 }
 0x111   :  { %v575_v37 = vadd.f32 %v5391_v48, %v574_v36  ;;  %v4299_v38 = vpop.f32.mrb[26].mxu0  ;;  %4436 = vmatprep.mubr.bf16.mxu1 %v1127_v33 }
 0x112   :  { %v586_v39 = vadd.f32 %v4299_v38, %v5391_v48  ;;  %v577_v40 = vpop.f32.mrb[27].mxu0  ;;  %4437 = vmatmul.mubr.bf16.gmra.mrb[20].mxu1 %v1128_v32  ;;  %v1015_v42 = vmax.f32 %v583_v35, 0.0 }
 0x113   :  { %v578_v41 = vadd.f32 %v5391_v48, %v577_v40  ;;  %v1013_v44 = vmax.f32 %v575_v37, 0.0 }
 0x114   :  { %v1016_v43 = vmax.f32 %v586_v39, 0.0 }
 0x115   :  { %v1014_v45 = vmax.f32 %v578_v41, 0.0 }
 0x116   :  { %v1130_v46 = vpack.c.bf16 %v1016_v43, %v1015_v42 }
 0x117   :  { %v1129_v47 = vpack.c.bf16 %v1014_v45, %v1013_v44  ;;  %v4302_v49 = vpop.f32.mrb[28].mxu0 }
 0x118   :  { %v599_v50 = vadd.f32 %v4302_v49, %v5391_v48  ;;  %v590_v51 = vpop.f32.mrb[29].mxu0  ;;  %v4887_v49 = vld [vmem:[%s6210_s5 + $0x8] sm:$0xff]  }
 0x119   :  { %v591_v52 = vadd.f32 %v5391_v48, %v590_v51  ;;  %v4303_v53 = vpop.f32.mrb[30].mxu0  ;;  %4440 = vmatprep.mubr.bf16.mxu1 %v1129_v47  ;;  %4546 = vmatprep.subr.bf16.mxu0 %v4887_v49 }
 0x11a   :  { %v602_v54 = vadd.f32 %v4303_v53, %v5391_v48  ;;  %v593_v55 = vpop.f32.mrb[31].mxu0  ;;  %4441 = vmatmul.mubr.bf16.gmra.mrb[24].mxu1 %v1130_v46  ;;  %v1019_v57 = vmax.f32 %v599_v50, 0.0  ;;  %4547 = vmatpush3.bf16.msra.mxu0 %v4887_v49 }
 0x11b   :  { %v594_v56 = vadd.f32 %v5391_v48, %v593_v55  ;;  %v1017_v59 = vmax.f32 %v591_v52, 0.0 }
 0x11c   :  { %v1020_v58 = vmax.f32 %v602_v54, 0.0 }
 0x11d   :  { %v1018_v60 = vmax.f32 %v594_v56, 0.0  ;;  %v4888_v56 = vld [vmem:[%s6210_s5 + $0x10] sm:$0xff]  }
 0x11e   :  { %v1132_v61 = vpack.c.bf16 %v1020_v58, %v1019_v57  ;;  %4548 = vmatprep.subr.bf16.mxu0 %v4888_v56 }
 0x11f   :  { %v1131_v62 = vpack.c.bf16 %v1018_v60, %v1017_v59  ;;  %v4306_v63 = vpop.f32.mrb[32].mxu0  ;;  %4549 = vmatpush3.bf16.msra.mxu0 %v4888_v56 }
 0x120   :  { %v615_v0 = vadd.f32 %v4306_v63, %v5391_v48  ;;  %v606_v1 = vpop.f32.mrb[33].mxu0 }
 0x121   :  { %v607_v2 = vadd.f32 %v5391_v48, %v606_v1  ;;  %v4307_v3 = vpop.f32.mrb[34].mxu0  ;;  %4444 = vmatprep.mubr.bf16.mxu1 %v1131_v62  ;;  %v4889_v1 = vld [vmem:[%s6210_s5 + $0x18] sm:$0xff]  }
 0x122   :  { %v618_v4 = vadd.f32 %v4307_v3, %v5391_v48  ;;  %v609_v5 = vpop.f32.mrb[35].mxu0  ;;  %4445 = vmatmul.mubr.bf16.gmra.mrb[28].mxu1 %v1132_v61  ;;  %v1023_v7 = vmax.f32 %v615_v0, 0.0  ;;  %4550 = vmatprep.subr.bf16.mxu0 %v4889_v1 }
 0x123   :  { %v610_v6 = vadd.f32 %v5391_v48, %v609_v5  ;;  %v1021_v9 = vmax.f32 %v607_v2, 0.0  ;;  %4551 = vmatpush3.bf16.msra.mxu0 %v4889_v1 }
 0x124   :  { %v1024_v8 = vmax.f32 %v618_v4, 0.0 }
 0x125   :  { %v1022_v10 = vmax.f32 %v610_v6, 0.0 }
 0x126   :  { %v1134_v11 = vpack.c.bf16 %v1024_v8, %v1023_v7 }
 0x127   :  { %v1133_v12 = vpack.c.bf16 %v1022_v10, %v1021_v9  ;;  %v4310_v13 = vpop.f32.mrb[36].mxu0 }
 0x128   :  { %v631_v14 = vadd.f32 %v4310_v13, %v5391_v48  ;;  %v622_v15 = vpop.f32.mrb[37].mxu0 }
 0x129   :  { %v623_v16 = vadd.f32 %v5391_v48, %v622_v15  ;;  %v4311_v17 = vpop.f32.mrb[38].mxu0  ;;  %4448 = vmatprep.mubr.bf16.mxu1 %v1133_v12 }
 0x12a   :  { %v634_v18 = vadd.f32 %v4311_v17, %v5391_v48  ;;  %v625_v19 = vpop.f32.mrb[39].mxu0  ;;  %4449 = vmatmul.mubr.bf16.gmra.mrb[32].mxu1 %v1134_v11  ;;  %v1027_v21 = vmax.f32 %v631_v14, 0.0 }
 0x12b   :  { %v626_v20 = vadd.f32 %v5391_v48, %v625_v19  ;;  %v1025_v23 = vmax.f32 %v623_v16, 0.0 }
 0x12c   :  { %v1028_v22 = vmax.f32 %v634_v18, 0.0 }
 0x12d   :  { %v1026_v24 = vmax.f32 %v626_v20, 0.0 }
 0x12e   :  { %v1136_v25 = vpack.c.bf16 %v1028_v22, %v1027_v21 }
 0x12f   :  { %v1135_v26 = vpack.c.bf16 %v1026_v24, %v1025_v23  ;;  %v4314_v27 = vpop.f32.mrb[40].mxu0 }
 0x130   :  { %v647_v28 = vadd.f32 %v4314_v27, %v5391_v48  ;;  %v638_v29 = vpop.f32.mrb[41].mxu0 }
 0x131   :  { %v639_v30 = vadd.f32 %v5391_v48, %v638_v29  ;;  %v4315_v31 = vpop.f32.mrb[42].mxu0  ;;  %4452 = vmatprep.mubr.bf16.mxu1 %v1135_v26 }
 0x132   :  { %v650_v32 = vadd.f32 %v4315_v31, %v5391_v48  ;;  %v641_v33 = vpop.f32.mrb[43].mxu0  ;;  %4453 = vmatmul.mubr.bf16.gmra.mrb[36].mxu1 %v1136_v25  ;;  %v1031_v35 = vmax.f32 %v647_v28, 0.0 }
 0x133   :  { %v642_v34 = vadd.f32 %v5391_v48, %v641_v33  ;;  %v1029_v37 = vmax.f32 %v639_v30, 0.0 }
 0x134   :  { %v1032_v36 = vmax.f32 %v650_v32, 0.0 }
 0x135   :  { %v1030_v38 = vmax.f32 %v642_v34, 0.0 }
 0x136   :  { %v1138_v39 = vpack.c.bf16 %v1032_v36, %v1031_v35 }
 0x137   :  { %v1137_v40 = vpack.c.bf16 %v1030_v38, %v1029_v37  ;;  %v4318_v41 = vpop.f32.mrb[44].mxu0 }
 0x138   :  { %v663_v42 = vadd.f32 %v4318_v41, %v5391_v48  ;;  %v654_v43 = vpop.f32.mrb[45].mxu0 }
 0x139   :  { %v655_v44 = vadd.f32 %v5391_v48, %v654_v43  ;;  %v4319_v45 = vpop.f32.mrb[46].mxu0  ;;  %4456 = vmatprep.mubr.bf16.mxu1 %v1137_v40 }
 0x13a   :  { %v666_v46 = vadd.f32 %v4319_v45, %v5391_v48  ;;  %v657_v47 = vpop.f32.mrb[47].mxu0  ;;  %4457 = vmatmul.mubr.bf16.gmra.mrb[40].mxu1 %v1138_v39  ;;  %v1035_v51 = vmax.f32 %v663_v42, 0.0 }
 0x13b   :  { %v658_v50 = vadd.f32 %v5391_v48, %v657_v47  ;;  %v1033_v53 = vmax.f32 %v655_v44, 0.0 }
 0x13c   :  { %v1036_v52 = vmax.f32 %v666_v46, 0.0 }
 0x13d   :  { %v1034_v54 = vmax.f32 %v658_v50, 0.0 }
 0x13e   :  { %v1140_v55 = vpack.c.bf16 %v1036_v52, %v1035_v51 }
 0x13f   :  { %v1139_v57 = vpack.c.bf16 %v1034_v54, %v1033_v53  ;;  %v4322_v58 = vpop.f32.mrb[48].mxu0 }
 0x140   :  { %v679_v59 = vadd.f32 %v4322_v58, %v5391_v48  ;;  %v670_v60 = vpop.f32.mrb[49].mxu0 }
 0x141   :  { %v671_v61 = vadd.f32 %v5391_v48, %v670_v60  ;;  %v4323_v62 = vpop.f32.mrb[50].mxu0  ;;  %4460 = vmatprep.mubr.bf16.mxu1 %v1139_v57 }
 0x142   :  { %v682_v63 = vadd.f32 %v4323_v62, %v5391_v48  ;;  %v673_v0 = vpop.f32.mrb[51].mxu0  ;;  %4461 = vmatmul.mubr.bf16.gmra.mrb[44].mxu1 %v1140_v55  ;;  %v1039_v3 = vmax.f32 %v679_v59, 0.0 }
 0x143   :  { %v674_v2 = vadd.f32 %v5391_v48, %v673_v0  ;;  %v1037_v5 = vmax.f32 %v671_v61, 0.0 }
 0x144   :  { %v1040_v4 = vmax.f32 %v682_v63, 0.0 }
 0x145   :  { %v1038_v6 = vmax.f32 %v674_v2, 0.0 }
 0x146   :  { %v1142_v7 = vpack.c.bf16 %v1040_v4, %v1039_v3 }
 0x147   :  { %v1141_v8 = vpack.c.bf16 %v1038_v6, %v1037_v5  ;;  %v4326_v9 = vpop.f32.mrb[52].mxu0 }
 0x148   :  { %v695_v10 = vadd.f32 %v4326_v9, %v5391_v48  ;;  %v686_v11 = vpop.f32.mrb[53].mxu0 }
 0x149   :  { %v687_v12 = vadd.f32 %v5391_v48, %v686_v11  ;;  %v4327_v13 = vpop.f32.mrb[54].mxu0  ;;  %4464 = vmatprep.mubr.bf16.mxu1 %v1141_v8 }
 0x14a   :  { %v698_v14 = vadd.f32 %v4327_v13, %v5391_v48  ;;  %v689_v15 = vpop.f32.mrb[55].mxu0  ;;  %4465 = vmatmul.mubr.bf16.gmra.mrb[48].mxu1 %v1142_v7  ;;  %v1043_v17 = vmax.f32 %v695_v10, 0.0 }
 0x14b   :  { %v690_v16 = vadd.f32 %v5391_v48, %v689_v15  ;;  %v1041_v19 = vmax.f32 %v687_v12, 0.0 }
 0x14c   :  { %v1044_v18 = vmax.f32 %v698_v14, 0.0 }
 0x14d   :  { %v1042_v20 = vmax.f32 %v690_v16, 0.0 }
 0x14e   :  { %v1144_v21 = vpack.c.bf16 %v1044_v18, %v1043_v17 }
 0x14f   :  { %v1143_v22 = vpack.c.bf16 %v1042_v20, %v1041_v19  ;;  %v4330_v23 = vpop.f32.mrb[56].mxu0 }
 0x150   :  { %v711_v24 = vadd.f32 %v4330_v23, %v5391_v48  ;;  %v702_v25 = vpop.f32.mrb[57].mxu0 }
 0x151   :  { %v703_v26 = vadd.f32 %v5391_v48, %v702_v25  ;;  %v4331_v27 = vpop.f32.mrb[58].mxu0  ;;  %4468 = vmatprep.mubr.bf16.mxu1 %v1143_v22 }
 0x152   :  { %v714_v28 = vadd.f32 %v4331_v27, %v5391_v48  ;;  %v705_v29 = vpop.f32.mrb[59].mxu0  ;;  %4469 = vmatmul.mubr.bf16.gmra.mrb[52].mxu1 %v1144_v21  ;;  %v1047_v31 = vmax.f32 %v711_v24, 0.0 }
 0x153   :  { %v706_v30 = vadd.f32 %v5391_v48, %v705_v29  ;;  %v1045_v33 = vmax.f32 %v703_v26, 0.0 }
 0x154   :  { %v1048_v32 = vmax.f32 %v714_v28, 0.0 }
 0x155   :  { %v1046_v34 = vmax.f32 %v706_v30, 0.0 }
 0x156   :  { %v1146_v35 = vpack.c.bf16 %v1048_v32, %v1047_v31 }
 0x157   :  { %v1145_v36 = vpack.c.bf16 %v1046_v34, %v1045_v33  ;;  %v4334_v37 = vpop.f32.mrb[60].mxu0 }
 0x158   :  { %v727_v38 = vadd.f32 %v4334_v37, %v5391_v48  ;;  %v718_v39 = vpop.f32.mrb[61].mxu0 }
 0x159   :  { %v719_v40 = vadd.f32 %v5391_v48, %v718_v39  ;;  %v4335_v41 = vpop.f32.mrb[62].mxu0  ;;  %4472 = vmatprep.mubr.bf16.mxu1 %v1145_v36 }
 0x15a   :  { %v730_v42 = vadd.f32 %v4335_v41, %v5391_v48  ;;  %v721_v43 = vpop.f32.mrb[63].mxu0  ;;  %4473 = vmatmul.mubr.bf16.gmra.mrb[56].mxu1 %v1146_v35  ;;  %v1051_v45 = vmax.f32 %v727_v38, 0.0 }
 0x15b   :  { %v722_v44 = vadd.f32 %v5391_v48, %v721_v43  ;;  %v1049_v47 = vmax.f32 %v719_v40, 0.0 }
 0x15c   :  { %v1052_v46 = vmax.f32 %v730_v42, 0.0 }
 0x15d   :  { %v1050_v49 = vmax.f32 %v722_v44, 0.0 }
 0x15e   :  { %v1148_v50 = vpack.c.bf16 %v1052_v46, %v1051_v45 }
 0x15f   :  { %v1147_v51 = vpack.c.bf16 %v1050_v49, %v1049_v47  ;;  %v4338_v52 = vpop.f32.mrb[64].mxu0 }
 0x160   :  { %v743_v53 = vadd.f32 %v4338_v52, %v5391_v48  ;;  %v734_v54 = vpop.f32.mrb[65].mxu0 }
 0x161   :  { %v735_v55 = vadd.f32 %v5391_v48, %v734_v54  ;;  %v4339_v56 = vpop.f32.mrb[66].mxu0  ;;  %4476 = vmatprep.mubr.bf16.mxu1 %v1147_v51 }
 0x162   :  { %v746_v57 = vadd.f32 %v4339_v56, %v5391_v48  ;;  %v737_v58 = vpop.f32.mrb[67].mxu0  ;;  %4477 = vmatmul.mubr.bf16.gmra.mrb[60].mxu1 %v1148_v50  ;;  %v1055_v60 = vmax.f32 %v743_v53, 0.0 }
 0x163   :  { %v738_v59 = vadd.f32 %v5391_v48, %v737_v58  ;;  %v1053_v62 = vmax.f32 %v735_v55, 0.0 }
 0x164   :  { %v1056_v61 = vmax.f32 %v746_v57, 0.0 }
 0x165   :  { %v1054_v63 = vmax.f32 %v738_v59, 0.0 }
 0x166   :  { %v1150_v0 = vpack.c.bf16 %v1056_v61, %v1055_v60 }
 0x167   :  { %v1149_v1 = vpack.c.bf16 %v1054_v63, %v1053_v62  ;;  %v4342_v2 = vpop.f32.mrb[68].mxu0 }
 0x168   :  { %v759_v3 = vadd.f32 %v4342_v2, %v5391_v48  ;;  %v750_v4 = vpop.f32.mrb[69].mxu0 }
 0x169   :  { %v751_v5 = vadd.f32 %v5391_v48, %v750_v4  ;;  %v4343_v6 = vpop.f32.mrb[70].mxu0  ;;  %4480 = vmatprep.mubr.bf16.mxu1 %v1149_v1 }
 0x16a   :  { %v762_v7 = vadd.f32 %v4343_v6, %v5391_v48  ;;  %v753_v8 = vpop.f32.mrb[71].mxu0  ;;  %4481 = vmatmul.mubr.bf16.gmra.mrb[64].mxu1 %v1150_v0  ;;  %v1059_v10 = vmax.f32 %v759_v3, 0.0 }
 0x16b   :  { %v754_v9 = vadd.f32 %v5391_v48, %v753_v8  ;;  %v1057_v12 = vmax.f32 %v751_v5, 0.0 }
 0x16c   :  { %v1060_v11 = vmax.f32 %v762_v7, 0.0 }
 0x16d   :  { %v1058_v13 = vmax.f32 %v754_v9, 0.0 }
 0x16e   :  { %v1152_v14 = vpack.c.bf16 %v1060_v11, %v1059_v10 }
 0x16f   :  { %v1151_v15 = vpack.c.bf16 %v1058_v13, %v1057_v12  ;;  %v4346_v16 = vpop.f32.mrb[72].mxu0 }
 0x170   :  { %v775_v17 = vadd.f32 %v4346_v16, %v5391_v48  ;;  %v766_v18 = vpop.f32.mrb[73].mxu0 }
 0x171   :  { %v767_v19 = vadd.f32 %v5391_v48, %v766_v18  ;;  %v4347_v20 = vpop.f32.mrb[74].mxu0  ;;  %4484 = vmatprep.mubr.bf16.mxu1 %v1151_v15 }
 0x172   :  { %v778_v21 = vadd.f32 %v4347_v20, %v5391_v48  ;;  %v769_v22 = vpop.f32.mrb[75].mxu0  ;;  %4485 = vmatmul.mubr.bf16.gmra.mrb[68].mxu1 %v1152_v14  ;;  %v1063_v24 = vmax.f32 %v775_v17, 0.0 }
 0x173   :  { %v770_v23 = vadd.f32 %v5391_v48, %v769_v22  ;;  %v1061_v26 = vmax.f32 %v767_v19, 0.0 }
 0x174   :  { %v1064_v25 = vmax.f32 %v778_v21, 0.0 }
 0x175   :  { %v1062_v27 = vmax.f32 %v770_v23, 0.0 }
 0x176   :  { %v1154_v28 = vpack.c.bf16 %v1064_v25, %v1063_v24 }
 0x177   :  { %v1153_v29 = vpack.c.bf16 %v1062_v27, %v1061_v26  ;;  %v4350_v30 = vpop.f32.mrb[76].mxu0 }
 0x178   :  { %v791_v31 = vadd.f32 %v4350_v30, %v5391_v48  ;;  %v782_v32 = vpop.f32.mrb[77].mxu0 }
 0x179   :  { %v783_v33 = vadd.f32 %v5391_v48, %v782_v32  ;;  %v4351_v34 = vpop.f32.mrb[78].mxu0  ;;  %4488 = vmatprep.mubr.bf16.mxu1 %v1153_v29 }
 0x17a   :  { %v794_v35 = vadd.f32 %v4351_v34, %v5391_v48  ;;  %v785_v36 = vpop.f32.mrb[79].mxu0  ;;  %4489 = vmatmul.mubr.bf16.gmra.mrb[72].mxu1 %v1154_v28  ;;  %v1067_v38 = vmax.f32 %v791_v31, 0.0 }
 0x17b   :  { %v786_v37 = vadd.f32 %v5391_v48, %v785_v36  ;;  %v1065_v40 = vmax.f32 %v783_v33, 0.0 }
 0x17c   :  { %v1068_v39 = vmax.f32 %v794_v35, 0.0 }
 0x17d   :  { %v1066_v41 = vmax.f32 %v786_v37, 0.0 }
 0x17e   :  { %v1156_v42 = vpack.c.bf16 %v1068_v39, %v1067_v38 }
 0x17f   :  { %v1155_v43 = vpack.c.bf16 %v1066_v41, %v1065_v40  ;;  %v4354_v44 = vpop.f32.mrb[80].mxu0 }
 0x180   :  { %v807_v45 = vadd.f32 %v4354_v44, %v5391_v48  ;;  %v798_v46 = vpop.f32.mrb[81].mxu0 }
 0x181   :  { %v799_v47 = vadd.f32 %v5391_v48, %v798_v46  ;;  %v4355_v49 = vpop.f32.mrb[82].mxu0  ;;  %4492 = vmatprep.mubr.bf16.mxu1 %v1155_v43 }
 0x182   :  { %v810_v50 = vadd.f32 %v4355_v49, %v5391_v48  ;;  %v801_v51 = vpop.f32.mrb[83].mxu0  ;;  %4493 = vmatmul.mubr.bf16.gmra.mrb[76].mxu1 %v1156_v42  ;;  %v1071_v53 = vmax.f32 %v807_v45, 0.0 }
 0x183   :  { %v802_v52 = vadd.f32 %v5391_v48, %v801_v51  ;;  %v1069_v55 = vmax.f32 %v799_v47, 0.0 }
 0x184   :  { %v1072_v54 = vmax.f32 %v810_v50, 0.0 }
 0x185   :  { %v1070_v56 = vmax.f32 %v802_v52, 0.0 }
 0x186   :  { %v1158_v57 = vpack.c.bf16 %v1072_v54, %v1071_v53 }
 0x187   :  { %v1157_v58 = vpack.c.bf16 %v1070_v56, %v1069_v55  ;;  %v4358_v59 = vpop.f32.mrb[84].mxu0 }
 0x188   :  { %v823_v60 = vadd.f32 %v4358_v59, %v5391_v48  ;;  %v814_v61 = vpop.f32.mrb[85].mxu0 }
 0x189   :  { %v815_v62 = vadd.f32 %v5391_v48, %v814_v61  ;;  %v4359_v63 = vpop.f32.mrb[86].mxu0  ;;  %4496 = vmatprep.mubr.bf16.mxu1 %v1157_v58 }
 0x18a   :  { %v826_v0 = vadd.f32 %v4359_v63, %v5391_v48  ;;  %v817_v1 = vpop.f32.mrb[87].mxu0  ;;  %4497 = vmatmul.mubr.bf16.gmra.mrb[80].mxu1 %v1158_v57  ;;  %v1075_v3 = vmax.f32 %v823_v60, 0.0 }
 0x18b   :  { %v818_v2 = vadd.f32 %v5391_v48, %v817_v1  ;;  %v1073_v5 = vmax.f32 %v815_v62, 0.0 }
 0x18c   :  { %v1076_v4 = vmax.f32 %v826_v0, 0.0 }
 0x18d   :  { %v1074_v6 = vmax.f32 %v818_v2, 0.0 }
 0x18e   :  { %v1160_v7 = vpack.c.bf16 %v1076_v4, %v1075_v3 }
 0x18f   :  { %v1159_v8 = vpack.c.bf16 %v1074_v6, %v1073_v5  ;;  %v4362_v9 = vpop.f32.mrb[88].mxu0 }
 0x190   :  { %v839_v10 = vadd.f32 %v4362_v9, %v5391_v48  ;;  %v830_v11 = vpop.f32.mrb[89].mxu0 }
 0x191   :  { %v831_v12 = vadd.f32 %v5391_v48, %v830_v11  ;;  %v4363_v13 = vpop.f32.mrb[90].mxu0  ;;  %4500 = vmatprep.mubr.bf16.mxu1 %v1159_v8 }
 0x192   :  { %v842_v14 = vadd.f32 %v4363_v13, %v5391_v48  ;;  %v833_v15 = vpop.f32.mrb[91].mxu0  ;;  %4501 = vmatmul.mubr.bf16.gmra.mrb[84].mxu1 %v1160_v7  ;;  %v1079_v17 = vmax.f32 %v839_v10, 0.0 }
 0x193   :  { %v834_v16 = vadd.f32 %v5391_v48, %v833_v15  ;;  %v1077_v19 = vmax.f32 %v831_v12, 0.0 }
 0x194   :  { %v1080_v18 = vmax.f32 %v842_v14, 0.0 }
 0x195   :  { %v1078_v20 = vmax.f32 %v834_v16, 0.0 }
 0x196   :  { %v1162_v21 = vpack.c.bf16 %v1080_v18, %v1079_v17 }
 0x197   :  { %v1161_v22 = vpack.c.bf16 %v1078_v20, %v1077_v19  ;;  %v4366_v23 = vpop.f32.mrb[92].mxu0 }
 0x198   :  { %v855_v24 = vadd.f32 %v4366_v23, %v5391_v48  ;;  %v846_v25 = vpop.f32.mrb[93].mxu0 }
 0x199   :  { %v847_v26 = vadd.f32 %v5391_v48, %v846_v25  ;;  %v4367_v27 = vpop.f32.mrb[94].mxu0  ;;  %4504 = vmatprep.mubr.bf16.mxu1 %v1161_v22 }
 0x19a   :  { %v858_v28 = vadd.f32 %v4367_v27, %v5391_v48  ;;  %v849_v29 = vpop.f32.mrb[95].mxu0  ;;  %4505 = vmatmul.mubr.bf16.gmra.mrb[88].mxu1 %v1162_v21  ;;  %v1083_v31 = vmax.f32 %v855_v24, 0.0  ;;  %v5584_v24 = vld [vmem:[%s6209_s4] ss:$0 sm:$0xff] }
 0x19b   :  { %v850_v30 = vadd.f32 %v5391_v48, %v849_v29  ;;  %v1081_v33 = vmax.f32 %v847_v26, 0.0 }
 0x19c   :  { %v1084_v32 = vmax.f32 %v858_v28, 0.0 }
 0x19d   :  { %v1082_v34 = vmax.f32 %v850_v30, 0.0 }
 0x19e   :  { %v1164_v35 = vpack.c.bf16 %v1084_v32, %v1083_v31 }
 0x19f   :  { %v1163_v36 = vpack.c.bf16 %v1082_v34, %v1081_v33  ;;  %v4370_v37 = vpop.f32.mrb[96].mxu0 }
 0x1a0   :  { %v871_v38 = vadd.f32 %v4370_v37, %v5391_v48  ;;  %v862_v39 = vpop.f32.mrb[97].mxu0 }
 0x1a1   :  { %v863_v40 = vadd.f32 %v5391_v48, %v862_v39  ;;  %v4371_v41 = vpop.f32.mrb[98].mxu0  ;;  %4508 = vmatprep.mubr.bf16.mxu1 %v1163_v36 }
 0x1a2   :  { %v874_v42 = vadd.f32 %v4371_v41, %v5391_v48  ;;  %v865_v43 = vpop.f32.mrb[99].mxu0  ;;  %4509 = vmatmul.mubr.bf16.gmra.mrb[92].mxu1 %v1164_v35  ;;  %v1087_v45 = vmax.f32 %v871_v38, 0.0 }
 0x1a3   :  { %v866_v44 = vadd.f32 %v5391_v48, %v865_v43  ;;  %v1085_v47 = vmax.f32 %v863_v40, 0.0 }
 0x1a4   :  { %v1088_v46 = vmax.f32 %v874_v42, 0.0 }
 0x1a5   :  { %v1086_v49 = vmax.f32 %v866_v44, 0.0 }
 0x1a6   :  { %v1166_v50 = vpack.c.bf16 %v1088_v46, %v1087_v45  ;;  %v5595_v46 = vld [vmem:[%s6207_s2] ss:$0 sm:$0xff] }
 0x1a7   :  { %v1165_v51 = vpack.c.bf16 %v1086_v49, %v1085_v47  ;;  %v4374_v52 = vpop.f32.mrb[100].mxu0 }
 0x1a8   :  { %v887_v53 = vadd.f32 %v4374_v52, %v5391_v48  ;;  %v878_v54 = vpop.f32.mrb[101].mxu0 }
 0x1a9   :  { %v879_v55 = vadd.f32 %v5391_v48, %v878_v54  ;;  %v4375_v56 = vpop.f32.mrb[102].mxu0  ;;  %4512 = vmatprep.mubr.bf16.mxu1 %v1165_v51 }
 0x1aa   :  { %v890_v57 = vadd.f32 %v4375_v56, %v5391_v48  ;;  %v881_v58 = vpop.f32.mrb[103].mxu0  ;;  %4513 = vmatmul.mubr.bf16.gmra.mrb[96].mxu1 %v1166_v50  ;;  %v1091_v60 = vmax.f32 %v887_v53, 0.0 }
 0x1ab   :  { %v882_v59 = vadd.f32 %v5391_v48, %v881_v58  ;;  %v1089_v62 = vmax.f32 %v879_v55, 0.0 }
 0x1ac   :  { %v1092_v61 = vmax.f32 %v890_v57, 0.0 }
 0x1ad   :  { %v1090_v63 = vmax.f32 %v882_v59, 0.0 }
 0x1ae   :  { %v1168_v0 = vpack.c.bf16 %v1092_v61, %v1091_v60 }
 0x1af   :  { %v1167_v1 = vpack.c.bf16 %v1090_v63, %v1089_v62  ;;  %v4378_v2 = vpop.f32.mrb[104].mxu0 }
 0x1b0   :  { %v903_v3 = vadd.f32 %v4378_v2, %v5391_v48  ;;  %v894_v4 = vpop.f32.mrb[105].mxu0 }
 0x1b1   :  { %v895_v5 = vadd.f32 %v5391_v48, %v894_v4  ;;  %v4379_v6 = vpop.f32.mrb[106].mxu0  ;;  %4516 = vmatprep.mubr.bf16.mxu1 %v1167_v1 }
 0x1b2   :  { %v906_v7 = vadd.f32 %v4379_v6, %v5391_v48  ;;  %v897_v8 = vpop.f32.mrb[107].mxu0  ;;  %4517 = vmatmul.mubr.bf16.gmra.mrb[100].mxu1 %v1168_v0  ;;  %v1095_v10 = vmax.f32 %v903_v3, 0.0 }
 0x1b3   :  { %v898_v9 = vadd.f32 %v5391_v48, %v897_v8  ;;  %v1093_v12 = vmax.f32 %v895_v5, 0.0 }
 0x1b4   :  { %v1096_v11 = vmax.f32 %v906_v7, 0.0 }
 0x1b5   :  { %v1094_v13 = vmax.f32 %v898_v9, 0.0 }
 0x1b6   :  { %v1170_v14 = vpack.c.bf16 %v1096_v11, %v1095_v10 }
 0x1b7   :  { %v1169_v15 = vpack.c.bf16 %v1094_v13, %v1093_v12  ;;  %v4382_v16 = vpop.f32.mrb[108].mxu0 }
 0x1b8   :  { %v919_v17 = vadd.f32 %v4382_v16, %v5391_v48  ;;  %v910_v18 = vpop.f32.mrb[109].mxu0 }
 0x1b9   :  { %v911_v19 = vadd.f32 %v5391_v48, %v910_v18  ;;  %v4383_v20 = vpop.f32.mrb[110].mxu0  ;;  %4520 = vmatprep.mubr.bf16.mxu1 %v1169_v15 }
 0x1ba   :  { %v922_v21 = vadd.f32 %v4383_v20, %v5391_v48  ;;  %v913_v22 = vpop.f32.mrb[111].mxu0  ;;  %4521 = vmatmul.mubr.bf16.gmra.mrb[104].mxu1 %v1170_v14  ;;  %v1099_v25 = vmax.f32 %v919_v17, 0.0 }
 0x1bb   :  { %v914_v23 = vadd.f32 %v5391_v48, %v913_v22  ;;  %v1097_v27 = vmax.f32 %v911_v19, 0.0 }
 0x1bc   :  { %v1100_v26 = vmax.f32 %v922_v21, 0.0 }
 0x1bd   :  { %v1098_v28 = vmax.f32 %v914_v23, 0.0  ;;  %v4418_v29 = vpop.f32.mrb[0].mxu1 }
 0x1be   :  { %v1172_v30 = vpack.c.bf16 %v1100_v26, %v1099_v25  ;;  %v1295_v31 = vadd.f32 %v4418_v29, %v5584_v24  ;;  %v1286_v32 = vpop.f32.mrb[1].mxu1 }
 0x1bf   :  { %v1171_v33 = vpack.c.bf16 %v1098_v28, %v1097_v27  ;;  %v1287_v34 = vadd.f32 %v5584_v24, %v1286_v32  ;;  %v4386_v35 = vpop.f32.mrb[112].mxu0  ;;  %v4419_v36 = vpop.f32.mrb[2].mxu1 }
 0x1c0   :  { %v935_v37 = vadd.f32 %v4386_v35, %v5391_v48  ;;  %v1298_v38 = vadd.f32 %v4419_v36, %v5584_v24  ;;  %v926_v39 = vpop.f32.mrb[113].mxu0  ;;  %v1289_v40 = vpop.f32.mrb[3].mxu1  ;;  %v1799_v44 = vmax.f32 %v1295_v31, 0.0 }
 0x1c1   :  { %v927_v41 = vadd.f32 %v5391_v48, %v926_v39  ;;  %v1290_v42 = vadd.f32 %v5584_v24, %v1289_v40  ;;  %v4387_v43 = vpop.f32.mrb[114].mxu0  ;;  %4524 = vmatprep.mubr.bf16.mxu1 %v1171_v33  ;;  %v1797_v50 = vmax.f32 %v1287_v34, 0.0 }
 0x1c2   :  { %v1800_v45 = vmax.f32 %v1298_v38, 0.0  ;;  %v938_v47 = vadd.f32 %v5595_v46, %v4387_v43  ;;  %v929_v49 = vpop.f32.mrb[115].mxu0  ;;  %4525 = vmatmul.mubr.bf16.gmra.mrb[108].mxu1 %v1172_v30  ;;  %v1103_v48 = vmax.f32 %v935_v37, 0.0 }
 0x1c3   :  { %v1798_v51 = vmax.f32 %v1290_v42, 0.0  ;;  %v930_v52 = vadd.f32 %v5595_v46, %v929_v49  ;;  %v1101_v55 = vmax.f32 %v927_v41, 0.0 }
 0x1c4   :  { %v1926_v53 = vpack.c.bf16 %v1800_v45, %v1799_v44  ;;  %v1104_v54 = vmax.f32 %v938_v47, 0.0 }
 0x1c5   :  { %v1925_v56 = vpack.c.bf16 %v1798_v51, %v1797_v50  ;;  %v1102_v57 = vmax.f32 %v930_v52, 0.0  ;;  %v4422_v58 = vpop.f32.mrb[4].mxu1 }
 0x1c6   :  { %v1174_v59 = vpack.c.bf16 %v1104_v54, %v1103_v48  ;;  %v1311_v60 = vadd.f32 %v4422_v58, %v5584_v24  ;;  %v1302_v61 = vpop.f32.mrb[5].mxu1 }
 0x1c7   :  { %v1173_v62 = vpack.c.bf16 %v1102_v57, %v1101_v55  ;;  %v1303_v63 = vadd.f32 %v5584_v24, %v1302_v61  ;;  %v4423_v0 = vpop.f32.mrb[6].mxu1  ;;  %4552 = vmatprep.mubr.msk.bf16.mxu0 %vm2028_vm1, %v1925_v56  ;;  %v4390_v1 = vpop.f32.mrb[116].mxu0 }
 0x1c8   :  { %v1314_v2 = vadd.f32 %v4423_v0, %v5584_v24  ;;  %v1305_v3 = vpop.f32.mrb[7].mxu1  ;;  %4553 = vmatmul.mubr.msk.bf16.vlgmr.msra.gmra.mrb[128].mxu0 %vm2028_vm1, %v1926_v53  ;;  %v951_v4 = vadd.f32 %v5595_v46, %v4390_v1  ;;  %v942_v5 = vpop.f32.mrb[117].mxu0  ;;  %v1803_v9 = vmax.f32 %v1311_v60, 0.0 }
 0x1c9   :  { %v1306_v6 = vadd.f32 %v5584_v24, %v1305_v3  ;;  %4528 = vmatprep.mubr.bf16.mxu1 %v1173_v62  ;;  %v943_v7 = vadd.f32 %v5595_v46, %v942_v5  ;;  %v4391_v8 = vpop.f32.mrb[118].mxu0  ;;  %v1801_v14 = vmax.f32 %v1303_v63, 0.0 }
 0x1ca   :  { %v1804_v10 = vmax.f32 %v1314_v2, 0.0  ;;  %4529 = vmatmul.mubr.bf16.gmra.mrb[112].mxu1 %v1174_v59  ;;  %v1107_v11 = vmax.f32 %v951_v4, 0.0  ;;  %v954_v12 = vadd.f32 %v5595_v46, %v4391_v8  ;;  %v945_v13 = vpop.f32.mrb[119].mxu0 }
 0x1cb   :  { %v1802_v15 = vmax.f32 %v1306_v6, 0.0  ;;  %v1105_v16 = vmax.f32 %v943_v7, 0.0  ;;  %v946_v17 = vadd.f32 %v5595_v46, %v945_v13 }
 0x1cc   :  { %v1928_v18 = vpack.c.bf16 %v1804_v10, %v1803_v9  ;;  %v1108_v19 = vmax.f32 %v954_v12, 0.0 }
 0x1cd   :  { %v1927_v20 = vpack.c.bf16 %v1802_v15, %v1801_v14  ;;  %v4426_v21 = vpop.f32.mrb[8].mxu1  ;;  %v1106_v22 = vmax.f32 %v946_v17, 0.0 }
 0x1ce   :  { %v1327_v23 = vadd.f32 %v4426_v21, %v5584_v24  ;;  %v1318_v25 = vpop.f32.mrb[9].mxu1  ;;  %v1176_v26 = vpack.c.bf16 %v1108_v19, %v1107_v11 }
 0x1cf   :  { %v1319_v27 = vadd.f32 %v5584_v24, %v1318_v25  ;;  %v4427_v28 = vpop.f32.mrb[10].mxu1  ;;  %4556 = vmatprep.mubr.msk.bf16.mxu0 %vm2028_vm1, %v1927_v20  ;;  %v1175_v29 = vpack.c.bf16 %v1106_v22, %v1105_v16  ;;  %v4394_v30 = vpop.f32.mrb[120].mxu0 }
 0x1d0   :  { %v1330_v31 = vadd.f32 %v4427_v28, %v5584_v24  ;;  %v1321_v32 = vpop.f32.mrb[11].mxu1  ;;  %4557 = vmatmul.mubr.msk.bf16.gmra.mrb[132].mxu0 %vm2028_vm1, %v1928_v18  ;;  %v967_v33 = vadd.f32 %v5595_v46, %v4394_v30  ;;  %v958_v34 = vpop.f32.mrb[121].mxu0  ;;  %v1807_v38 = vmax.f32 %v1327_v23, 0.0 }
 0x1d1   :  { %v1322_v35 = vadd.f32 %v5584_v24, %v1321_v32  ;;  %4532 = vmatprep.mubr.bf16.mxu1 %v1175_v29  ;;  %v959_v36 = vadd.f32 %v5595_v46, %v958_v34  ;;  %v4395_v37 = vpop.f32.mrb[122].mxu0  ;;  %v1805_v43 = vmax.f32 %v1319_v27, 0.0 }
 0x1d2   :  { %v1808_v39 = vmax.f32 %v1330_v31, 0.0  ;;  %4533 = vmatmul.mubr.bf16.gmra.mrb[116].mxu1 %v1176_v26  ;;  %v1111_v40 = vmax.f32 %v967_v33, 0.0  ;;  %v970_v41 = vadd.f32 %v5595_v46, %v4395_v37  ;;  %v961_v42 = vpop.f32.mrb[123].mxu0 }
 0x1d3   :  { %v1806_v44 = vmax.f32 %v1322_v35, 0.0  ;;  %v1109_v45 = vmax.f32 %v959_v36, 0.0  ;;  %v962_v47 = vadd.f32 %v5595_v46, %v961_v42 }
 0x1d4   :  { %v1930_v49 = vpack.c.bf16 %v1808_v39, %v1807_v38  ;;  %v1112_v50 = vmax.f32 %v970_v41, 0.0 }
 0x1d5   :  { %v1929_v51 = vpack.c.bf16 %v1806_v44, %v1805_v43  ;;  %v4430_v52 = vpop.f32.mrb[12].mxu1  ;;  %v1110_v48 = vmax.f32 %v962_v47, 0.0 }
 0x1d6   :  { %v1343_v53 = vadd.f32 %v4430_v52, %v5584_v24  ;;  %v1334_v54 = vpop.f32.mrb[13].mxu1  ;;  %v1178_v55 = vpack.c.bf16 %v1112_v50, %v1111_v40 }
 0x1d7   :  { %v1335_v56 = vadd.f32 %v5584_v24, %v1334_v54  ;;  %v4431_v57 = vpop.f32.mrb[14].mxu1  ;;  %4560 = vmatprep.mubr.msk.bf16.mxu0 %vm2028_vm1, %v1929_v51  ;;  %v1177_v58 = vpack.c.bf16 %v1110_v48, %v1109_v45  ;;  %v4398_v59 = vpop.f32.mrb[124].mxu0 }
 0x1d8   :  { %v1346_v60 = vadd.f32 %v4431_v57, %v5584_v24  ;;  %v1337_v61 = vpop.f32.mrb[15].mxu1  ;;  %4561 = vmatmul.mubr.msk.bf16.gmra.mrb[136].mxu0 %vm2028_vm1, %v1930_v49  ;;  %v983_v62 = vadd.f32 %v5595_v46, %v4398_v59  ;;  %v974_v63 = vpop.f32.mrb[125].mxu0  ;;  %v1811_v3 = vmax.f32 %v1343_v53, 0.0 }
 0x1d9   :  { %v1338_v0 = vadd.f32 %v5584_v24, %v1337_v61  ;;  %4536 = vmatprep.mubr.bf16.mxu1 %v1177_v58  ;;  %v975_v1 = vadd.f32 %v5595_v46, %v974_v63  ;;  %v4399_v2 = vpop.f32.mrb[126].mxu0  ;;  %v1809_v8 = vmax.f32 %v1335_v56, 0.0 }
 0x1da   :  { %v1812_v4 = vmax.f32 %v1346_v60, 0.0  ;;  %4537 = vmatmul.mubr.bf16.gmra.mrb[120].mxu1 %v1178_v55  ;;  %v1115_v5 = vmax.f32 %v983_v62, 0.0  ;;  %v986_v6 = vadd.f32 %v5595_v46, %v4399_v2  ;;  %v977_v7 = vpop.f32.mrb[127].mxu0 }
 0x1db   :  { %v1810_v9 = vmax.f32 %v1338_v0, 0.0  ;;  %v1113_v10 = vmax.f32 %v975_v1, 0.0  ;;  %v978_v11 = vadd.f32 %v5595_v46, %v977_v7 }
 0x1dc   :  { %v1932_v12 = vpack.c.bf16 %v1812_v4, %v1811_v3  ;;  %v1116_v13 = vmax.f32 %v986_v6, 0.0 }
 0x1dd   :  { %v1931_v14 = vpack.c.bf16 %v1810_v9, %v1809_v8  ;;  %v4434_v15 = vpop.f32.mrb[16].mxu1  ;;  %v1114_v16 = vmax.f32 %v978_v11, 0.0 }
 0x1de   :  { %v1359_v17 = vadd.f32 %v4434_v15, %v5584_v24  ;;  %v1350_v18 = vpop.f32.mrb[17].mxu1  ;;  %v1180_v19 = vpack.c.bf16 %v1116_v13, %v1115_v5 }
 0x1df   :  { %v1351_v20 = vadd.f32 %v5584_v24, %v1350_v18  ;;  %v4435_v21 = vpop.f32.mrb[18].mxu1  ;;  %4564 = vmatprep.mubr.msk.bf16.mxu0 %vm2028_vm1, %v1931_v14  ;;  %v1179_v22 = vpack.c.bf16 %v1114_v16, %v1113_v10 }
 0x1e0   :  { %v1362_v23 = vadd.f32 %v4435_v21, %v5584_v24  ;;  %v1353_v25 = vpop.f32.mrb[19].mxu1  ;;  %4565 = vmatmul.mubr.msk.bf16.gmra.mrb[140].mxu0 %vm2028_vm1, %v1932_v12  ;;  %v1815_v26 = vmax.f32 %v1359_v17, 0.0 }
 0x1e1   :  { %v1354_v46 = vadd.f32 %v5584_v24, %v1353_v25  ;;  %4540 = vmatprep.mubr.bf16.mxu1 %v1179_v22  ;;  %v1813_v28 = vmax.f32 %v1351_v20, 0.0 }
 0x1e2   :  { %v1816_v27 = vmax.f32 %v1362_v23, 0.0  ;;  %4541 = vmatmul.mubr.bf16.gmra.mrb[124].mxu1 %v1180_v19 }
 0x1e3   :  { %v1814_v29 = vmax.f32 %v1354_v46, 0.0 }
 0x1e4   :  { %v1934_v30 = vpack.c.bf16 %v1816_v27, %v1815_v26 }
 0x1e5   :  { %v1933_v31 = vpack.c.bf16 %v1814_v29, %v1813_v28  ;;  %v4438_v32 = vpop.f32.mrb[20].mxu1 }
 0x1e6   :  { %v1375_v33 = vadd.f32 %v4438_v32, %v5584_v24  ;;  %v1366_v34 = vpop.f32.mrb[21].mxu1 }
 0x1e7   :  { %v1367_v35 = vadd.f32 %v5584_v24, %v1366_v34  ;;  %v4439_v36 = vpop.f32.mrb[22].mxu1  ;;  %4568 = vmatprep.mubr.msk.bf16.mxu0 %vm2028_vm1, %v1933_v31 }
 0x1e8   :  { %v1378_v37 = vadd.f32 %v4439_v36, %v5584_v24  ;;  %v1369_v38 = vpop.f32.mrb[23].mxu1  ;;  %4569 = vmatmul.mubr.msk.bf16.gmra.mrb[144].mxu0 %vm2028_vm1, %v1934_v30  ;;  %v1819_v40 = vmax.f32 %v1375_v33, 0.0 }
 0x1e9   :  { %v1370_v39 = vadd.f32 %v5584_v24, %v1369_v38  ;;  %v1817_v42 = vmax.f32 %v1367_v35, 0.0 }
 0x1ea   :  { %v1820_v41 = vmax.f32 %v1378_v37, 0.0 }
 0x1eb   :  { %v1818_v43 = vmax.f32 %v1370_v39, 0.0 }
 0x1ec   :  { %v1936_v44 = vpack.c.bf16 %v1820_v41, %v1819_v40 }
 0x1ed   :  { %v1935_v45 = vpack.c.bf16 %v1818_v43, %v1817_v42  ;;  %v4442_v47 = vpop.f32.mrb[24].mxu1 }
 0x1ee   :  { %v1391_v49 = vadd.f32 %v4442_v47, %v5584_v24  ;;  %v1382_v50 = vpop.f32.mrb[25].mxu1 }
 0x1ef   :  { %v1383_v51 = vadd.f32 %v5584_v24, %v1382_v50  ;;  %v4443_v52 = vpop.f32.mrb[26].mxu1  ;;  %4572 = vmatprep.mubr.msk.bf16.mxu0 %vm2028_vm1, %v1935_v45 }
 0x1f0   :  { %v1394_v48 = vadd.f32 %v4443_v52, %v5584_v24  ;;  %v1385_v53 = vpop.f32.mrb[27].mxu1  ;;  %4573 = vmatmul.mubr.msk.bf16.gmra.mrb[148].mxu0 %vm2028_vm1, %v1936_v44  ;;  %v1823_v55 = vmax.f32 %v1391_v49, 0.0 }
 0x1f1   :  { %v1386_v54 = vadd.f32 %v5584_v24, %v1385_v53  ;;  %v1821_v57 = vmax.f32 %v1383_v51, 0.0 }
 0x1f2   :  { %v1824_v56 = vmax.f32 %v1394_v48, 0.0 }
 0x1f3   :  { %v1822_v58 = vmax.f32 %v1386_v54, 0.0 }
 0x1f4   :  { %v1938_v59 = vpack.c.bf16 %v1824_v56, %v1823_v55 }
 0x1f5   :  { %v1937_v60 = vpack.c.bf16 %v1822_v58, %v1821_v57  ;;  %v4446_v61 = vpop.f32.mrb[28].mxu1 }
 0x1f6   :  { %v1407_v62 = vadd.f32 %v4446_v61, %v5584_v24  ;;  %v1398_v63 = vpop.f32.mrb[29].mxu1 }
 0x1f7   :  { %v1399_v0 = vadd.f32 %v5584_v24, %v1398_v63  ;;  %v4447_v1 = vpop.f32.mrb[30].mxu1  ;;  %4576 = vmatprep.mubr.msk.bf16.mxu0 %vm2028_vm1, %v1937_v60 }
 0x1f8   :  { %v1410_v2 = vadd.f32 %v4447_v1, %v5584_v24  ;;  %v1401_v3 = vpop.f32.mrb[31].mxu1  ;;  %4577 = vmatmul.mubr.msk.bf16.gmra.mrb[152].mxu0 %vm2028_vm1, %v1938_v59  ;;  %v1827_v5 = vmax.f32 %v1407_v62, 0.0 }
 0x1f9   :  { %v1402_v4 = vadd.f32 %v5584_v24, %v1401_v3  ;;  %v1825_v7 = vmax.f32 %v1399_v0, 0.0 }
 0x1fa   :  { %v1828_v6 = vmax.f32 %v1410_v2, 0.0 }
 0x1fb   :  { %v1826_v8 = vmax.f32 %v1402_v4, 0.0 }
 0x1fc   :  { %v1940_v9 = vpack.c.bf16 %v1828_v6, %v1827_v5 }
 0x1fd   :  { %v1939_v10 = vpack.c.bf16 %v1826_v8, %v1825_v7  ;;  %v4450_v11 = vpop.f32.mrb[32].mxu1 }
 0x1fe   :  { %v1423_v12 = vadd.f32 %v4450_v11, %v5584_v24  ;;  %v1414_v13 = vpop.f32.mrb[33].mxu1 }
 0x1ff   :  { %v1415_v14 = vadd.f32 %v5584_v24, %v1414_v13  ;;  %v4451_v15 = vpop.f32.mrb[34].mxu1  ;;  %4580 = vmatprep.mubr.msk.bf16.mxu0 %vm2028_vm1, %v1939_v10 }
 0x200   :  { %v1426_v16 = vadd.f32 %v4451_v15, %v5584_v24  ;;  %v1417_v17 = vpop.f32.mrb[35].mxu1  ;;  %4581 = vmatmul.mubr.msk.bf16.gmra.mrb[156].mxu0 %vm2028_vm1, %v1940_v9  ;;  %v1831_v19 = vmax.f32 %v1423_v12, 0.0 }
 0x201   :  { %v1418_v18 = vadd.f32 %v5584_v24, %v1417_v17  ;;  %v1829_v21 = vmax.f32 %v1415_v14, 0.0 }
 0x202   :  { %v1832_v20 = vmax.f32 %v1426_v16, 0.0 }
 0x203   :  { %v1830_v22 = vmax.f32 %v1418_v18, 0.0 }
 0x204   :  { %v1942_v23 = vpack.c.bf16 %v1832_v20, %v1831_v19 }
 0x205   :  { %v1941_v25 = vpack.c.bf16 %v1830_v22, %v1829_v21  ;;  %v4454_v46 = vpop.f32.mrb[36].mxu1 }
 0x206   :  { %v1439_v26 = vadd.f32 %v4454_v46, %v5584_v24  ;;  %v1430_v27 = vpop.f32.mrb[37].mxu1 }
 0x207   :  { %v1431_v28 = vadd.f32 %v5584_v24, %v1430_v27  ;;  %v4455_v29 = vpop.f32.mrb[38].mxu1  ;;  %4584 = vmatprep.mubr.msk.bf16.mxu0 %vm2028_vm1, %v1941_v25 }
 0x208   :  { %v1442_v30 = vadd.f32 %v4455_v29, %v5584_v24  ;;  %v1433_v31 = vpop.f32.mrb[39].mxu1  ;;  %4585 = vmatmul.mubr.msk.bf16.gmra.mrb[160].mxu0 %vm2028_vm1, %v1942_v23  ;;  %v1835_v33 = vmax.f32 %v1439_v26, 0.0 }
 0x209   :  { %v1434_v32 = vadd.f32 %v5584_v24, %v1433_v31  ;;  %v1833_v35 = vmax.f32 %v1431_v28, 0.0 }
 0x20a   :  { %v1836_v34 = vmax.f32 %v1442_v30, 0.0 }
 0x20b   :  { %v1834_v36 = vmax.f32 %v1434_v32, 0.0 }
 0x20c   :  { %v1944_v37 = vpack.c.bf16 %v1836_v34, %v1835_v33 }
 0x20d   :  { %v1943_v38 = vpack.c.bf16 %v1834_v36, %v1833_v35  ;;  %v4458_v39 = vpop.f32.mrb[40].mxu1 }
 0x20e   :  { %v1455_v40 = vadd.f32 %v4458_v39, %v5584_v24  ;;  %v1446_v41 = vpop.f32.mrb[41].mxu1 }
 0x20f   :  { %v1447_v42 = vadd.f32 %v5584_v24, %v1446_v41  ;;  %v4459_v43 = vpop.f32.mrb[42].mxu1  ;;  %4588 = vmatprep.mubr.msk.bf16.mxu0 %vm2028_vm1, %v1943_v38 }
 0x210   :  { %v1458_v44 = vadd.f32 %v4459_v43, %v5584_v24  ;;  %v1449_v45 = vpop.f32.mrb[43].mxu1  ;;  %4589 = vmatmul.mubr.msk.bf16.gmra.mrb[164].mxu0 %vm2028_vm1, %v1944_v37  ;;  %v1839_v49 = vmax.f32 %v1455_v40, 0.0 }
 0x211   :  { %v1450_v47 = vadd.f32 %v5584_v24, %v1449_v45  ;;  %v1837_v51 = vmax.f32 %v1447_v42, 0.0 }
 0x212   :  { %v1840_v50 = vmax.f32 %v1458_v44, 0.0 }
 0x213   :  { %v1838_v52 = vmax.f32 %v1450_v47, 0.0 }
 0x214   :  { %v1946_v48 = vpack.c.bf16 %v1840_v50, %v1839_v49 }
 0x215   :  { %v1945_v53 = vpack.c.bf16 %v1838_v52, %v1837_v51  ;;  %v4462_v54 = vpop.f32.mrb[44].mxu1 }
 0x216   :  { %v1471_v55 = vadd.f32 %v4462_v54, %v5584_v24  ;;  %v1462_v56 = vpop.f32.mrb[45].mxu1 }
 0x217   :  { %v1463_v57 = vadd.f32 %v5584_v24, %v1462_v56  ;;  %v4463_v58 = vpop.f32.mrb[46].mxu1  ;;  %4592 = vmatprep.mubr.msk.bf16.mxu0 %vm2028_vm1, %v1945_v53 }
 0x218   :  { %v1474_v59 = vadd.f32 %v4463_v58, %v5584_v24  ;;  %v1465_v60 = vpop.f32.mrb[47].mxu1  ;;  %4593 = vmatmul.mubr.msk.bf16.gmra.mrb[168].mxu0 %vm2028_vm1, %v1946_v48  ;;  %v1843_v62 = vmax.f32 %v1471_v55, 0.0 }
 0x219   :  { %v1466_v61 = vadd.f32 %v5584_v24, %v1465_v60  ;;  %v1841_v0 = vmax.f32 %v1463_v57, 0.0 }
 0x21a   :  { %v1844_v63 = vmax.f32 %v1474_v59, 0.0 }
 0x21b   :  { %v1842_v1 = vmax.f32 %v1466_v61, 0.0 }
 0x21c   :  { %v1948_v2 = vpack.c.bf16 %v1844_v63, %v1843_v62 }
 0x21d   :  { %v1947_v3 = vpack.c.bf16 %v1842_v1, %v1841_v0  ;;  %v4466_v4 = vpop.f32.mrb[48].mxu1 }
 0x21e   :  { %v1487_v5 = vadd.f32 %v4466_v4, %v5584_v24  ;;  %v1478_v6 = vpop.f32.mrb[49].mxu1 }
 0x21f   :  { %v1479_v7 = vadd.f32 %v5584_v24, %v1478_v6  ;;  %v4467_v8 = vpop.f32.mrb[50].mxu1  ;;  %4596 = vmatprep.mubr.msk.bf16.mxu0 %vm2028_vm1, %v1947_v3 }
 0x220   :  { %v1490_v9 = vadd.f32 %v4467_v8, %v5584_v24  ;;  %v1481_v10 = vpop.f32.mrb[51].mxu1  ;;  %4597 = vmatmul.mubr.msk.bf16.gmra.mrb[172].mxu0 %vm2028_vm1, %v1948_v2  ;;  %v1847_v12 = vmax.f32 %v1487_v5, 0.0 }
 0x221   :  { %v1482_v11 = vadd.f32 %v5584_v24, %v1481_v10  ;;  %v1845_v14 = vmax.f32 %v1479_v7, 0.0 }
 0x222   :  { %v1848_v13 = vmax.f32 %v1490_v9, 0.0 }
 0x223   :  { %v1846_v15 = vmax.f32 %v1482_v11, 0.0 }
 0x224   :  { %v1950_v16 = vpack.c.bf16 %v1848_v13, %v1847_v12 }
 0x225   :  { %v1949_v17 = vpack.c.bf16 %v1846_v15, %v1845_v14  ;;  %v4470_v18 = vpop.f32.mrb[52].mxu1 }
 0x226   :  { %v1503_v19 = vadd.f32 %v4470_v18, %v5584_v24  ;;  %v1494_v20 = vpop.f32.mrb[53].mxu1 }
 0x227   :  { %v1495_v21 = vadd.f32 %v5584_v24, %v1494_v20  ;;  %v4471_v22 = vpop.f32.mrb[54].mxu1  ;;  %4600 = vmatprep.mubr.msk.bf16.mxu0 %vm2028_vm1, %v1949_v17 }
 0x228   :  { %v1506_v23 = vadd.f32 %v4471_v22, %v5584_v24  ;;  %v1497_v25 = vpop.f32.mrb[55].mxu1  ;;  %4601 = vmatmul.mubr.msk.bf16.gmra.mrb[176].mxu0 %vm2028_vm1, %v1950_v16  ;;  %v1851_v26 = vmax.f32 %v1503_v19, 0.0 }
 0x229   :  { %v1498_v46 = vadd.f32 %v5584_v24, %v1497_v25  ;;  %v1849_v28 = vmax.f32 %v1495_v21, 0.0 }
 0x22a   :  { %v1852_v27 = vmax.f32 %v1506_v23, 0.0 }
 0x22b   :  { %v1850_v29 = vmax.f32 %v1498_v46, 0.0 }
 0x22c   :  { %v1952_v30 = vpack.c.bf16 %v1852_v27, %v1851_v26 }
 0x22d   :  { %v1951_v31 = vpack.c.bf16 %v1850_v29, %v1849_v28  ;;  %v4474_v32 = vpop.f32.mrb[56].mxu1 }
 0x22e   :  { %v1519_v33 = vadd.f32 %v4474_v32, %v5584_v24  ;;  %v1510_v34 = vpop.f32.mrb[57].mxu1 }
 0x22f   :  { %v1511_v35 = vadd.f32 %v5584_v24, %v1510_v34  ;;  %v4475_v36 = vpop.f32.mrb[58].mxu1  ;;  %4604 = vmatprep.mubr.msk.bf16.mxu0 %vm2028_vm1, %v1951_v31 }
 0x230   :  { %v1522_v37 = vadd.f32 %v4475_v36, %v5584_v24  ;;  %v1513_v38 = vpop.f32.mrb[59].mxu1  ;;  %4605 = vmatmul.mubr.msk.bf16.gmra.mrb[180].mxu0 %vm2028_vm1, %v1952_v30  ;;  %v1855_v40 = vmax.f32 %v1519_v33, 0.0 }
 0x231   :  { %v1514_v39 = vadd.f32 %v5584_v24, %v1513_v38  ;;  %v1853_v42 = vmax.f32 %v1511_v35, 0.0 }
 0x232   :  { %v1856_v41 = vmax.f32 %v1522_v37, 0.0 }
 0x233   :  { %v1854_v43 = vmax.f32 %v1514_v39, 0.0 }
 0x234   :  { %v1954_v44 = vpack.c.bf16 %v1856_v41, %v1855_v40 }
 0x235   :  { %v1953_v45 = vpack.c.bf16 %v1854_v43, %v1853_v42  ;;  %v4478_v47 = vpop.f32.mrb[60].mxu1 }
 0x236   :  { %v1535_v49 = vadd.f32 %v4478_v47, %v5584_v24  ;;  %v1526_v50 = vpop.f32.mrb[61].mxu1 }
 0x237   :  { %v1527_v51 = vadd.f32 %v5584_v24, %v1526_v50  ;;  %v4479_v52 = vpop.f32.mrb[62].mxu1  ;;  %4608 = vmatprep.mubr.msk.bf16.mxu0 %vm2028_vm1, %v1953_v45 }
 0x238   :  { %v1538_v48 = vadd.f32 %v4479_v52, %v5584_v24  ;;  %v1529_v53 = vpop.f32.mrb[63].mxu1  ;;  %4609 = vmatmul.mubr.msk.bf16.gmra.mrb[184].mxu0 %vm2028_vm1, %v1954_v44  ;;  %v1859_v55 = vmax.f32 %v1535_v49, 0.0 }
 0x239   :  { %v1530_v54 = vadd.f32 %v5584_v24, %v1529_v53  ;;  %v1857_v57 = vmax.f32 %v1527_v51, 0.0 }
 0x23a   :  { %v1860_v56 = vmax.f32 %v1538_v48, 0.0 }
 0x23b   :  { %v1858_v58 = vmax.f32 %v1530_v54, 0.0 }
 0x23c   :  { %v1956_v59 = vpack.c.bf16 %v1860_v56, %v1859_v55 }
 0x23d   :  { %v1955_v60 = vpack.c.bf16 %v1858_v58, %v1857_v57  ;;  %v4482_v61 = vpop.f32.mrb[64].mxu1 }
 0x23e   :  { %v1551_v62 = vadd.f32 %v4482_v61, %v5584_v24  ;;  %v1542_v63 = vpop.f32.mrb[65].mxu1 }
 0x23f   :  { %v1543_v0 = vadd.f32 %v5584_v24, %v1542_v63  ;;  %v4483_v1 = vpop.f32.mrb[66].mxu1  ;;  %4612 = vmatprep.mubr.msk.bf16.mxu0 %vm2028_vm1, %v1955_v60 }
 0x240   :  { %v1554_v2 = vadd.f32 %v4483_v1, %v5584_v24  ;;  %v1545_v3 = vpop.f32.mrb[67].mxu1  ;;  %4613 = vmatmul.mubr.msk.bf16.gmra.mrb[188].mxu0 %vm2028_vm1, %v1956_v59  ;;  %v1863_v5 = vmax.f32 %v1551_v62, 0.0 }
 0x241   :  { %v1546_v4 = vadd.f32 %v5584_v24, %v1545_v3  ;;  %v1861_v7 = vmax.f32 %v1543_v0, 0.0 }
 0x242   :  { %v1864_v6 = vmax.f32 %v1554_v2, 0.0 }
 0x243   :  { %v1862_v8 = vmax.f32 %v1546_v4, 0.0 }
 0x244   :  { %v1958_v9 = vpack.c.bf16 %v1864_v6, %v1863_v5 }
 0x245   :  { %v1957_v10 = vpack.c.bf16 %v1862_v8, %v1861_v7  ;;  %v4486_v11 = vpop.f32.mrb[68].mxu1 }
 0x246   :  { %v1567_v12 = vadd.f32 %v4486_v11, %v5584_v24  ;;  %v1558_v13 = vpop.f32.mrb[69].mxu1 }
 0x247   :  { %v1559_v14 = vadd.f32 %v5584_v24, %v1558_v13  ;;  %v4487_v15 = vpop.f32.mrb[70].mxu1  ;;  %4616 = vmatprep.mubr.msk.bf16.mxu0 %vm2028_vm1, %v1957_v10 }
 0x248   :  { %v1570_v16 = vadd.f32 %v4487_v15, %v5584_v24  ;;  %v1561_v17 = vpop.f32.mrb[71].mxu1  ;;  %4617 = vmatmul.mubr.msk.bf16.gmra.mrb[192].mxu0 %vm2028_vm1, %v1958_v9  ;;  %v1867_v19 = vmax.f32 %v1567_v12, 0.0 }
 0x249   :  { %v1562_v18 = vadd.f32 %v5584_v24, %v1561_v17  ;;  %v1865_v21 = vmax.f32 %v1559_v14, 0.0 }
 0x24a   :  { %v1868_v20 = vmax.f32 %v1570_v16, 0.0 }
 0x24b   :  { %v1866_v22 = vmax.f32 %v1562_v18, 0.0 }
 0x24c   :  { %v1960_v23 = vpack.c.bf16 %v1868_v20, %v1867_v19 }
 0x24d   :  { %v1959_v25 = vpack.c.bf16 %v1866_v22, %v1865_v21  ;;  %v4490_v46 = vpop.f32.mrb[72].mxu1 }
 0x24e   :  { %v1583_v26 = vadd.f32 %v4490_v46, %v5584_v24  ;;  %v1574_v27 = vpop.f32.mrb[73].mxu1 }
 0x24f   :  { %v1575_v28 = vadd.f32 %v5584_v24, %v1574_v27  ;;  %v4491_v29 = vpop.f32.mrb[74].mxu1  ;;  %4620 = vmatprep.mubr.msk.bf16.mxu0 %vm2028_vm1, %v1959_v25 }
 0x250   :  { %v1586_v30 = vadd.f32 %v4491_v29, %v5584_v24  ;;  %v1577_v31 = vpop.f32.mrb[75].mxu1  ;;  %4621 = vmatmul.mubr.msk.bf16.gmra.mrb[196].mxu0 %vm2028_vm1, %v1960_v23  ;;  %v1871_v33 = vmax.f32 %v1583_v26, 0.0 }
 0x251   :  { %v1578_v32 = vadd.f32 %v5584_v24, %v1577_v31  ;;  %v1869_v35 = vmax.f32 %v1575_v28, 0.0 }
 0x252   :  { %v1872_v34 = vmax.f32 %v1586_v30, 0.0 }
 0x253   :  { %v1870_v36 = vmax.f32 %v1578_v32, 0.0 }
 0x254   :  { %v1962_v37 = vpack.c.bf16 %v1872_v34, %v1871_v33 }
 0x255   :  { %v1961_v38 = vpack.c.bf16 %v1870_v36, %v1869_v35  ;;  %v4494_v39 = vpop.f32.mrb[76].mxu1 }
 0x256   :  { %v1599_v40 = vadd.f32 %v4494_v39, %v5584_v24  ;;  %v1590_v41 = vpop.f32.mrb[77].mxu1 }
 0x257   :  { %v1591_v42 = vadd.f32 %v5584_v24, %v1590_v41  ;;  %v4495_v43 = vpop.f32.mrb[78].mxu1  ;;  %4624 = vmatprep.mubr.msk.bf16.mxu0 %vm2028_vm1, %v1961_v38 }
 0x258   :  { %v1602_v44 = vadd.f32 %v4495_v43, %v5584_v24  ;;  %v1593_v45 = vpop.f32.mrb[79].mxu1  ;;  %4625 = vmatmul.mubr.msk.bf16.gmra.mrb[200].mxu0 %vm2028_vm1, %v1962_v37  ;;  %v1875_v49 = vmax.f32 %v1599_v40, 0.0 }
 0x259   :  { %v1594_v47 = vadd.f32 %v5584_v24, %v1593_v45  ;;  %v1873_v51 = vmax.f32 %v1591_v42, 0.0 }
 0x25a   :  { %v1876_v50 = vmax.f32 %v1602_v44, 0.0 }
 0x25b   :  { %v1874_v52 = vmax.f32 %v1594_v47, 0.0 }
 0x25c   :  { %v1964_v48 = vpack.c.bf16 %v1876_v50, %v1875_v49 }
 0x25d   :  { %v1963_v53 = vpack.c.bf16 %v1874_v52, %v1873_v51  ;;  %v4498_v54 = vpop.f32.mrb[80].mxu1 }
 0x25e   :  { %v1615_v55 = vadd.f32 %v4498_v54, %v5584_v24  ;;  %v1606_v56 = vpop.f32.mrb[81].mxu1 }
 0x25f   :  { %v1607_v57 = vadd.f32 %v5584_v24, %v1606_v56  ;;  %v4499_v58 = vpop.f32.mrb[82].mxu1  ;;  %4628 = vmatprep.mubr.msk.bf16.mxu0 %vm2028_vm1, %v1963_v53 }
 0x260   :  { %v1618_v59 = vadd.f32 %v4499_v58, %v5584_v24  ;;  %v1609_v60 = vpop.f32.mrb[83].mxu1  ;;  %4629 = vmatmul.mubr.msk.bf16.gmra.mrb[204].mxu0 %vm2028_vm1, %v1964_v48  ;;  %v1879_v62 = vmax.f32 %v1615_v55, 0.0 }
 0x261   :  { %v1610_v61 = vadd.f32 %v5584_v24, %v1609_v60  ;;  %v1877_v0 = vmax.f32 %v1607_v57, 0.0 }
 0x262   :  { %v1880_v63 = vmax.f32 %v1618_v59, 0.0  ;;  %v5758_v59 = vld [vmem:[%s6212_s7] sm:$0x1] }
 0x263   :  { %v1878_v1 = vmax.f32 %v1610_v61, 0.0  ;;  %4164 = vmatprep.mubr.msk.f32.mxu1 %vm251_vm0, %v5758_v59 }
 0x264   :  { %v1966_v2 = vpack.c.bf16 %v1880_v63, %v1879_v62 }
 0x265   :  { %v1965_v3 = vpack.c.bf16 %v1878_v1, %v1877_v0  ;;  %v4502_v4 = vpop.f32.mrb[84].mxu1 }
 0x266   :  { %v1631_v5 = vadd.f32 %v4502_v4, %v5584_v24  ;;  %v1622_v6 = vpop.f32.mrb[85].mxu1 }
 0x267   :  { %v1623_v7 = vadd.f32 %v5584_v24, %v1622_v6  ;;  %v4503_v8 = vpop.f32.mrb[86].mxu1  ;;  %4632 = vmatprep.mubr.msk.bf16.mxu0 %vm2028_vm1, %v1965_v3 }
 0x268   :  { %v1634_v9 = vadd.f32 %v4503_v8, %v5584_v24  ;;  %v1625_v10 = vpop.f32.mrb[87].mxu1  ;;  %4633 = vmatmul.mubr.msk.bf16.gmra.mrb[208].mxu0 %vm2028_vm1, %v1966_v2  ;;  %v1883_v12 = vmax.f32 %v1631_v5, 0.0 }
 0x269   :  { %v1626_v11 = vadd.f32 %v5584_v24, %v1625_v10  ;;  %v1881_v14 = vmax.f32 %v1623_v7, 0.0 }
 0x26a   :  { %v1884_v13 = vmax.f32 %v1634_v9, 0.0 }
 0x26b   :  { %v1882_v15 = vmax.f32 %v1626_v11, 0.0 }
 0x26c   :  { %v1968_v16 = vpack.c.bf16 %v1884_v13, %v1883_v12 }
 0x26d   :  { %v1967_v17 = vpack.c.bf16 %v1882_v15, %v1881_v14  ;;  %v4506_v18 = vpop.f32.mrb[88].mxu1 }
 0x26e   :  { %v1647_v19 = vadd.f32 %v4506_v18, %v5584_v24  ;;  %v1638_v20 = vpop.f32.mrb[89].mxu1 }
 0x26f   :  { %v1639_v21 = vadd.f32 %v5584_v24, %v1638_v20  ;;  %v4507_v22 = vpop.f32.mrb[90].mxu1  ;;  %4636 = vmatprep.mubr.msk.bf16.mxu0 %vm2028_vm1, %v1967_v17 }
 0x270   :  { %v1650_v23 = vadd.f32 %v4507_v22, %v5584_v24  ;;  %v1641_v25 = vpop.f32.mrb[91].mxu1  ;;  %4637 = vmatmul.mubr.msk.bf16.gmra.mrb[212].mxu0 %vm2028_vm1, %v1968_v16  ;;  %v1887_v26 = vmax.f32 %v1647_v19, 0.0 }
 0x271   :  { %v1642_v46 = vadd.f32 %v5584_v24, %v1641_v25  ;;  %v1885_v28 = vmax.f32 %v1639_v21, 0.0 }
 0x272   :  { %v1888_v27 = vmax.f32 %v1650_v23, 0.0 }
 0x273   :  { %v1886_v29 = vmax.f32 %v1642_v46, 0.0 }
 0x274   :  { %v1970_v30 = vpack.c.bf16 %v1888_v27, %v1887_v26 }
 0x275   :  { %v1969_v31 = vpack.c.bf16 %v1886_v29, %v1885_v28  ;;  %v4510_v32 = vpop.f32.mrb[92].mxu1 }
 0x276   :  { %v1663_v33 = vadd.f32 %v4510_v32, %v5584_v24  ;;  %v1654_v34 = vpop.f32.mrb[93].mxu1 }
 0x277   :  { %v1655_v35 = vadd.f32 %v5584_v24, %v1654_v34  ;;  %v4511_v36 = vpop.f32.mrb[94].mxu1  ;;  %4640 = vmatprep.mubr.msk.bf16.mxu0 %vm2028_vm1, %v1969_v31  ;;  %v5780_v31 = vld [vmem:[%s6209_s4] ss:$0 sm:$0xff] }
 0x278   :  { %v1666_v37 = vadd.f32 %v4511_v36, %v5584_v24  ;;  %v1657_v38 = vpop.f32.mrb[95].mxu1  ;;  %4641 = vmatmul.mubr.msk.bf16.gmra.mrb[216].mxu0 %vm2028_vm1, %v1970_v30  ;;  %v1891_v40 = vmax.f32 %v1663_v33, 0.0 }
 0x279   :  { %v1658_v39 = vadd.f32 %v5584_v24, %v1657_v38  ;;  %v1889_v42 = vmax.f32 %v1655_v35, 0.0  ;;  %v5788_v35 = vld [vmem:[%s6211_s6] ss:$0 sm:$0xff] }
 0x27a   :  { %v1892_v41 = vmax.f32 %v1666_v37, 0.0 }
 0x27b   :  { %v1890_v43 = vmax.f32 %v1658_v39, 0.0 }
 0x27c   :  { %v1972_v44 = vpack.c.bf16 %v1892_v41, %v1891_v40 }
 0x27d   :  { %v1971_v45 = vpack.c.bf16 %v1890_v43, %v1889_v42  ;;  %v4514_v47 = vpop.f32.mrb[96].mxu1 }
 0x27e   :  { %v1679_v49 = vadd.f32 %v4514_v47, %v5584_v24  ;;  %v1670_v50 = vpop.f32.mrb[97].mxu1 }
 0x27f   :  { %v1671_v51 = vadd.f32 %v5584_v24, %v1670_v50  ;;  %v4515_v52 = vpop.f32.mrb[98].mxu1  ;;  %4644 = vmatprep.mubr.msk.bf16.mxu0 %vm2028_vm1, %v1971_v45 }
 0x280   :  { %v1682_v48 = vadd.f32 %v4515_v52, %v5584_v24  ;;  %v1673_v53 = vpop.f32.mrb[99].mxu1  ;;  %4645 = vmatmul.mubr.msk.bf16.gmra.mrb[220].mxu0 %vm2028_vm1, %v1972_v44  ;;  %v1895_v55 = vmax.f32 %v1679_v49, 0.0 }
 0x281   :  { %v1674_v54 = vadd.f32 %v5584_v24, %v1673_v53  ;;  %v1893_v57 = vmax.f32 %v1671_v51, 0.0 }
 0x282   :  { %v1896_v56 = vmax.f32 %v1682_v48, 0.0 }
 0x283   :  { %v1894_v58 = vmax.f32 %v1674_v54, 0.0 }
 0x284   :  { %v1974_v60 = vpack.c.bf16 %v1896_v56, %v1895_v55 }
 0x285   :  { %v1973_v61 = vpack.c.bf16 %v1894_v58, %v1893_v57  ;;  %v4518_v62 = vpop.f32.mrb[100].mxu1 }
 0x286   :  { %v1695_v63 = vadd.f32 %v4518_v62, %v5584_v24  ;;  %v1686_v0 = vpop.f32.mrb[101].mxu1 }
 0x287   :  { %v1687_v1 = vadd.f32 %v5584_v24, %v1686_v0  ;;  %v4519_v2 = vpop.f32.mrb[102].mxu1  ;;  %4648 = vmatprep.mubr.msk.bf16.mxu0 %vm2028_vm1, %v1973_v61 }
 0x288   :  { %v1698_v3 = vadd.f32 %v4519_v2, %v5584_v24  ;;  %v1689_v4 = vpop.f32.mrb[103].mxu1  ;;  %4649 = vmatmul.mubr.msk.bf16.gmra.mrb[224].mxu0 %vm2028_vm1, %v1974_v60  ;;  %v1899_v6 = vmax.f32 %v1695_v63, 0.0 }
 0x289   :  { %v1690_v5 = vadd.f32 %v5584_v24, %v1689_v4  ;;  %v1897_v8 = vmax.f32 %v1687_v1, 0.0 }
 0x28a   :  { %v1900_v7 = vmax.f32 %v1698_v3, 0.0 }
 0x28b   :  { %v1898_v9 = vmax.f32 %v1690_v5, 0.0 }
 0x28c   :  { %v1976_v10 = vpack.c.bf16 %v1900_v7, %v1899_v6 }
 0x28d   :  { %v1975_v11 = vpack.c.bf16 %v1898_v9, %v1897_v8  ;;  %v4522_v12 = vpop.f32.mrb[104].mxu1 }
 0x28e   :  { %v1711_v13 = vadd.f32 %v4522_v12, %v5584_v24  ;;  %v1702_v14 = vpop.f32.mrb[105].mxu1 }
 0x28f   :  { %v1703_v15 = vadd.f32 %v5584_v24, %v1702_v14  ;;  %v4523_v16 = vpop.f32.mrb[106].mxu1  ;;  %4652 = vmatprep.mubr.msk.bf16.mxu0 %vm2028_vm1, %v1975_v11 }
 0x290   :  { %v1714_v17 = vadd.f32 %v4523_v16, %v5584_v24  ;;  %v1705_v18 = vpop.f32.mrb[107].mxu1  ;;  %4653 = vmatmul.mubr.msk.bf16.gmra.mrb[228].mxu0 %vm2028_vm1, %v1976_v10  ;;  %v1903_v20 = vmax.f32 %v1711_v13, 0.0 }
 0x291   :  { %v1706_v19 = vadd.f32 %v5584_v24, %v1705_v18  ;;  %v1901_v22 = vmax.f32 %v1703_v15, 0.0 }
 0x292   :  { %v1904_v21 = vmax.f32 %v1714_v17, 0.0 }
 0x293   :  { %v1902_v23 = vmax.f32 %v1706_v19, 0.0 }
 0x294   :  { %v1978_v25 = vpack.c.bf16 %v1904_v21, %v1903_v20 }
 0x295   :  { %v1977_v46 = vpack.c.bf16 %v1902_v23, %v1901_v22  ;;  %v4526_v26 = vpop.f32.mrb[108].mxu1 }
 0x296   :  { %v1727_v27 = vadd.f32 %v4526_v26, %v5584_v24  ;;  %v1718_v28 = vpop.f32.mrb[109].mxu1 }
 0x297   :  { %v1719_v29 = vadd.f32 %v5584_v24, %v1718_v28  ;;  %v4527_v30 = vpop.f32.mrb[110].mxu1  ;;  %4656 = vmatprep.mubr.msk.bf16.mxu0 %vm2028_vm1, %v1977_v46 }
 0x298   :  { %v1730_v32 = vadd.f32 %v5780_v31, %v4527_v30  ;;  %v1721_v33 = vpop.f32.mrb[111].mxu1  ;;  %4657 = vmatmul.mubr.msk.bf16.gmra.mrb[232].mxu0 %vm2028_vm1, %v1978_v25  ;;  %v1907_v24 = vmax.f32 %v1727_v27, 0.0 }
 0x299   :  { %v1722_v34 = vadd.f32 %v5780_v31, %v1721_v33  ;;  %v1905_v37 = vmax.f32 %v1719_v29, 0.0 }
 0x29a   :  { %v1908_v36 = vmax.f32 %v1730_v32, 0.0 }
 0x29b   :  { %v1906_v38 = vmax.f32 %v1722_v34, 0.0  ;;  %v4554_v39 = vpop.f32.mrb[128].mxu0 }
 0x29c   :  { %v1980_v40 = vpack.c.bf16 %v1908_v36, %v1907_v24  ;;  %v2264_v41 = vadd.f32 %v4554_v39, %v5788_v35  ;;  %v2255_v42 = vpop.f32.mrb[129].mxu0 }
 0x29d   :  { %v1979_v43 = vpack.c.bf16 %v1906_v38, %v1905_v37  ;;  %v2256_v44 = vadd.f32 %v5788_v35, %v2255_v42  ;;  %v4530_v45 = vpop.f32.mrb[112].mxu1  ;;  %v4555_v47 = vpop.f32.mrb[130].mxu0 }
 0x29e   :  { %v1743_v49 = vadd.f32 %v5780_v31, %v4530_v45  ;;  %v2267_v50 = vadd.f32 %v4555_v47, %v5788_v35  ;;  %v1734_v51 = vpop.f32.mrb[113].mxu1  ;;  %v2258_v52 = vpop.f32.mrb[131].mxu0  ;;  %v2768_v55 = vmax.f32 %v2264_v41, 0.0 }
 0x29f   :  { %v1735_v48 = vadd.f32 %v5780_v31, %v1734_v51  ;;  %v2259_v53 = vadd.f32 %v5788_v35, %v2258_v52  ;;  %v4531_v54 = vpop.f32.mrb[114].mxu1  ;;  %4660 = vmatprep.mubr.msk.bf16.mxu0 %vm2028_vm1, %v1979_v43  ;;  %v2766_v60 = vmax.f32 %v2256_v44, 0.0 }
 0x2a0   :  { %v2769_v56 = vmax.f32 %v2267_v50, 0.0  ;;  %v1746_v57 = vadd.f32 %v5780_v31, %v4531_v54  ;;  %v1737_v58 = vpop.f32.mrb[115].mxu1  ;;  %4661 = vmatmul.mubr.msk.bf16.gmra.mrb[236].mxu0 %vm2028_vm1, %v1980_v40  ;;  %v1911_v63 = vmax.f32 %v1743_v49, 0.0 }
 0x2a1   :  { %v2767_v61 = vmax.f32 %v2259_v53, 0.0  ;;  %v1738_v62 = vadd.f32 %v5780_v31, %v1737_v58  ;;  %v1909_v2 = vmax.f32 %v1735_v48, 0.0 }
 0x2a2   :  { %v5800_v0 = vpack.c.bf16 %v2769_v56, %v2768_v55  ;;  %v1912_v1 = vmax.f32 %v1746_v57, 0.0 }
 0x2a3   :  { %v5802_v3 = vpack.c.bf16 %v2767_v61, %v2766_v60  ;;  %v1910_v4 = vmax.f32 %v1738_v62, 0.0  ;;  %v4558_v5 = vpop.f32.mrb[132].mxu0 }
 0x2a4   :  { %v1982_v6 = vpack.c.bf16 %v1912_v1, %v1911_v63  ;;  %v2280_v7 = vadd.f32 %v4558_v5, %v5788_v35  ;;  %v2271_v8 = vpop.f32.mrb[133].mxu0 }
 0x2a5   :  { %v1981_v9 = vpack.c.bf16 %v1910_v4, %v1909_v2  ;;  %v2272_v10 = vadd.f32 %v5788_v35, %v2271_v8  ;;  %v4559_v11 = vpop.f32.mrb[134].mxu0  ;;  %v4534_v12 = vpop.f32.mrb[116].mxu1 }
 0x2a6   :  { %v2283_v13 = vadd.f32 %v4559_v11, %v5788_v35  ;;  %v2274_v14 = vpop.f32.mrb[135].mxu0  ;;  %v1759_v15 = vadd.f32 %v5780_v31, %v4534_v12  ;;  %v1750_v16 = vpop.f32.mrb[117].mxu1  ;;  %v2772_v20 = vmax.f32 %v2280_v7, 0.0 }
 0x2a7   :  { %v2275_v17 = vadd.f32 %v5788_v35, %v2274_v14  ;;  %4664 = vmatprep.mubr.msk.bf16.mxu0 %vm2028_vm1, %v1981_v9  ;;  %v1751_v18 = vadd.f32 %v5780_v31, %v1750_v16  ;;  %v4535_v19 = vpop.f32.mrb[118].mxu1  ;;  %v2770_v46 = vmax.f32 %v2272_v10, 0.0 }
 0x2a8   :  { %v2773_v21 = vmax.f32 %v2283_v13, 0.0  ;;  %4665 = vmatmul.mubr.msk.bf16.gmra.mrb[240].mxu0 %vm2028_vm1, %v1982_v6  ;;  %v1915_v22 = vmax.f32 %v1759_v15, 0.0  ;;  %v1762_v23 = vadd.f32 %v5780_v31, %v4535_v19  ;;  %v1753_v25 = vpop.f32.mrb[119].mxu1 }
 0x2a9   :  { %v2771_v26 = vmax.f32 %v2275_v17, 0.0  ;;  %v1913_v27 = vmax.f32 %v1751_v18, 0.0  ;;  %v1754_v28 = vadd.f32 %v5780_v31, %v1753_v25 }
 0x2aa   :  { %v5814_v29 = vpack.c.bf16 %v2773_v21, %v2772_v20  ;;  %v1916_v30 = vmax.f32 %v1762_v23, 0.0 }
 0x2ab   :  { %v5816_v32 = vpack.c.bf16 %v2771_v26, %v2770_v46  ;;  %v4562_v33 = vpop.f32.mrb[136].mxu0  ;;  %v1914_v34 = vmax.f32 %v1754_v28, 0.0 }
 0x2ac   :  { %v2296_v24 = vadd.f32 %v4562_v33, %v5788_v35  ;;  %v2287_v36 = vpop.f32.mrb[137].mxu0  ;;  %v1984_v37 = vpack.c.bf16 %v1916_v30, %v1915_v22 }
 0x2ad   :  { %v2288_v38 = vadd.f32 %v5788_v35, %v2287_v36  ;;  %v4563_v39 = vpop.f32.mrb[138].mxu0  ;;  %v1983_v40 = vpack.c.bf16 %v1914_v34, %v1913_v27  ;;  %v4538_v41 = vpop.f32.mrb[120].mxu1 }
 0x2ae   :  { %v2299_v42 = vadd.f32 %v4563_v39, %v5788_v35  ;;  %v2290_v43 = vpop.f32.mrb[139].mxu0  ;;  %v1775_v44 = vadd.f32 %v5780_v31, %v4538_v41  ;;  %v1766_v45 = vpop.f32.mrb[121].mxu1  ;;  %v2776_v51 = vmax.f32 %v2296_v24, 0.0 }
 0x2af   :  { %v2291_v47 = vadd.f32 %v5788_v35, %v2290_v43  ;;  %4668 = vmatprep.mubr.msk.bf16.mxu0 %vm2028_vm1, %v1983_v40  ;;  %v1767_v49 = vadd.f32 %v5780_v31, %v1766_v45  ;;  %v4539_v50 = vpop.f32.mrb[122].mxu1  ;;  %v2774_v55 = vmax.f32 %v2288_v38, 0.0 }
 0x2b0   :  { %v2777_v52 = vmax.f32 %v2299_v42, 0.0  ;;  %4669 = vmatmul.mubr.msk.bf16.gmra.mrb[244].mxu0 %vm2028_vm1, %v1984_v37  ;;  %v1919_v48 = vmax.f32 %v1775_v44, 0.0  ;;  %v1778_v53 = vadd.f32 %v5780_v31, %v4539_v50  ;;  %v1769_v54 = vpop.f32.mrb[123].mxu1 }
 0x2b1   :  { %v2775_v56 = vmax.f32 %v2291_v47, 0.0  ;;  %v1917_v57 = vmax.f32 %v1767_v49, 0.0  ;;  %v1770_v58 = vadd.f32 %v5780_v31, %v1769_v54 }
 0x2b2   :  { %v5828_v60 = vpack.c.bf16 %v2777_v52, %v2776_v51  ;;  %v1920_v61 = vmax.f32 %v1778_v53, 0.0 }
 0x2b3   :  { %v5830_v62 = vpack.c.bf16 %v2775_v56, %v2774_v55  ;;  %v4566_v63 = vpop.f32.mrb[140].mxu0  ;;  %v1918_v1 = vmax.f32 %v1770_v58, 0.0 }
 0x2b4   :  { %v2312_v2 = vadd.f32 %v4566_v63, %v5788_v35  ;;  %v2303_v4 = vpop.f32.mrb[141].mxu0  ;;  %v1986_v5 = vpack.c.bf16 %v1920_v61, %v1919_v48 }
 0x2b5   :  { %v2304_v6 = vadd.f32 %v5788_v35, %v2303_v4  ;;  %v4567_v7 = vpop.f32.mrb[142].mxu0  ;;  %v1985_v8 = vpack.c.bf16 %v1918_v1, %v1917_v57  ;;  %v4542_v9 = vpop.f32.mrb[124].mxu1 }
 0x2b6   :  { %v2315_v10 = vadd.f32 %v4567_v7, %v5788_v35  ;;  %v2306_v11 = vpop.f32.mrb[143].mxu0  ;;  %v1791_v12 = vadd.f32 %v5780_v31, %v4542_v9  ;;  %v1782_v13 = vpop.f32.mrb[125].mxu1  ;;  %v2780_v17 = vmax.f32 %v2312_v2, 0.0 }
 0x2b7   :  { %v2307_v14 = vadd.f32 %v5788_v35, %v2306_v11  ;;  %4672 = vmatprep.mubr.msk.bf16.mxu0 %vm2028_vm1, %v1985_v8  ;;  %v1783_v15 = vadd.f32 %v5780_v31, %v1782_v13  ;;  %v4543_v16 = vpop.f32.mrb[126].mxu1  ;;  %v2778_v22 = vmax.f32 %v2304_v6, 0.0 }
 0x2b8   :  { %v2781_v18 = vmax.f32 %v2315_v10, 0.0  ;;  %4673 = vmatmul.mubr.msk.bf16.gmra.mrb[248].mxu0 %vm2028_vm1, %v1986_v5  ;;  %v1923_v19 = vmax.f32 %v1791_v12, 0.0  ;;  %v1794_v20 = vadd.f32 %v5780_v31, %v4543_v16  ;;  %v1785_v21 = vpop.f32.mrb[127].mxu1 }
 0x2b9   :  { %v2779_v23 = vmax.f32 %v2307_v14, 0.0  ;;  %v1921_v25 = vmax.f32 %v1783_v15, 0.0  ;;  %v1786_v46 = vadd.f32 %v5780_v31, %v1785_v21 }
 0x2ba   :  { %v5842_v26 = vpack.c.bf16 %v2781_v18, %v2780_v17  ;;  %v1924_v27 = vmax.f32 %v1794_v20, 0.0 }
 0x2bb   :  { %v5844_v28 = vpack.c.bf16 %v2779_v23, %v2778_v22  ;;  %v4570_v30 = vpop.f32.mrb[144].mxu0  ;;  %v1922_v33 = vmax.f32 %v1786_v46, 0.0  ;;  %v4918_v46 = vmov 0  }
 0x2bc   :  { %v2328_v34 = vadd.f32 %v4570_v30, %v5788_v35  ;;  %v2319_v24 = vpop.f32.mrb[145].mxu0  ;;  %v1988_v36 = vpack.c.bf16 %v1924_v27, %v1923_v19  ;;  %4875 = vset.pattern.permute.xlu0 %v4918_v46  ;;  %v2895_v27 = vld [vmem:[#allocation2] sm:$0x1] }
 0x2bd   :  { %v2320_v37 = vadd.f32 %v5788_v35, %v2319_v24  ;;  %v4571_v38 = vpop.f32.mrb[146].mxu0  ;;  %v1987_v39 = vpack.c.bf16 %v1922_v33, %v1921_v25  ;;  %2898 = vperm.xlu0 %4875, %v2895_v27  }
 0x2be   :  { %v2331_v40 = vadd.f32 %v4571_v38, %v5788_v35  ;;  %v2322_v41 = vpop.f32.mrb[147].mxu0  ;;  %v2784_v42 = vmax.f32 %v2328_v34, 0.0 }
 0x2bf   :  { %v2323_v31 = vadd.f32 %v5788_v35, %v2322_v41  ;;  %4676 = vmatprep.mubr.msk.bf16.mxu0 %vm2028_vm1, %v1987_v39  ;;  %v2782_v44 = vmax.f32 %v2320_v37, 0.0 }
 0x2c0   :  { %v2785_v43 = vmax.f32 %v2331_v40, 0.0  ;;  %4677 = vmatmul.mubr.msk.bf16.gmra.mrb[252].mxu0 %vm2028_vm1, %v1988_v36 }
 0x2c1   :  { %v2783_v45 = vmax.f32 %v2323_v31, 0.0 }
 0x2c2   :  { %v4686_v47 = vpack.c.bf16 %v2785_v43, %v2784_v42 }
 0x2c3   :  { %v4680_v50 = vpack.c.bf16 %v2783_v45, %v2782_v44  ;;  %v4574_v51 = vpop.f32.mrb[148].mxu0 }
 0x2c4   :  { %v2344_v52 = vadd.f32 %v4574_v51, %v5788_v35  ;;  %v2335_v48 = vpop.f32.mrb[149].mxu0 }
 0x2c5   :  { %4682 = vmatprep.subr.msk.bf16.mxu1 %vm5854_vm2, %v4680_v50  ;;  %v2336_v53 = vadd.f32 %v5788_v35, %v2335_v48  ;;  %v4575_v54 = vpop.f32.mrb[150].mxu0 }
 0x2c6   :  { %4685 = vmatpush3.bf16.xpose.msk.msra.mxu1 %vm5854_vm2, %v5802_v3  ;;  %v2347_v55 = vadd.f32 %v4575_v54, %v5788_v35  ;;  %v2338_v56 = vpop.f32.mrb[151].mxu0  ;;  %v2788_v58 = vmax.f32 %v2344_v52, 0.0 }
 0x2c7   :  { %4688 = vmatprep.subr.msk.bf16.mxu1 %vm5854_vm2, %v4686_v47  ;;  %v2339_v57 = vadd.f32 %v5788_v35, %v2338_v56  ;;  %v2786_v63 = vmax.f32 %v2336_v53, 0.0 }
 0x2c8   :  { %v2789_v61 = vmax.f32 %v2347_v55, 0.0 }
 0x2c9   :  { %v2787_v1 = vmax.f32 %v2339_v57, 0.0 }
 0x2ca   :  { %v4698_v2 = vpack.c.bf16 %v2789_v61, %v2788_v58 }
 0x2cb   :  { %v4692_v4 = vpack.c.bf16 %v2787_v1, %v2786_v63  ;;  %v4578_v5 = vpop.f32.mrb[152].mxu0 }
 0x2cc   :  { %v2360_v6 = vadd.f32 %v4578_v5, %v5788_v35  ;;  %v2351_v7 = vpop.f32.mrb[153].mxu0 }
 0x2cd   :  { %v2352_v3 = vadd.f32 %v5788_v35, %v2351_v7  ;;  %v4579_v8 = vpop.f32.mrb[154].mxu0 }
 0x2ce   :  { %4691 = vmatpush3.bf16.xpose.msk.msra.mxu1 %vm5854_vm2, %v5800_v0  ;;  %v2363_v9 = vadd.f32 %v4579_v8, %v5788_v35  ;;  %v2354_v10 = vpop.f32.mrb[155].mxu0  ;;  %v2792_v12 = vmax.f32 %v2360_v6, 0.0 }
 0x2cf   :  { %4694 = vmatprep.subr.msk.bf16.mxu1 %vm5854_vm2, %v4692_v4  ;;  %v2355_v11 = vadd.f32 %v5788_v35, %v2354_v10  ;;  %v2790_v14 = vmax.f32 %v2352_v3, 0.0 }
 0x2d0   :  { %v2793_v13 = vmax.f32 %v2363_v9, 0.0 }
 0x2d1   :  { %v2791_v15 = vmax.f32 %v2355_v11, 0.0 }
 0x2d2   :  { %v4710_v16 = vpack.c.bf16 %v2793_v13, %v2792_v12 }
 0x2d3   :  { %v4704_v17 = vpack.c.bf16 %v2791_v15, %v2790_v14  ;;  %v4582_v18 = vpop.f32.mrb[156].mxu0 }
 0x2d4   :  { %v2376_v19 = vadd.f32 %v4582_v18, %v5788_v35  ;;  %v2367_v20 = vpop.f32.mrb[157].mxu0 }
 0x2d5   :  { %v2368_v0 = vadd.f32 %v5788_v35, %v2367_v20  ;;  %v4583_v21 = vpop.f32.mrb[158].mxu0 }
 0x2d6   :  { %4697 = vmatpush3.bf16.xpose.msk.msra.mxu1 %vm5854_vm2, %v5816_v32  ;;  %v2379_v22 = vadd.f32 %v4583_v21, %v5788_v35  ;;  %v2370_v23 = vpop.f32.mrb[159].mxu0  ;;  %v2796_v30 = vmax.f32 %v2376_v19, 0.0 }
 0x2d7   :  { %4700 = vmatprep.subr.msk.bf16.mxu1 %vm5854_vm2, %v4698_v2  ;;  %v2371_v25 = vadd.f32 %v5788_v35, %v2370_v23  ;;  %v2794_v34 = vmax.f32 %v2368_v0, 0.0 }
 0x2d8   :  { %v2797_v33 = vmax.f32 %v2379_v22, 0.0 }
 0x2d9   :  { %v2795_v24 = vmax.f32 %v2371_v25, 0.0 }
 0x2da   :  { %v4722_v36 = vpack.c.bf16 %v2797_v33, %v2796_v30 }
 0x2db   :  { %v4716_v37 = vpack.c.bf16 %v2795_v24, %v2794_v34  ;;  %v4586_v38 = vpop.f32.mrb[160].mxu0 }
 0x2dc   :  { %v2392_v32 = vadd.f32 %v4586_v38, %v5788_v35  ;;  %v2383_v39 = vpop.f32.mrb[161].mxu0 }
 0x2dd   :  { %v2384_v40 = vadd.f32 %v5788_v35, %v2383_v39  ;;  %v4587_v41 = vpop.f32.mrb[162].mxu0 }
 0x2de   :  { %4703 = vmatpush3.bf16.xpose.msk.msra.mxu1 %vm5854_vm2, %v5814_v29  ;;  %v2395_v31 = vadd.f32 %v4587_v41, %v5788_v35  ;;  %v2386_v42 = vpop.f32.mrb[163].mxu0  ;;  %v2800_v44 = vmax.f32 %v2392_v32, 0.0 }
 0x2df   :  { %4706 = vmatprep.subr.msk.bf16.mxu1 %vm5854_vm2, %v4704_v17  ;;  %v2387_v43 = vadd.f32 %v5788_v35, %v2386_v42  ;;  %v2798_v47 = vmax.f32 %v2384_v40, 0.0 }
 0x2e0   :  { %v2801_v45 = vmax.f32 %v2395_v31, 0.0 }
 0x2e1   :  { %v2799_v50 = vmax.f32 %v2387_v43, 0.0 }
 0x2e2   :  { %v5896_v51 = vpack.c.bf16 %v2801_v45, %v2800_v44 }
 0x2e3   :  { %v5898_v52 = vpack.c.bf16 %v2799_v50, %v2798_v47  ;;  %v4590_v48 = vpop.f32.mrb[164].mxu0 }
 0x2e4   :  { %v2408_v53 = vadd.f32 %v4590_v48, %v5788_v35  ;;  %v2399_v29 = vpop.f32.mrb[165].mxu0 }
 0x2e5   :  { %v2400_v54 = vadd.f32 %v5788_v35, %v2399_v29  ;;  %v4591_v55 = vpop.f32.mrb[166].mxu0 }
 0x2e6   :  { %4709 = vmatpush3.bf16.xpose.msk.msra.mxu1 %vm5854_vm2, %v5830_v62  ;;  %v2411_v56 = vadd.f32 %v4591_v55, %v5788_v35  ;;  %v2402_v57 = vpop.f32.mrb[167].mxu0  ;;  %v2804_v61 = vmax.f32 %v2408_v53, 0.0 }
 0x2e7   :  { %4712 = vmatprep.subr.msk.bf16.mxu1 %vm5854_vm2, %v4710_v16  ;;  %v2403_v58 = vadd.f32 %v5788_v35, %v2402_v57  ;;  %v2802_v1 = vmax.f32 %v2400_v54, 0.0 }
 0x2e8   :  { %v2805_v63 = vmax.f32 %v2411_v56, 0.0 }
 0x2e9   :  { %v2803_v2 = vmax.f32 %v2403_v58, 0.0 }
 0x2ea   :  { %v5909_v4 = vpack.c.bf16 %v2805_v63, %v2804_v61 }
 0x2eb   :  { %v5911_v5 = vpack.c.bf16 %v2803_v2, %v2802_v1  ;;  %v4594_v6 = vpop.f32.mrb[168].mxu0 }
 0x2ec   :  { %v2424_v7 = vadd.f32 %v4594_v6, %v5788_v35  ;;  %v2415_v62 = vpop.f32.mrb[169].mxu0 }
 0x2ed   :  { %v2416_v3 = vadd.f32 %v5788_v35, %v2415_v62  ;;  %v4595_v8 = vpop.f32.mrb[170].mxu0 }
 0x2ee   :  { %4715 = vmatpush3.bf16.xpose.msk.msra.mxu1 %vm5854_vm2, %v5828_v60  ;;  %v2427_v9 = vadd.f32 %v4595_v8, %v5788_v35  ;;  %v2418_v10 = vpop.f32.mrb[171].mxu0  ;;  %v2808_v12 = vmax.f32 %v2424_v7, 0.0 }
 0x2ef   :  { %4718 = vmatprep.subr.msk.bf16.mxu1 %vm5854_vm2, %v4716_v37  ;;  %v2419_v11 = vadd.f32 %v5788_v35, %v2418_v10  ;;  %v2806_v14 = vmax.f32 %v2416_v3, 0.0 }
 0x2f0   :  { %v2809_v13 = vmax.f32 %v2427_v9, 0.0 }
 0x2f1   :  { %v2807_v15 = vmax.f32 %v2419_v11, 0.0 }
 0x2f2   :  { %v5922_v16 = vpack.c.bf16 %v2809_v13, %v2808_v12 }
 0x2f3   :  { %v5924_v17 = vpack.c.bf16 %v2807_v15, %v2806_v14  ;;  %v4598_v18 = vpop.f32.mrb[172].mxu0 }
 0x2f4   :  { %v2440_v19 = vadd.f32 %v4598_v18, %v5788_v35  ;;  %v2431_v60 = vpop.f32.mrb[173].mxu0 }
 0x2f5   :  { %v2432_v20 = vadd.f32 %v5788_v35, %v2431_v60  ;;  %v4599_v0 = vpop.f32.mrb[174].mxu0 }
 0x2f6   :  { %4721 = vmatpush3.bf16.xpose.msk.msra.mxu1 %vm5854_vm2, %v5844_v28  ;;  %v2443_v21 = vadd.f32 %v4599_v0, %v5788_v35  ;;  %v2434_v22 = vpop.f32.mrb[175].mxu0  ;;  %v2812_v25 = vmax.f32 %v2440_v19, 0.0 }
 0x2f7   :  { %v2435_v23 = vadd.f32 %v5788_v35, %v2434_v22  ;;  %4724 = vmatprep.subr.msk.bf16.mxu1 %vm5854_vm2, %v4722_v36  ;;  %v2810_v27 = vmax.f32 %v2432_v20, 0.0 }
 0x2f8   :  { %v2813_v46 = vmax.f32 %v2443_v21, 0.0 }
 0x2f9   :  { %v2811_v30 = vmax.f32 %v2435_v23, 0.0 }
 0x2fa   :  { %v5935_v33 = vpack.c.bf16 %v2813_v46, %v2812_v25 }
 0x2fb   :  { %v5937_v34 = vpack.c.bf16 %v2811_v30, %v2810_v27  ;;  %v4602_v24 = vpop.f32.mrb[176].mxu0 }
 0x2fc   :  { %v2456_v37 = vadd.f32 %v4602_v24, %v5788_v35  ;;  %v2447_v28 = vpop.f32.mrb[177].mxu0 }
 0x2fd   :  { %v2448_v38 = vadd.f32 %v5788_v35, %v2447_v28  ;;  %v4603_v32 = vpop.f32.mrb[178].mxu0 }
 0x2fe   :  { %v2459_v39 = vadd.f32 %v4603_v32, %v5788_v35  ;;  %v2450_v40 = vpop.f32.mrb[179].mxu0  ;;  %4727 = vmatpush3.bf16.xpose.msk.msra.mxu1 %vm5854_vm2, %v5842_v26  ;;  %v2816_v41 = vmax.f32 %v2456_v37, 0.0 }
 0x2ff   :  { %v2451_v36 = vadd.f32 %v5788_v35, %v2450_v40  ;;  %v2814_v42 = vmax.f32 %v2448_v38, 0.0 }
 0x300   :  { %v2817_v31 = vmax.f32 %v2459_v39, 0.0 }
 0x301   :  { %v2815_v43 = vmax.f32 %v2451_v36, 0.0 }
 0x302   :  { %v4734_v44 = vpack.c.bf16 %v2817_v31, %v2816_v41 }
 0x303   :  { %v4728_v45 = vpack.c.bf16 %v2815_v43, %v2814_v42  ;;  %v4606_v47 = vpop.f32.mrb[180].mxu0 }
 0x304   :  { %v2472_v50 = vadd.f32 %v4606_v47, %v5788_v35  ;;  %v2463_v48 = vpop.f32.mrb[181].mxu0 }
 0x305   :  { %4730 = vmatprep.subr.msk.bf16.mxu1 %vm5854_vm2, %v4728_v45  ;;  %4165 = vmatmul.mubr.msk.f32.vlgmr.msra.gmra.mrb[128].mxu1 %vm251_vm0, %v5758_v59  ;;  %v2464_v26 = vadd.f32 %v5788_v35, %v2463_v48  ;;  %v4607_v53 = vpop.f32.mrb[182].mxu0 }
 0x306   :  { %4733 = vmatpush3.bf16.xpose.msk.msra.mxu1 %vm5854_vm2, %v5898_v52  ;;  %v2475_v29 = vadd.f32 %v4607_v53, %v5788_v35  ;;  %v2466_v54 = vpop.f32.mrb[183].mxu0  ;;  %4198 = vmatprep.mubr.msk.f32.mxu1 %vm251_vm0, %v5758_v59  ;;  %v2820_v56 = vmax.f32 %v2472_v50, 0.0 }
 0x307   :  { %4736 = vmatprep.subr.msk.bf16.mxu1 %vm5854_vm2, %v4734_v44  ;;  %v2467_v55 = vadd.f32 %v5788_v35, %v2466_v54  ;;  %v2818_v58 = vmax.f32 %v2464_v26, 0.0 }
 0x308   :  { %v2821_v57 = vmax.f32 %v2475_v29, 0.0 }
 0x309   :  { %v2819_v61 = vmax.f32 %v2467_v55, 0.0 }
 0x30a   :  { %v4746_v63 = vpack.c.bf16 %v2821_v57, %v2820_v56 }
 0x30b   :  { %v4740_v1 = vpack.c.bf16 %v2819_v61, %v2818_v58  ;;  %v4610_v2 = vpop.f32.mrb[184].mxu0 }
 0x30c   :  { %v2488_v52 = vadd.f32 %v4610_v2, %v5788_v35  ;;  %v2479_v6 = vpop.f32.mrb[185].mxu0 }
 0x30d   :  { %v2480_v7 = vadd.f32 %v5788_v35, %v2479_v6  ;;  %v4611_v62 = vpop.f32.mrb[186].mxu0 }
 0x30e   :  { %4739 = vmatpush3.bf16.xpose.msk.msra.mxu1 %vm5854_vm2, %v5896_v51  ;;  %v2491_v3 = vadd.f32 %v4611_v62, %v5788_v35  ;;  %v2482_v8 = vpop.f32.mrb[187].mxu0  ;;  %v2824_v10 = vmax.f32 %v2488_v52, 0.0 }
 0x30f   :  { %4742 = vmatprep.subr.msk.bf16.mxu1 %vm5854_vm2, %v4740_v1  ;;  %v2483_v9 = vadd.f32 %v5788_v35, %v2482_v8  ;;  %v2822_v12 = vmax.f32 %v2480_v7, 0.0 }
 0x310   :  { %v2825_v11 = vmax.f32 %v2491_v3, 0.0 }
 0x311   :  { %v2823_v13 = vmax.f32 %v2483_v9, 0.0 }
 0x312   :  { %v4758_v14 = vpack.c.bf16 %v2825_v11, %v2824_v10 }
 0x313   :  { %v4752_v15 = vpack.c.bf16 %v2823_v13, %v2822_v12  ;;  %v4614_v18 = vpop.f32.mrb[188].mxu0 }
 0x314   :  { %v2504_v19 = vadd.f32 %v4614_v18, %v5788_v35  ;;  %v2495_v60 = vpop.f32.mrb[189].mxu0 }
 0x315   :  { %v2496_v51 = vadd.f32 %v5788_v35, %v2495_v60  ;;  %v4615_v20 = vpop.f32.mrb[190].mxu0 }
 0x316   :  { %4745 = vmatpush3.bf16.xpose.msk.msra.mxu1 %vm5854_vm2, %v5911_v5  ;;  %v2507_v0 = vadd.f32 %v4615_v20, %v5788_v35  ;;  %v2498_v21 = vpop.f32.mrb[191].mxu0  ;;  %v2828_v23 = vmax.f32 %v2504_v19, 0.0 }
 0x317   :  { %4748 = vmatprep.subr.msk.bf16.mxu1 %vm5854_vm2, %v4746_v63  ;;  %v2499_v22 = vadd.f32 %v5788_v35, %v2498_v21  ;;  %v2826_v46 = vmax.f32 %v2496_v51, 0.0 }
 0x318   :  { %v2829_v25 = vmax.f32 %v2507_v0, 0.0 }
 0x319   :  { %v2827_v27 = vmax.f32 %v2499_v22, 0.0 }
 0x31a   :  { %v4770_v30 = vpack.c.bf16 %v2829_v25, %v2828_v23 }
 0x31b   :  { %v4764_v24 = vpack.c.bf16 %v2827_v27, %v2826_v46  ;;  %v4618_v37 = vpop.f32.mrb[192].mxu0 }
 0x31c   :  { %v2520_v28 = vadd.f32 %v4618_v37, %v5788_v35  ;;  %v2511_v38 = vpop.f32.mrb[193].mxu0 }
 0x31d   :  { %v2512_v5 = vadd.f32 %v5788_v35, %v2511_v38  ;;  %v4619_v32 = vpop.f32.mrb[194].mxu0 }
 0x31e   :  { %4751 = vmatpush3.bf16.xpose.msk.msra.mxu1 %vm5854_vm2, %v5909_v4  ;;  %v2523_v39 = vadd.f32 %v4619_v32, %v5788_v35  ;;  %v2514_v40 = vpop.f32.mrb[195].mxu0  ;;  %v2832_v41 = vmax.f32 %v2520_v28, 0.0 }
 0x31f   :  { %4754 = vmatprep.subr.msk.bf16.mxu1 %vm5854_vm2, %v4752_v15  ;;  %v2515_v36 = vadd.f32 %v5788_v35, %v2514_v40  ;;  %v2830_v42 = vmax.f32 %v2512_v5, 0.0 }
 0x320   :  { %v2833_v31 = vmax.f32 %v2523_v39, 0.0 }
 0x321   :  { %v2831_v43 = vmax.f32 %v2515_v36, 0.0 }
 0x322   :  { %v5988_v44 = vpack.c.bf16 %v2833_v31, %v2832_v41 }
 0x323   :  { %v5990_v45 = vpack.c.bf16 %v2831_v43, %v2830_v42  ;;  %v4622_v47 = vpop.f32.mrb[196].mxu0 }
 0x324   :  { %v2536_v50 = vadd.f32 %v4622_v47, %v5788_v35  ;;  %v2527_v4 = vpop.f32.mrb[197].mxu0 }
 0x325   :  { %v2528_v48 = vadd.f32 %v5788_v35, %v2527_v4  ;;  %v4623_v26 = vpop.f32.mrb[198].mxu0 }
 0x326   :  { %4757 = vmatpush3.bf16.xpose.msk.msra.mxu1 %vm5854_vm2, %v5924_v17  ;;  %v2539_v53 = vadd.f32 %v4623_v26, %v5788_v35  ;;  %v2530_v29 = vpop.f32.mrb[199].mxu0  ;;  %v2836_v55 = vmax.f32 %v2536_v50, 0.0 }
 0x327   :  { %4760 = vmatprep.subr.msk.bf16.mxu1 %vm5854_vm2, %v4758_v14  ;;  %v2531_v54 = vadd.f32 %v5788_v35, %v2530_v29  ;;  %v2834_v57 = vmax.f32 %v2528_v48, 0.0 }
 0x328   :  { %v2837_v56 = vmax.f32 %v2539_v53, 0.0 }
 0x329   :  { %v2835_v58 = vmax.f32 %v2531_v54, 0.0 }
 0x32a   :  { %v6001_v61 = vpack.c.bf16 %v2837_v56, %v2836_v55 }
 0x32b   :  { %v6003_v63 = vpack.c.bf16 %v2835_v58, %v2834_v57  ;;  %v4626_v1 = vpop.f32.mrb[200].mxu0 }
 0x32c   :  { %v2552_v2 = vadd.f32 %v4626_v1, %v5788_v35  ;;  %v2543_v17 = vpop.f32.mrb[201].mxu0 }
 0x32d   :  { %v2544_v52 = vadd.f32 %v5788_v35, %v2543_v17  ;;  %v4627_v6 = vpop.f32.mrb[202].mxu0 }
 0x32e   :  { %4763 = vmatpush3.bf16.xpose.msk.msra.mxu1 %vm5854_vm2, %v5922_v16  ;;  %v2555_v7 = vadd.f32 %v4627_v6, %v5788_v35  ;;  %v2546_v62 = vpop.f32.mrb[203].mxu0  ;;  %v2840_v8 = vmax.f32 %v2552_v2, 0.0 }
 0x32f   :  { %4766 = vmatprep.subr.msk.bf16.mxu1 %vm5854_vm2, %v4764_v24  ;;  %v2547_v3 = vadd.f32 %v5788_v35, %v2546_v62  ;;  %v2838_v10 = vmax.f32 %v2544_v52, 0.0 }
 0x330   :  { %v2841_v9 = vmax.f32 %v2555_v7, 0.0 }
 0x331   :  { %v2839_v11 = vmax.f32 %v2547_v3, 0.0 }
 0x332   :  { %v6014_v12 = vpack.c.bf16 %v2841_v9, %v2840_v8 }
 0x333   :  { %v6016_v13 = vpack.c.bf16 %v2839_v11, %v2838_v10  ;;  %v4630_v14 = vpop.f32.mrb[204].mxu0 }
 0x334   :  { %v2568_v15 = vadd.f32 %v4630_v14, %v5788_v35  ;;  %v2559_v16 = vpop.f32.mrb[205].mxu0 }
 0x335   :  { %v2560_v18 = vadd.f32 %v5788_v35, %v2559_v16  ;;  %v4631_v19 = vpop.f32.mrb[206].mxu0 }
 0x336   :  { %4769 = vmatpush3.bf16.xpose.msk.msra.mxu1 %vm5854_vm2, %v5937_v34  ;;  %v2571_v60 = vadd.f32 %v4631_v19, %v5788_v35  ;;  %v2562_v51 = vpop.f32.mrb[207].mxu0  ;;  %v2844_v0 = vmax.f32 %v2568_v15, 0.0 }
 0x337   :  { %v2563_v20 = vadd.f32 %v5788_v35, %v2562_v51  ;;  %4772 = vmatprep.subr.msk.bf16.mxu1 %vm5854_vm2, %v4770_v30  ;;  %v2842_v22 = vmax.f32 %v2560_v18, 0.0 }
 0x338   :  { %v2845_v21 = vmax.f32 %v2571_v60, 0.0 }
 0x339   :  { %v2843_v23 = vmax.f32 %v2563_v20, 0.0 }
 0x33a   :  { %v6027_v25 = vpack.c.bf16 %v2845_v21, %v2844_v0 }
 0x33b   :  { %v6029_v46 = vpack.c.bf16 %v2843_v23, %v2842_v22  ;;  %v4634_v27 = vpop.f32.mrb[208].mxu0 }
 0x33c   :  { %v2584_v24 = vadd.f32 %v4634_v27, %v5788_v35  ;;  %v2575_v34 = vpop.f32.mrb[209].mxu0 }
 0x33d   :  { %v2576_v37 = vadd.f32 %v5788_v35, %v2575_v34  ;;  %v4635_v28 = vpop.f32.mrb[210].mxu0 }
 0x33e   :  { %v2587_v38 = vadd.f32 %v4635_v28, %v5788_v35  ;;  %v2578_v5 = vpop.f32.mrb[211].mxu0  ;;  %4775 = vmatpush3.bf16.xpose.msk.msra.mxu1 %vm5854_vm2, %v5935_v33  ;;  %v2848_v32 = vmax.f32 %v2584_v24, 0.0 }
 0x33f   :  { %v2579_v30 = vadd.f32 %v5788_v35, %v2578_v5  ;;  %v2846_v40 = vmax.f32 %v2576_v37, 0.0 }
 0x340   :  { %v2849_v39 = vmax.f32 %v2587_v38, 0.0 }
 0x341   :  { %v2847_v36 = vmax.f32 %v2579_v30, 0.0 }
 0x342   :  { %v4782_v41 = vpack.c.bf16 %v2849_v39, %v2848_v32 }
 0x343   :  { %v4776_v31 = vpack.c.bf16 %v2847_v36, %v2846_v40  ;;  %v4638_v42 = vpop.f32.mrb[212].mxu0 }
 0x344   :  { %v2600_v43 = vadd.f32 %v4638_v42, %v5788_v35  ;;  %v2591_v47 = vpop.f32.mrb[213].mxu0 }
 0x345   :  { %4778 = vmatprep.subr.msk.bf16.mxu1 %vm5854_vm2, %v4776_v31  ;;  %4199 = vmatmul.mubr.msk.f32.vlgmr.msra.gmra.mrb[130].mxu1 %vm251_vm0, %v5758_v59  ;;  %v2592_v33 = vadd.f32 %v5788_v35, %v2591_v47  ;;  %v4639_v50 = vpop.f32.mrb[214].mxu0 }
 0x346   :  { %4781 = vmatpush3.bf16.xpose.msk.msra.mxu1 %vm5854_vm2, %v5990_v45  ;;  %v2603_v4 = vadd.f32 %v4639_v50, %v5788_v35  ;;  %v2594_v48 = vpop.f32.mrb[215].mxu0  ;;  %4232 = vmatprep.mubr.msk.f32.mxu1 %vm251_vm0, %v5758_v59  ;;  %v2852_v53 = vmax.f32 %v2600_v43, 0.0 }
 0x347   :  { %4784 = vmatprep.subr.msk.bf16.mxu1 %vm5854_vm2, %v4782_v41  ;;  %v2595_v26 = vadd.f32 %v5788_v35, %v2594_v48  ;;  %v2850_v54 = vmax.f32 %v2592_v33, 0.0 }
 0x348   :  { %v2853_v29 = vmax.f32 %v2603_v4, 0.0 }
 0x349   :  { %v2851_v55 = vmax.f32 %v2595_v26, 0.0 }
 0x34a   :  { %v4794_v56 = vpack.c.bf16 %v2853_v29, %v2852_v53 }
 0x34b   :  { %v4788_v57 = vpack.c.bf16 %v2851_v55, %v2850_v54  ;;  %v4642_v58 = vpop.f32.mrb[216].mxu0 }
 0x34c   :  { %v2616_v45 = vadd.f32 %v4642_v58, %v5788_v35  ;;  %v2607_v1 = vpop.f32.mrb[217].mxu0 }
 0x34d   :  { %v2608_v2 = vadd.f32 %v5788_v35, %v2607_v1  ;;  %v4643_v17 = vpop.f32.mrb[218].mxu0 }
 0x34e   :  { %4787 = vmatpush3.bf16.xpose.msk.msra.mxu1 %vm5854_vm2, %v5988_v44  ;;  %v2619_v59 = vadd.f32 %v4643_v17, %v5788_v35  ;;  %v2610_v52 = vpop.f32.mrb[219].mxu0  ;;  %v2856_v7 = vmax.f32 %v2616_v45, 0.0 }
 0x34f   :  { %4790 = vmatprep.subr.msk.bf16.mxu1 %vm5854_vm2, %v4788_v57  ;;  %v2611_v6 = vadd.f32 %v5788_v35, %v2610_v52  ;;  %v2854_v3 = vmax.f32 %v2608_v2, 0.0 }
 0x350   :  { %v2857_v62 = vmax.f32 %v2619_v59, 0.0 }
 0x351   :  { %v2855_v8 = vmax.f32 %v2611_v6, 0.0 }
 0x352   :  { %v4806_v9 = vpack.c.bf16 %v2857_v62, %v2856_v7 }
 0x353   :  { %v4800_v10 = vpack.c.bf16 %v2855_v8, %v2854_v3  ;;  %v4646_v11 = vpop.f32.mrb[220].mxu0 }
 0x354   :  { %v2632_v14 = vadd.f32 %v4646_v11, %v5788_v35  ;;  %v2623_v15 = vpop.f32.mrb[221].mxu0 }
 0x355   :  { %v2624_v44 = vadd.f32 %v5788_v35, %v2623_v15  ;;  %v4647_v16 = vpop.f32.mrb[222].mxu0 }
 0x356   :  { %4793 = vmatpush3.bf16.xpose.msk.msra.mxu1 %vm5854_vm2, %v6003_v63  ;;  %v2635_v18 = vadd.f32 %v4647_v16, %v5788_v35  ;;  %v2626_v19 = vpop.f32.mrb[223].mxu0  ;;  %v2860_v51 = vmax.f32 %v2632_v14, 0.0 }
 0x357   :  { %4796 = vmatprep.subr.msk.bf16.mxu1 %vm5854_vm2, %v4794_v56  ;;  %v2627_v60 = vadd.f32 %v5788_v35, %v2626_v19  ;;  %v2858_v0 = vmax.f32 %v2624_v44, 0.0  ;;  %v6119_v44 = vld [vmem:[%s6211_s6] ss:$0 sm:$0xff] }
 0x358   :  { %v2861_v20 = vmax.f32 %v2635_v18, 0.0 }
 0x359   :  { %v2859_v21 = vmax.f32 %v2627_v60, 0.0 }
 0x35a   :  { %v4818_v22 = vpack.c.bf16 %v2861_v20, %v2860_v51 }
 0x35b   :  { %v4812_v23 = vpack.c.bf16 %v2859_v21, %v2858_v0  ;;  %v4650_v27 = vpop.f32.mrb[224].mxu0 }
 0x35c   :  { %v2648_v24 = vadd.f32 %v4650_v27, %v5788_v35  ;;  %v2639_v34 = vpop.f32.mrb[225].mxu0 }
 0x35d   :  { %v2640_v63 = vadd.f32 %v5788_v35, %v2639_v34  ;;  %v4651_v37 = vpop.f32.mrb[226].mxu0 }
 0x35e   :  { %4799 = vmatpush3.bf16.xpose.msk.msra.mxu1 %vm5854_vm2, %v6001_v61  ;;  %v2651_v28 = vadd.f32 %v4651_v37, %v5788_v35  ;;  %v2642_v38 = vpop.f32.mrb[227].mxu0  ;;  %v2864_v30 = vmax.f32 %v2648_v24, 0.0 }
 0x35f   :  { %4802 = vmatprep.subr.msk.bf16.mxu1 %vm5854_vm2, %v4800_v10  ;;  %v2643_v5 = vadd.f32 %v5788_v35, %v2642_v38  ;;  %v2862_v39 = vmax.f32 %v2640_v63, 0.0 }
 0x360   :  { %v2865_v32 = vmax.f32 %v2651_v28, 0.0 }
 0x361   :  { %v2863_v40 = vmax.f32 %v2643_v5, 0.0 }
 0x362   :  { %v6080_v36 = vpack.c.bf16 %v2865_v32, %v2864_v30 }
 0x363   :  { %v6082_v41 = vpack.c.bf16 %v2863_v40, %v2862_v39  ;;  %v4654_v31 = vpop.f32.mrb[228].mxu0 }
 0x364   :  { %v2664_v42 = vadd.f32 %v4654_v31, %v5788_v35  ;;  %v2655_v61 = vpop.f32.mrb[229].mxu0  ;;  %v4893_v31 = vld [vmem:[%s6212_s7] sm:$0x1]  ;;  %s4920_s7 = smov [#allocation3]  }
 0x365   :  { %v2656_v43 = vadd.f32 %v5788_v35, %v2655_v61  ;;  %v4655_v47 = vpop.f32.mrb[230].mxu0  ;;  %s3641_s1 = sshll.u32 %s4920_s7, 4  ;;  %s3642_s1 = int_to_ptr.vmem [resolvable:$true] %s3641_s1 }
 0x366   :  { %4805 = vmatpush3.bf16.xpose.msk.msra.mxu1 %vm5854_vm2, %v6016_v13  ;;  %v2667_v33 = vadd.f32 %v4655_v47, %v5788_v35  ;;  %v2658_v50 = vpop.f32.mrb[231].mxu0  ;;  %v2868_v48 = vmax.f32 %v2664_v42, 0.0  ;;  %s4894_s3 = scalar_lea.vmem %s3642_s1, 128  ;;  %p4899_p1 = scmp.lt.s32.totalorder %s3642_s1, %s3642_s1 }
 0x367   :  { %4808 = vmatprep.subr.msk.bf16.mxu1 %vm5854_vm2, %v4806_v9  ;;  %v2659_v4 = vadd.f32 %v5788_v35, %v2658_v50  ;;  %v2866_v53 = vmax.f32 %v2656_v43, 0.0  ;;  %p4895_p0 = scmp.ne.s32.totalorder %s3642_s1, %s4894_s3  ;;  %p4900_p2 = scmp.lt.s32.totalorder %s4894_s3, %s4894_s3 }
 0x368   :  { %v2869_v26 = vmax.f32 %v2667_v33, 0.0 }
 0x369   :  { %v2867_v29 = vmax.f32 %v2659_v4, 0.0  ;;  %p4901_p3 = por %p4900_p2, %p4899_p1 }
 0x36a   :  { %v6093_v54 = vpack.c.bf16 %v2869_v26, %v2868_v48 }
 0x36b   :  { %v6095_v55 = vpack.c.bf16 %v2867_v29, %v2866_v53  ;;  %v4658_v56 = vpop.f32.mrb[232].mxu0  ;;  %p4902_p4 = pnand %p4901_p3, %p4895_p0 }
 0x36c   :  { %v2680_v57 = vadd.f32 %v4658_v56, %v5788_v35  ;;  %v2671_v13 = vpop.f32.mrb[233].mxu0 }
 0x36d   :  { %v2672_v58 = vadd.f32 %v5788_v35, %v2671_v13  ;;  %v4659_v45 = vpop.f32.mrb[234].mxu0 }
 0x36e   :  { %4811 = vmatpush3.bf16.xpose.msk.msra.mxu1 %vm5854_vm2, %v6014_v12  ;;  %v2683_v1 = vadd.f32 %v4659_v45, %v5788_v35  ;;  %v2674_v2 = vpop.f32.mrb[235].mxu0  ;;  %v2872_v59 = vmax.f32 %v2680_v57, 0.0 }
 0x36f   :  { %4814 = vmatprep.subr.msk.bf16.mxu1 %vm5854_vm2, %v4812_v23  ;;  %v2675_v17 = vadd.f32 %v5788_v35, %v2674_v2  ;;  %v2870_v6 = vmax.f32 %v2672_v58, 0.0 }
 0x370   :  { %v2873_v52 = vmax.f32 %v2683_v1, 0.0 }
 0x371   :  { %v2871_v7 = vmax.f32 %v2675_v17, 0.0 }
 0x372   :  { %v6106_v62 = vpack.c.bf16 %v2873_v52, %v2872_v59 }
 0x373   :  { %v6108_v3 = vpack.c.bf16 %v2871_v7, %v2870_v6  ;;  %v4662_v8 = vpop.f32.mrb[236].mxu0 }
 0x374   :  { %v2696_v9 = vadd.f32 %v4662_v8, %v5788_v35  ;;  %v2687_v12 = vpop.f32.mrb[237].mxu0 }
 0x375   :  { %v2688_v10 = vadd.f32 %v5788_v35, %v2687_v12  ;;  %v4663_v11 = vpop.f32.mrb[238].mxu0 }
 0x376   :  { %4817 = vmatpush3.bf16.xpose.msk.msra.mxu1 %vm5854_vm2, %v6029_v46  ;;  %v2699_v14 = vadd.f32 %v4663_v11, %v5788_v35  ;;  %v2690_v15 = vpop.f32.mrb[239].mxu0  ;;  %v2876_v18 = vmax.f32 %v2696_v9, 0.0 }
 0x377   :  { %v2691_v16 = vadd.f32 %v6119_v44, %v2690_v15  ;;  %4820 = vmatprep.subr.msk.bf16.mxu1 %vm5854_vm2, %v4818_v22  ;;  %v2874_v60 = vmax.f32 %v2688_v10, 0.0 }
 0x378   :  { %v2877_v19 = vmax.f32 %v2699_v14, 0.0 }
 0x379   :  { %v2875_v51 = vmax.f32 %v2691_v16, 0.0 }
 0x37a   :  { %v6124_v20 = vpack.c.bf16 %v2877_v19, %v2876_v18 }
 0x37b   :  { %v6126_v46 = vpack.c.bf16 %v2875_v51, %v2874_v60  ;;  %v4666_v35 = vpop.f32.mrb[240].mxu0 }
 0x37c   :  { %v2712_v0 = vadd.f32 %v6119_v44, %v4666_v35  ;;  %v2703_v21 = vpop.f32.mrb[241].mxu0 }
 0x37d   :  { %v2704_v23 = vadd.f32 %v6119_v44, %v2703_v21  ;;  %v4667_v27 = vpop.f32.mrb[242].mxu0 }
 0x37e   :  { %v2715_v24 = vadd.f32 %v6119_v44, %v4667_v27  ;;  %v2706_v34 = vpop.f32.mrb[243].mxu0  ;;  %4823 = vmatpush3.bf16.xpose.msk.msra.mxu1 %vm5854_vm2, %v6027_v25  ;;  %v2880_v63 = vmax.f32 %v2712_v0, 0.0 }
 0x37f   :  { %v2707_v22 = vadd.f32 %v6119_v44, %v2706_v34  ;;  %v2878_v28 = vmax.f32 %v2704_v23, 0.0 }
 0x380   :  { %v2881_v37 = vmax.f32 %v2715_v24, 0.0 }
 0x381   :  { %v2879_v38 = vmax.f32 %v2707_v22, 0.0 }
 0x382   :  { %v4830_v5 = vpack.c.bf16 %v2881_v37, %v2880_v63 }
 0x383   :  { %v4824_v30 = vpack.c.bf16 %v2879_v38, %v2878_v28  ;;  %v4670_v32 = vpop.f32.mrb[244].mxu0 }
 0x384   :  { %v2728_v39 = vadd.f32 %v6119_v44, %v4670_v32  ;;  %v2719_v40 = vpop.f32.mrb[245].mxu0 }
 0x385   :  { %4826 = vmatprep.subr.msk.bf16.mxu1 %vm5854_vm2, %v4824_v30  ;;  %4233 = vmatmul.mubr.msk.f32.vlgmr.msra.gmra.mrb[132].mxu1 %vm251_vm0, %v4893_v31  ;;  %v2720_v25 = vadd.f32 %v6119_v44, %v2719_v40  ;;  %v4671_v42 = vpop.f32.mrb[246].mxu0 }
 0x386   :  { %4829 = vmatpush3.bf16.xpose.msk.msra.mxu1 %vm5854_vm2, %v6082_v41  ;;  %v2731_v61 = vadd.f32 %v6119_v44, %v4671_v42  ;;  %v2722_v43 = vpop.f32.mrb[247].mxu0  ;;  %4266 = vmatprep.mubr.msk.f32.mxu1 %vm251_vm0, %v4893_v31  ;;  %v2884_v33 = vmax.f32 %v2728_v39, 0.0 }
 0x387   :  { %4832 = vmatprep.subr.msk.bf16.mxu1 %vm5854_vm2, %v4830_v5  ;;  %v2723_v47 = vadd.f32 %v6119_v44, %v2722_v43  ;;  %v2882_v4 = vmax.f32 %v2720_v25, 0.0 }
 0x388   :  { %v2885_v50 = vmax.f32 %v2731_v61, 0.0 }
 0x389   :  { %v2883_v48 = vmax.f32 %v2723_v47, 0.0 }
 0x38a   :  { %v4842_v26 = vpack.c.bf16 %v2885_v50, %v2884_v33 }
 0x38b   :  { %v4836_v53 = vpack.c.bf16 %v2883_v48, %v2882_v4  ;;  %v4674_v29 = vpop.f32.mrb[248].mxu0 }
 0x38c   :  { %v2744_v56 = vadd.f32 %v6119_v44, %v4674_v29  ;;  %v2735_v41 = vpop.f32.mrb[249].mxu0 }
 0x38d   :  { %v2736_v57 = vadd.f32 %v6119_v44, %v2735_v41  ;;  %v4675_v13 = vpop.f32.mrb[250].mxu0 }
 0x38e   :  { %4835 = vmatpush3.bf16.xpose.msk.msra.mxu1 %vm5854_vm2, %v6080_v36  ;;  %v2888_v58 = vmax.f32 %v2744_v56, 0.0  ;;  %v2747_v45 = vadd.f32 %v6119_v44, %v4675_v13  ;;  %v2738_v1 = vpop.f32.mrb[251].mxu0 }
 0x38f   :  { %4838 = vmatprep.subr.msk.bf16.mxu1 %vm5854_vm2, %v4836_v53  ;;  %v2886_v2 = vmax.f32 %v2736_v57, 0.0  ;;  %v2739_v17 = vadd.f32 %v6119_v44, %v2738_v1 }
 0x390   :  { %v2889_v59 = vmax.f32 %v2747_v45, 0.0 }
 0x391   :  { %v2887_v52 = vmax.f32 %v2739_v17, 0.0 }
 0x392   :  { %v4854_v6 = vpack.c.bf16 %v2889_v59, %v2888_v58 }
 0x393   :  { %v4848_v7 = vpack.c.bf16 %v2887_v52, %v2886_v2  ;;  %v4678_v8 = vpop.f32.mrb[252].mxu0 }
 0x394   :  { %v2760_v9 = vadd.f32 %v6119_v44, %v4678_v8  ;;  %v2751_v12 = vpop.f32.mrb[253].mxu0 }
 0x395   :  { %v2752_v36 = vadd.f32 %v6119_v44, %v2751_v12  ;;  %v4679_v10 = vpop.f32.mrb[254].mxu0 }
 0x396   :  { %4841 = vmatpush3.bf16.xpose.msk.msra.mxu1 %vm5854_vm2, %v6095_v55  ;;  %v2892_v11 = vmax.f32 %v2760_v9, 0.0  ;;  %v2763_v14 = vadd.f32 %v6119_v44, %v4679_v10  ;;  %v2754_v15 = vpop.f32.mrb[255].mxu0 }
 0x397   :  { %4844 = vmatprep.subr.msk.bf16.mxu1 %vm5854_vm2, %v4842_v26  ;;  %v2890_v16 = vmax.f32 %v2752_v36, 0.0  ;;  %v2755_v18 = vadd.f32 %v6119_v44, %v2754_v15 }
 0x398   :  { %v2893_v19 = vmax.f32 %v2763_v14, 0.0 }
 0x399   :  { %v2891_v60 = vmax.f32 %v2755_v18, 0.0 }
 0x39a   :  { %v4866_v51 = vpack.c.bf16 %v2893_v19, %v2892_v11 }
 0x39b   :  { %v4860_v35 = vpack.c.bf16 %v2891_v60, %v2890_v16 }
 0x39e   :  { %4847 = vmatpush3.bf16.xpose.msk.msra.mxu1 %vm5854_vm2, %v6093_v54  ;;  %v2901_v54 = vlaneseq }
 0x39f   :  { %4850 = vmatprep.subr.msk.bf16.mxu1 %vm5854_vm2, %v4848_v7 }
 0x3a0   :  { %v2902_v55 = vshrl.u32 %v2901_v54, 7 }
 0x3a6   :  { %4853 = vmatpush3.bf16.xpose.msk.msra.mxu1 %vm5854_vm2, %v6108_v3  ;;  %v2903_v3 = vsub.s32 0, %v2902_v55 }
 0x3a7   :  { %4856 = vmatprep.subr.msk.bf16.mxu1 %vm5854_vm2, %v4854_v6 }
 0x3ae   :  { %4859 = vmatpush3.bf16.xpose.msk.msra.mxu1 %vm5854_vm2, %v6106_v62  ;;  %v2899_v62 = vpop.permute.xlu0 %2898 }
 0x3af   :  { %4862 = vmatprep.subr.msk.bf16.mxu1 %vm5854_vm2, %v4860_v35  ;;  %v2904_v44 = vrot.slane %v2899_v62, %v2903_v3 }
 0x3b6   :  { %4865 = vmatpush3.bf16.xpose.msk.msra.mxu1 %vm5854_vm2, %v6126_v46  ;;  %v4919_v46 = vmov 1966171168  }
 0x3b7   :  { %4868 = vmatprep.subr.msk.bf16.mxu1 %vm5854_vm2, %v4866_v51  ;;  %v3589_v34 = vunpack.c.l.s4 %v4919_v46 }
 0x3b9   :  { %v3590_v22 = vunpack.c.0.s8 %v3589_v34 }
 0x3bb   :  { %v3593_v49 = vsub.s32 %v3590_v22, %v2902_v55 }
 0x3be   :  { %4871 = vmatpush3.bf16.xpose.msk.msra.mxu1 %vm5854_vm2, %v6124_v20 }
 0x3c5   :  { %4267 = vmatmul.mubr.msk.f32.vlgmr.msra.gmra.mrb[134].mxu1 %vm251_vm0, %v4893_v31 }
 0x3d8   :  { %v3358_v0 = vpop.f32.mrb[128].mxu1 }
 0x3d9   :  { %v3360_v21 = vpop.f32.mrb[129].mxu1  ;;  %v3359_v23 = vadd.f32 %v3358_v0, %v2904_v44 }
 0x3da   :  { %v3361_v27 = vadd.f32 %v3360_v21, %v2904_v44 }
 0x3dc   :  { %v3584_v24 = vcombine.low %v3359_v23, %v3361_v27 }
 0x3de   :  { %v3594_v5 = vrot.slane %v3584_v24, %v3593_v49 }
 0x418   :  { %v3429_v63 = vpop.f32.mrb[130].mxu1 }
 0x419   :  { %v3431_v37 = vpop.f32.mrb[131].mxu1  ;;  %v3430_v28 = vadd.f32 %v3429_v63, %v2904_v44 }
 0x41a   :  { %v3432_v20 = vadd.f32 %v3431_v37, %v2904_v44 }
 0x41c   :  { %v3585_v38 = vcombine.low %v3430_v28, %v3432_v20 }
 0x41e   :  { %v3601_v30 = vrot.slane %v3585_v38, %v3593_v49 }
 0x420   :  { %v3616_v32 = vcombine.low %v3594_v5, %v3601_v30 }
 0x422   :  { %v3624_v53 = vrot.slane %v3616_v32, %v3593_v49 }
 0x458   :  { %v3500_v39 = vpop.f32.mrb[132].mxu1 }
 0x459   :  { %v3501_v40 = vadd.f32 %v3500_v39, %v2904_v44  ;;  %v3502_v31 = vpop.f32.mrb[133].mxu1 }
 0x45a   :  { %v3503_v25 = vadd.f32 %v3502_v31, %v2904_v44 }
 0x45c   :  { %v3586_v42 = vcombine.low %v3501_v40, %v3503_v25 }
 0x45e   :  { %v3608_v4 = vrot.slane %v3586_v42, %v3593_v49 }
 0x498   :  { %v3571_v61 = vpop.f32.mrb[134].mxu1 }
 0x499   :  { %v3572_v43 = vadd.f32 %v3571_v61, %v2904_v44  ;;  %v3573_v47 = vpop.f32.mrb[135].mxu1 }
 0x49a   :  { %v3574_v33 = vadd.f32 %v3573_v47, %v2904_v44 }
 0x49c   :  { %v3587_v50 = vcombine.low %v3572_v43, %v3574_v33 }
 0x49e   :  { %v3615_v48 = vrot.slane %v3587_v50, %v3593_v49 }
 0x4a0   :  { %v3617_v26 = vcombine.low %v3608_v4, %v3615_v48 }
 0x4a2   :  { %v3631_v29 = vrot.slane %v3617_v26, %v3593_v49 }
 0x4a4   :  { %v3632_v56 = vcombine.low %v3624_v53, %v3631_v29 }
 0x4a6   :  { %3634 = vst [vmem:[#allocation3] sm:$0xff] %v3632_v56 }
 0x4a7   :  { %4905 = shalt.err (!%p4902_p4)
}
 0x4a8   :  { %s4906_s24 = scalar_lea.hbm %s6214_s9, 128 }
 0x4a9   :  { %p4907_p5 = scmp.ne.s32.totalorder %s6214_s9, %s4906_s24  ;;  %p4910_p6 = scmp.lt.u32.totalorder %s4906_s24, %s6214_s9 }
 0x4ab   :  { %p4912_p7 = pnand %p4910_p6, %p4907_p5 }
 0x4ad   :  { %4915 = shalt.err (!%p4912_p7)
}
 0x4ae   :  { %3644 = dma.vmem_to_hbm [thread:$0]  %s3642_s1, 128, %s6214_s9, [#allocation4]  }
 0x4af   :  { %4916 = dma.done.wait [#allocation4], 128  }
 0x4b0   :  { %4917 = vsyncadd [#allocation4], 4294967168 }
 0x4b1   :  { %3648 = vsyncpa [#allocation4], 1 }

</bundles_post_ra>
